<compile_context>
chip_gen: v5e
topology: v5e:2x2
jax: 0.10.0
libtpu: 0.0.40
codegen_flags: <defaults>
</compile_context>

<pallas_src>
import functools
import math

import jax
import jax.numpy as jnp
from jax import lax
from jax.experimental import pallas as pl
from jax.experimental.pallas import tpu as pltpu

_VMEM_LIMIT = 64 * 1024 * 1024   # explicit scoped-VMEM budget (review item)


def _round_up(x, m):
    return ((x + m - 1) // m) * m


def _pick_div(n, max_t, mult=8):
    """Largest divisor of n that is <= max_t and a multiple of `mult`; else n."""
    for d in range(min(n, max_t), 0, -1):
        if n % d == 0 and d % mult == 0:
            return d
    return n


# ----------------------------------------------------------------------------
# Fused LayerNorm + Linear (ln_1 + in_proj)
# ----------------------------------------------------------------------------

def _ln_matmul_kernel(x_ref, g_ref, b_ref, w_ref, o_ref, *, eps):
    x = x_ref[...]                                   # (tm, D) f32
    mu = jnp.mean(x, axis=-1, keepdims=True)
    xc = x - mu
    var = jnp.mean(xc * xc, axis=-1, keepdims=True)
    xn = xc * lax.rsqrt(var + eps) * g_ref[...] + b_ref[...]
    o_ref[...] = jnp.dot(xn.astype(jnp.bfloat16), w_ref[...],
                         preferred_element_type=jnp.float32)


def pallas_ln_matmul(x, g, b, w, *, eps):
    """LayerNorm(x) @ w.  x: (M, D) f32, w: (D, N) -> (M, N) f32."""
    M, D = x.shape
    N = w.shape[1]
    Np = _round_up(N, 128)                           # lane-dense output stores
    tm = min(_round_up(M, 8), 256)
    Mp = _round_up(M, tm)
    xpad = jnp.pad(x, ((0, Mp - M), (0, 0))) if Mp != M else x
    wpad = jnp.pad(w, ((0, 0), (0, Np - N))) if Np != N else w
    out = pl.pallas_call(
        functools.partial(_ln_matmul_kernel, eps=eps),
        out_shape=jax.ShapeDtypeStruct((Mp, Np), jnp.float32),
        grid_spec=pltpu.PrefetchScalarGridSpec(
            num_scalar_prefetch=0,
            grid=(Mp // tm,),
            in_specs=[
                pl.BlockSpec((tm, D), lambda i: (i, 0)),
                pl.BlockSpec((1, D), lambda i: (0, 0)),
                pl.BlockSpec((1, D), lambda i: (0, 0)),
                pl.BlockSpec((D, Np), lambda i: (0, 0)),
            ],
            out_specs=pl.BlockSpec((tm, Np), lambda i: (i, 0)),
        ),
        compiler_params=pltpu.CompilerParams(
            dimension_semantics=("parallel",),
            vmem_limit_bytes=_VMEM_LIMIT),
    )(xpad.astype(jnp.float32),
      g.reshape(1, D).astype(jnp.float32),
      b.reshape(1, D).astype(jnp.float32),
      wpad.astype(jnp.bfloat16))
    return out[:M, :N]


# ----------------------------------------------------------------------------
# Depthwise 3x3 conv + SiLU (NHWC), tiled over (batch, channel blocks)
# ----------------------------------------------------------------------------

def _dwconv_silu_kernel(x_ref, w_ref, b_ref, o_ref, *, H, W):
    acc = jnp.zeros(o_ref.shape, jnp.float32)
    for dh in range(3):
        for dw in range(3):
            acc = acc + x_ref[:, dh:dh + H, dw:dw + W, :] * w_ref[dh, dw]
    acc = acc + b_ref[...]
    o_ref[...] = acc * jax.nn.sigmoid(acc)           # SiLU


def pallas_dwconv3x3_silu(x_nhwc, w_dw, bias):
    # x_nhwc: (B,H,W,C); w_dw: (C,1,3,3) torch depthwise layout; bias: (C,)
    B, H, W, C = x_nhwc.shape
    tc = 128 if C % 128 == 0 else C
    xpad = jnp.pad(x_nhwc, ((0, 0), (1, 1), (1, 1), (0, 0)))
    w_hw1c = jnp.transpose(w_dw, (2, 3, 1, 0))       # (3,3,1,C)
    # TODO(synk): add H-row tiling with a 1-row halo for very large H*W*C images.
    return pl.pallas_call(
        functools.partial(_dwconv_silu_kernel, H=H, W=W),
        out_shape=jax.ShapeDtypeStruct((B, H, W, C), jnp.float32),
        grid_spec=pltpu.PrefetchScalarGridSpec(
            num_scalar_prefetch=0,
            grid=(B, C // tc),
            in_specs=[
                pl.BlockSpec((1, H + 2, W + 2, tc), lambda b, c: (b, 0, 0, c)),
                pl.BlockSpec((3, 3, 1, tc), lambda b, c: (0, 0, 0, c)),
                pl.BlockSpec((1, tc), lambda b, c: (0, c)),
            ],
            out_specs=pl.BlockSpec((1, H, W, tc), lambda b, c: (b, 0, 0, c)),
        ),
        compiler_params=pltpu.CompilerParams(
            dimension_semantics=("parallel", "parallel"),
            vmem_limit_bytes=_VMEM_LIMIT),
    )(xpad.astype(jnp.float32), w_hw1c.astype(jnp.float32),
      bias.reshape(1, C).astype(jnp.float32))


# ----------------------------------------------------------------------------
# Per-direction projection: einsum('b k l d, k d c -> b k l c') in ONE gridded call
# ----------------------------------------------------------------------------

def _bk_matmul_kernel(x_ref, w_ref, o_ref):
    o_ref[0, 0] = jnp.dot(x_ref[0, 0], w_ref[0],
                          preferred_element_type=jnp.float32)


def pallas_bk_matmul(x, w, *, max_tl=512):
    """x: (B, K, L, d), w: (K, d, c) -> (B, K, L, c) f32 (bf16 MXU, f32 acc)."""
    B, K, L, d = x.shape
    c = w.shape[2]
    dp = _round_up(d, 128)
    cp = _round_up(c, 128)                            # lane-dense output
    TL = _pick_div(L, max_tl, 8)
    xp = jnp.pad(x, ((0, 0), (0, 0), (0, 0), (0, dp - d))) if dp != d else x
    wp = jnp.pad(w, ((0, 0), (0, dp - d), (0, cp - c))) if (dp != d or cp != c) else w
    out = pl.pallas_call(
        _bk_matmul_kernel,
        out_shape=jax.ShapeDtypeStruct((B, K, L, cp), jnp.float32),
        grid_spec=pltpu.PrefetchScalarGridSpec(
            num_scalar_prefetch=0,
            grid=(B, K, L // TL),
            in_specs=[
                pl.BlockSpec((1, 1, TL, dp), lambda b, k, t: (b, k, t, 0)),
                pl.BlockSpec((1, dp, cp), lambda b, k, t: (k, 0, 0)),
            ],
            out_specs=pl.BlockSpec((1, 1, TL, cp), lambda b, k, t: (b, k, t, 0)),
        ),
        compiler_params=pltpu.CompilerParams(
            dimension_semantics=("parallel", "parallel", "parallel"),
            vmem_limit_bytes=_VMEM_LIMIT),
    )(xp.astype(jnp.bfloat16), wp.astype(jnp.bfloat16))
    return out[..., :c]


# ----------------------------------------------------------------------------
# Selective scan: one (batch*direction) per grid cell, L-tiled, grouped B/C
# ----------------------------------------------------------------------------

def _selective_scan_kernel(u_ref, dt_ref, A_ref, Bg_ref, Cg_ref, D_ref, b_ref,
                           y_ref, h_ref, *, N, TL, CH):
    """Block shapes:
       u_ref, dt_ref, y_ref : (1, TL, G)
       A_ref                : (1, N, G)
       Bg_ref, Cg_ref       : (1, TL, N, 1)  -- grouped B/C, never expanded over G
       D_ref, b_ref         : (1, 1, G)
       h_ref (VMEM scratch) : (N, G), carried across L-tiles.
    """
    @pl.when(pl.program_id(1) == 0)
    def _init():
        h_ref[...] = jnp.zeros_like(h_ref)

    A = A_ref[0]            # (N, G)
    Dp = D_ref[0]           # (1, G)
    bias = b_ref[0]         # (1, G)

    def chunk_body(c, h):
        base = pl.multiple_of(c * CH, CH)
        ys = []
        for i in range(CH):                      # unrolled: overlaps EUP/VPU latency
            l = base + i
            u_l = u_ref[0, pl.ds(l, 1), :]                       # (1, G)
            t = dt_ref[0, pl.ds(l, 1), :] + bias                 # (1, G)
            # stable softplus (delta_softplus=True)
            dt = jnp.maximum(t, 0.0) + jnp.log(1.0 + jnp.exp(-jnp.abs(t)))
            B_l = Bg_ref[0, pl.ds(l, 1), :, :].reshape(N, 1)     # (N, 1)
            C_l = Cg_ref[0, pl.ds(l, 1), :, :].reshape(N, 1)     # (N, 1)
            dA = jnp.exp(dt * A)                                 # (N, G)
            h = dA * h + B_l * (dt * u_l)                        # (N, G)
            ys.append(jnp.sum(C_l * h, axis=0, keepdims=True) + Dp * u_l)
        y_blk = ys[0] if CH == 1 else jnp.concatenate(ys, axis=0)
        y_ref[0, pl.ds(base, CH), :] = y_blk                     # (CH, G) aligned store
        return h

    h_ref[...] = lax.fori_loop(0, TL // CH, chunk_body, h_ref[...])


def pallas_selective_scan(u, delta, A_k, Bg, Cg, D_k, bias_k, *, max_tl=128):
    """selective_scan_fn_v1 semantics (delta_softplus=True), per direction.

    u, delta : (B, K, L, G);  A_k: (K, N, G) = -exp(A_logs) per direction
    Bg, Cg   : (B, K, L, N)   grouped B/C (one per direction)
    D_k, bias_k : (K, G).     Returns y: (B, K, L, G) float32.
    """
    B, K, L, G = u.shape
    N = A_k.shape[1]
    BK = B * K
    TL = _pick_div(L, max_tl, 8)
    CH = 8 if TL % 8 == 0 else 1
    nlt = L // TL

    u_f = u.reshape(BK, L, G).astype(jnp.float32)
    d_f = delta.reshape(BK, L, G).astype(jnp.float32)
    B_f = Bg.reshape(BK, L, N)[..., None].astype(jnp.float32)     # (BK, L, N, 1)
    C_f = Cg.reshape(BK, L, N)[..., None].astype(jnp.float32)
    A_f = jnp.tile(A_k.astype(jnp.float32), (B, 1, 1))            # (BK, N, G)
    D_f = jnp.tile(D_k.reshape(K, 1, G).astype(jnp.float32), (B, 1, 1))
    b_f = jnp.tile(bias_k.reshape(K, 1, G).astype(jnp.float32), (B, 1, 1))

    kernel = functools.partial(_selective_scan_kernel, N=N, TL=TL, CH=CH)
    y = pl.pallas_call(
        kernel,
        out_shape=jax.ShapeDtypeStruct((BK, L, G), jnp.float32),
        grid_spec=pltpu.PrefetchScalarGridSpec(
            num_scalar_prefetch=0,
            grid=(BK, nlt),
            in_specs=[
                pl.BlockSpec((1, TL, G), lambda i, t: (i, t, 0)),
                pl.BlockSpec((1, TL, G), lambda i, t: (i, t, 0)),
                pl.BlockSpec((1, N, G), lambda i, t: (i, 0, 0)),
                pl.BlockSpec((1, TL, N, 1), lambda i, t: (i, t, 0, 0)),
                pl.BlockSpec((1, TL, N, 1), lambda i, t: (i, t, 0, 0)),
                pl.BlockSpec((1, 1, G), lambda i, t: (i, 0, 0)),
                pl.BlockSpec((1, 1, G), lambda i, t: (i, 0, 0)),
            ],
            out_specs=pl.BlockSpec((1, TL, G), lambda i, t: (i, t, 0)),
            scratch_shapes=[pltpu.VMEM((N, G), jnp.float32)],
        ),
        compiler_params=pltpu.CompilerParams(
            dimension_semantics=("parallel", "arbitrary"),
            vmem_limit_bytes=_VMEM_LIMIT),
    )(u_f, d_f, A_f, B_f, C_f, D_f, b_f)
    return y.reshape(B, K, L, G)


# ----------------------------------------------------------------------------
# Fused out_norm + SiLU(z) gate + global-average-pool partial sums
# ----------------------------------------------------------------------------

def _norm_gate_pool_kernel(y_ref, z_ref, g_ref, b_ref, o_ref, p_ref, *, eps):
    @pl.when(pl.program_id(1) == 0)
    def _init():
        p_ref[...] = jnp.zeros_like(p_ref)
    y = y_ref[0]                                     # (tl, C)
    mu = jnp.mean(y, axis=-1, keepdims=True)
    yc = y - mu
    var = jnp.mean(yc * yc, axis=-1, keepdims=True)
    yn = yc * lax.rsqrt(var + eps) * g_ref[...] + b_ref[...]
    z = z_ref[0]
    yg = yn * (z * jax.nn.sigmoid(z))                # y * SiLU(z)
    o_ref[0] = yg
    p_ref[0] = p_ref[0] + jnp.sum(yg, axis=0, keepdims=True)


def pallas_norm_gate_pool(y, z, g, b, *, eps):
    """y, z: (B, L, C) -> (gated (B,L,C), pool_sum (B,1,C))."""
    B, L, C = y.shape
    tl = _pick_div(L, 512, 8)
    return pl.pallas_call(
        functools.partial(_norm_gate_pool_kernel, eps=eps),
        out_shape=(jax.ShapeDtypeStruct((B, L, C), jnp.float32),
                   jax.ShapeDtypeStruct((B, 1, C), jnp.float32)),
        grid_spec=pltpu.PrefetchScalarGridSpec(
            num_scalar_prefetch=0,
            grid=(B, L // tl),
            in_specs=[
                pl.BlockSpec((1, tl, C), lambda bb, t: (bb, t, 0)),
                pl.BlockSpec((1, tl, C), lambda bb, t: (bb, t, 0)),
                pl.BlockSpec((1, C), lambda bb, t: (0, 0)),
                pl.BlockSpec((1, C), lambda bb, t: (0, 0)),
            ],
            out_specs=[
                pl.BlockSpec((1, tl, C), lambda bb, t: (bb, t, 0)),
                pl.BlockSpec((1, 1, C), lambda bb, t: (bb, 0, 0)),
            ],
        ),
        compiler_params=pltpu.CompilerParams(
            dimension_semantics=("parallel", "arbitrary"),
            vmem_limit_bytes=_VMEM_LIMIT),
    )(y.astype(jnp.float32), z.astype(jnp.float32),
      g.reshape(1, C).astype(jnp.float32), b.reshape(1, C).astype(jnp.float32))


# ----------------------------------------------------------------------------
# Fused channel gate + out_proj + residual add
# ----------------------------------------------------------------------------

def _gate_proj_res_kernel(y_ref, c_ref, w_ref, r_ref, o_ref):
    yg = y_ref[0] * (1.0 + c_ref[0])                 # y + y*c == y*(1+c)
    o_ref[0] = jnp.dot(yg.astype(jnp.bfloat16), w_ref[...],
                       preferred_element_type=jnp.float32) + r_ref[0]


def pallas_gate_proj_residual(y, c, w, x_res):
    """y: (B,L,Ci), c: (B,Ci), w: (Ci,Co), x_res: (B,L,Co) -> (B,L,Co) f32."""
    B, L, Ci = y.shape
    Co = w.shape[1]
    tl = _pick_div(L, 512, 8)
    # (output width Co = d_model < 128 here; left un-padded — masked stores are
    #  negligible at this size, and padding would also force padding the residual.)
    return pl.pallas_call(
        _gate_proj_res_kernel,
        out_shape=jax.ShapeDtypeStruct((B, L, Co), jnp.float32),
        grid_spec=pltpu.PrefetchScalarGridSpec(
            num_scalar_prefetch=0,
            grid=(B, L // tl),
            in_specs=[
                pl.BlockSpec((1, tl, Ci), lambda bb, t: (bb, t, 0)),
                pl.BlockSpec((1, 1, Ci), lambda bb, t: (bb, 0, 0)),
                pl.BlockSpec((Ci, Co), lambda bb, t: (0, 0)),
                pl.BlockSpec((1, tl, Co), lambda bb, t: (bb, t, 0)),
            ],
            out_specs=pl.BlockSpec((1, tl, Co), lambda bb, t: (bb, t, 0)),
        ),
        compiler_params=pltpu.CompilerParams(
            dimension_semantics=("parallel", "parallel"),
            vmem_limit_bytes=_VMEM_LIMIT),
    )(y.astype(jnp.float32), c.reshape(B, 1, Ci).astype(jnp.float32),
      w.astype(jnp.bfloat16), x_res.astype(jnp.float32))


# ----------------------------------------------------------------------------
# Channel-direction SSM (cforward_corev1) — tiny, kept in plain JAX (per review)
# ----------------------------------------------------------------------------

def _selective_scan_ref(u, delta, A, Bg, Cg, D, delta_bias):
    """Plain-JAX reference selective scan (delta_softplus=True).
    u, delta: (Bb, Dd, L); A: (Dd, N); Bg, Cg: (Bb, K, N, L); D, delta_bias: (Dd,)."""
    Bb, Dd, L = u.shape
    K = Bg.shape[1]
    G = Dd // K
    N = A.shape[1]
    dt = jax.nn.softplus(delta + delta_bias[None, :, None])
    Bx = jnp.repeat(Bg, G, axis=1)                   # (Bb, Dd, N, L), k-major channels
    Cx = jnp.repeat(Cg, G, axis=1)
    dA = jnp.exp(dt[:, :, None, :] * A[None, :, :, None])
    dBu = (dt * u)[:, :, None, :] * Bx

    def step(h, t):
        dA_t, dBu_t, C_t = t
        h = dA_t * h + dBu_t
        y = jnp.sum(C_t * h, axis=-1)
        return h, y

    h0 = jnp.zeros((Bb, Dd, N), jnp.float32)
    _, ys = lax.scan(step, h0, (jnp.moveaxis(dA, -1, 0),
                                jnp.moveaxis(dBu, -1, 0),
                                jnp.moveaxis(Cx, -1, 0)))
    return jnp.moveaxis(ys, 0, -1) + D[None, :, None] * u


def _channel_ssm(pool, p):
    """cforward_corev1 on pooled features. pool: (B, d_inner) -> c: (B, d_inner)."""
    B, Lc = pool.shape
    dc_inner, dtc_rank, dc_state, KC = 4, 6, 16, 2
    w_cin = p['conv_cin_w'].reshape(dc_inner)
    xc = pool[:, None, :] * w_cin[None, :, None] + p['conv_cin_b'][None, :, None]
    xsc = jnp.stack([xc, jnp.flip(xc, axis=-1)], axis=1)              # (B,2,4,Lc)
    xc_dbl = jnp.einsum('bkdl,kcd->bkcl', xsc, p['xc_proj_weight'])
    dts = xc_dbl[:, :, :dtc_rank, :]
    Bsc = xc_dbl[:, :, dtc_rank:dtc_rank + dc_state, :]
    Csc = xc_dbl[:, :, dtc_rank + dc_state:, :]
    dts = jnp.einsum('bkrl,kdr->bkdl', dts, p['dtc_projs_weight'])
    u = xsc.reshape(B, KC * dc_inner, Lc).astype(jnp.float32)
    delta = dts.reshape(B, KC * dc_inner, Lc).astype(jnp.float32)
    Ac = -jnp.exp(p['Ac_logs'].astype(jnp.float32))
    out_y = _selective_scan_ref(u, delta, Ac, Bsc, Csc,
                                p['Dsc'].astype(jnp.float32),
                                p['dtc_projs_bias'].reshape(-1).astype(jnp.float32))
    out_y = out_y.reshape(B, KC, dc_inner, Lc)
    yc = out_y[:, 0] + jnp.flip(out_y[:, 1], axis=-1)                 # (B,4,Lc)
    w_cout = p['conv_cout_w'].reshape(dc_inner)
    yc2 = jnp.einsum('bjl,j->bl', yc, w_cout) + p['conv_cout_b'][0]   # (B, Lc)
    mu = jnp.mean(yc2, axis=-1, keepdims=True)
    var = jnp.mean((yc2 - mu) ** 2, axis=-1, keepdims=True)
    return (yc2 - mu) * lax.rsqrt(var + 1e-5) * p['channel_norm_w'] + p['channel_norm_b']


# ----------------------------------------------------------------------------
# VSSBlock forward
# ----------------------------------------------------------------------------

def vss_block_forward(x, p):
    B, H, W, d_model = x.shape
    L = H * W
    d_inner = p['in_proj_w'].shape[0] // 2
    d_state = p['A_logs'].shape[1]
    dt_rank = p['dt_projs_weight'].shape[2]
    K = 4

    # ---- ln_1 fused with in_proj ----
    xz = pallas_ln_matmul(x.reshape(B * L, d_model), p['ln1_w'], p['ln1_b'],
                          jnp.transpose(p['in_proj_w']), eps=1e-6)
    xz = xz.reshape(B, H, W, 2 * d_inner)
    xp_, z = xz[..., :d_inner], xz[..., d_inner:]

    # ---- depthwise 3x3 conv + SiLU ----
    xconv = pallas_dwconv3x3_silu(xp_, p['conv_w'], p['conv_b'])      # (B,H,W,d_inner)

    # ---- cross-scan in (B, K, L, d) layout ----
    x_hw = xconv.reshape(B, L, d_inner)                               # l = h*W + w
    x_wh = jnp.transpose(xconv, (0, 2, 1, 3)).reshape(B, L, d_inner)  # l = w*H + h
    xs = jnp.stack([x_hw, x_wh,
                    jnp.flip(x_hw, axis=1), jnp.flip(x_wh, axis=1)], axis=1)

    # ---- x_proj / dt_proj for all 4 directions in one gridded call each ----
    x_dbl = pallas_bk_matmul(xs, jnp.transpose(p['x_proj_weight'], (0, 2, 1)))
    dts_r = x_dbl[..., :dt_rank]
    Bs = x_dbl[..., dt_rank:dt_rank + d_state]                        # (B,4,L,N)
    Cs = x_dbl[..., dt_rank + d_state:dt_rank + 2 * d_state]
    dts = pallas_bk_matmul(dts_r, jnp.transpose(p['dt_projs_weight'], (0, 2, 1)))

    # ---- selective scan (grouped B/C, one direction per grid cell) ----
    A_full = -jnp.exp(p['A_logs'].astype(jnp.float32))                # (K*d, N)
    A_k = jnp.transpose(A_full.reshape(K, d_inner, d_state), (0, 2, 1))   # (K,N,d)
    D_k = p['Ds'].reshape(K, d_inner)
    bias_k = p['dt_projs_bias'].reshape(K, d_inner)
    out_y = pallas_selective_scan(xs, dts, A_k, Bs, Cs, D_k, bias_k)  # (B,4,L,d)

    # ---- merge the 4 scan directions ----
    def wh_to_hw(t):      # (B, L, d) with l=w*H+h  ->  l=h*W+w
        return jnp.transpose(t.reshape(B, W, H, d_inner), (0, 2, 1, 3)).reshape(B, L, d_inner)
    y_dir = (out_y[:, 0]
             + wh_to_hw(out_y[:, 1])
             + jnp.flip(out_y[:, 2], axis=1)
             + wh_to_hw(jnp.flip(out_y[:, 3], axis=1)))               # (B,L,d_inner)

    # ---- out_norm + SiLU(z) gate + pooled partial sums (fused) ----
    y_gated, pool_sum = pallas_norm_gate_pool(
        y_dir, z.reshape(B, L, d_inner), p['out_norm_w'], p['out_norm_b'], eps=1e-5)
    pool = pool_sum.reshape(B, d_inner) / float(L)

    # ---- channel-direction SSM (tiny; plain JAX) ----
    c = _channel_ssm(pool, p)                                         # (B, d_inner)

    # ---- channel gate + out_proj + residual (fused) ----
    out = pallas_gate_proj_residual(y_gated, c, jnp.transpose(p['out_proj_w']),
                                    x.reshape(B, L, d_model))
    return out.reshape(B, H, W, d_model)


# ----------------------------------------------------------------------------
# Deterministic parameter construction (shapes per SS2D_1.__init__)
# ----------------------------------------------------------------------------

def init_params(key, d_model=32, d_state=16, ssm_ratio=2):
    d_inner = int(ssm_ratio * d_model)
    dt_rank = math.ceil(d_model / 16)
    K = 4
    dc_inner, dtc_rank, dc_state, KC = 4, 6, 16, 2
    ks = jax.random.split(key, 16)

    def nrm(k, shape, scale):
        return scale * jax.random.normal(k, shape, jnp.float32)

    p = dict(
        ln1_w=jnp.ones((d_model,), jnp.float32),
        ln1_b=jnp.zeros((d_model,), jnp.float32),
        in_proj_w=nrm(ks[0], (2 * d_inner, d_model), 0.05),
        conv_w=nrm(ks[1], (d_inner, 1, 3, 3), 0.1),
        conv_b=nrm(ks[2], (d_inner,), 0.1),
        x_proj_weight=nrm(ks[3], (K, dt_rank + 2 * d_state, d_inner), 0.05),
        dt_projs_weight=nrm(ks[4], (K, d_inner, dt_rank), 0.1),
        dt_projs_bias=nrm(ks[5], (K, d_inner), 0.1),
        A_logs=jnp.broadcast_to(
            jnp.log(jnp.arange(1, d_state + 1, dtype=jnp.float32))[None, :],
            (K * d_inner, d_state)),
        Ds=jnp.ones((K * d_inner,), jnp.float32),
        out_norm_w=jnp.ones((d_inner,), jnp.float32),
        out_norm_b=jnp.zeros((d_inner,), jnp.float32),
        out_proj_w=nrm(ks[6], (d_model, d_inner), 0.05),
        channel_norm_w=jnp.ones((d_inner,), jnp.float32),
        channel_norm_b=jnp.zeros((d_inner,), jnp.float32),
        conv_cin_w=nrm(ks[7], (dc_inner, 1, 1, 1), 0.5),
        conv_cin_b=nrm(ks[8], (dc_inner,), 0.1),
        conv_cout_w=nrm(ks[9], (1, dc_inner, 1, 1), 0.5),
        conv_cout_b=nrm(ks[10], (1,), 0.1),
        xc_proj_weight=nrm(ks[11], (KC, dtc_rank + 2 * dc_state, dc_inner), 0.1),
        Dsc=jnp.ones((KC * dc_inner,), jnp.float32),
        Ac_logs=nrm(ks[12], (KC * dc_inner, dc_state), 0.5),
        dtc_projs_weight=nrm(ks[13], (KC, dc_inner, dtc_rank), 0.2),
        dtc_projs_bias=nrm(ks[14], (KC, dc_inner), 0.2),
    )
    return p


if __name__ == "__main__":
    key = jax.random.PRNGKey(0)
    k_param, k_x = jax.random.split(key)

    B, H, W, hidden_dim = 2, 8, 8, 32
    params = init_params(k_param, d_model=hidden_dim)
    x = jax.random.normal(k_x, (B, H, W, hidden_dim), jnp.float32)

    fwd = jax.jit(vss_block_forward)
    out = fwd(x, params)
    out = jax.block_until_ready(out)

    assert out.shape == (B, H, W, hidden_dim)
    assert bool(jnp.all(jnp.isfinite(out)))
    print("KERNEL_OK")
</pallas_src>

<mosaic_0001>
module attributes {stable_mosaic.version = 11 : i64} {
  func.func @_ln_matmul_kernel(%arg0: i32, %arg1: memref<128x32xf32, #tpu.memory_space<vmem>>, %arg2: memref<1x32xf32, #tpu.memory_space<vmem>>, %arg3: memref<1x32xf32, #tpu.memory_space<vmem>>, %arg4: memref<32x128xbf16, #tpu.memory_space<vmem>>, %arg5: memref<128x128xf32, #tpu.memory_space<vmem>>) attributes {dimension_semantics = [#tpu.dimension_semantics<parallel>], iteration_bounds = array<i64: 1>, scalar_prefetch = 0 : i64, scratch_operands = 0 : i64, tpu.core_type = #tpu.core_type<tc>, window_params = [{transform_indices = @transform_0, window_bounds = array<i64: 128, 32>}, {pipeline_mode = #tpu.pipeline_mode<synchronous>, transform_indices = @transform_1, window_bounds = array<i64: 1, 32>}, {pipeline_mode = #tpu.pipeline_mode<synchronous>, transform_indices = @transform_2, window_bounds = array<i64: 1, 32>}, {pipeline_mode = #tpu.pipeline_mode<synchronous>, transform_indices = @transform_3, window_bounds = array<i64: 32, 128>}, {transform_indices = @transform_4, window_bounds = array<i64: 128, 128>}]} {
    %c0 = arith.constant 0 : index
    %c0_0 = arith.constant 0 : index
    %0 = vector.load %arg1[%c0, %c0_0] : memref<128x32xf32, #tpu.memory_space<vmem>>, vector<128x32xf32>
    %cst = arith.constant dense<0.000000e+00> : vector<128xf32>
    %1 = vector.multi_reduction <add>, %0, %cst [1] : vector<128x32xf32> to vector<128xf32>
    %2 = vector.shape_cast %1 : vector<128xf32> to vector<128x1xf32>
    %cst_1 = arith.constant 3.200000e+01 : f32
    %3 = vector.broadcast %cst_1 : f32 to vector<128x1xf32>
    %4 = arith.divf %2, %3 : vector<128x1xf32>
    %5 = vector.broadcast %4 : vector<128x1xf32> to vector<128x32xf32>
    %6 = arith.subf %0, %5 : vector<128x32xf32>
    %7 = arith.mulf %6, %6 : vector<128x32xf32>
    %cst_2 = arith.constant dense<0.000000e+00> : vector<128xf32>
    %8 = vector.multi_reduction <add>, %7, %cst_2 [1] : vector<128x32xf32> to vector<128xf32>
    %9 = vector.shape_cast %8 : vector<128xf32> to vector<128x1xf32>
    %cst_3 = arith.constant 3.200000e+01 : f32
    %10 = vector.broadcast %cst_3 : f32 to vector<128x1xf32>
    %11 = arith.divf %9, %10 : vector<128x1xf32>
    %cst_4 = arith.constant 9.99999997E-7 : f32
    %12 = vector.broadcast %cst_4 : f32 to vector<128x1xf32>
    %13 = arith.addf %11, %12 : vector<128x1xf32>
    %14 = math.rsqrt %13 : vector<128x1xf32>
    %15 = vector.broadcast %14 : vector<128x1xf32> to vector<128x32xf32>
    %16 = arith.mulf %6, %15 : vector<128x32xf32>
    %c0_5 = arith.constant 0 : index
    %c0_6 = arith.constant 0 : index
    %17 = vector.load %arg2[%c0_5, %c0_6] : memref<1x32xf32, #tpu.memory_space<vmem>>, vector<1x32xf32>
    %18 = vector.broadcast %17 : vector<1x32xf32> to vector<128x32xf32>
    %19 = arith.mulf %16, %18 : vector<128x32xf32>
    %c0_7 = arith.constant 0 : index
    %c0_8 = arith.constant 0 : index
    %20 = vector.load %arg3[%c0_7, %c0_8] : memref<1x32xf32, #tpu.memory_space<vmem>>, vector<1x32xf32>
    %21 = vector.broadcast %20 : vector<1x32xf32> to vector<128x32xf32>
    %22 = arith.addf %19, %21 : vector<128x32xf32>
    %23 = arith.truncf %22 : vector<128x32xf32> to vector<128x32xbf16>
    %c0_9 = arith.constant 0 : index
    %c0_10 = arith.constant 0 : index
    %24 = vector.load %arg4[%c0_9, %c0_10] : memref<32x128xbf16, #tpu.memory_space<vmem>>, vector<32x128xbf16>
    %cst_11 = arith.constant dense<0.000000e+00> : vector<128x128xf32>
    %25 = tpu.matmul %23, %24, %cst_11 {dimension_numbers = #tpu.dot_dimension_numbers<[1], [0], [0], [1], [0, 0, 1, 1], [], []>} : vector<128x32xbf16>, vector<32x128xbf16>, vector<128x128xf32> -> vector<128x128xf32>
    %c0_12 = arith.constant 0 : index
    %c0_13 = arith.constant 0 : index
    %26 = vector.load %arg5[%c0_12, %c0_13] : memref<128x128xf32, #tpu.memory_space<vmem>>, vector<128x128xf32>
    tpu.vector_store %arg5[%c0_12, %c0_13], %25 {strides = array<i32>} : memref<128x128xf32, #tpu.memory_space<vmem>>, vector<128x128xf32>,
    return
  }
  func.func @transform_0(%arg0: i32) -> (i32, i32) {
    %c0_i32 = arith.constant 0 : i32
    %c0_i32_0 = arith.constant 0 : i32
    return %arg0, %c0_i32 : i32, i32
  }
  func.func @transform_1(%arg0: i32) -> (i32, i32) {
    %c0_i32 = arith.constant 0 : i32
    %c0_i32_0 = arith.constant 0 : i32
    %c0_i32_1 = arith.constant 0 : i32
    return %c0_i32, %c0_i32_0 : i32, i32
  }
  func.func @transform_2(%arg0: i32) -> (i32, i32) {
    %c0_i32 = arith.constant 0 : i32
    %c0_i32_0 = arith.constant 0 : i32
    %c0_i32_1 = arith.constant 0 : i32
    return %c0_i32, %c0_i32_0 : i32, i32
  }
  func.func @transform_3(%arg0: i32) -> (i32, i32) {
    %c0_i32 = arith.constant 0 : i32
    %c0_i32_0 = arith.constant 0 : i32
    %c0_i32_1 = arith.constant 0 : i32
    return %c0_i32, %c0_i32_0 : i32, i32
  }
  func.func @transform_4(%arg0: i32) -> (i32, i32) {
    %c0_i32 = arith.constant 0 : i32
    %c0_i32_0 = arith.constant 0 : i32
    return %arg0, %c0_i32 : i32, i32
  }
}

module attributes {stable_mosaic.version = 11 : i64} {
  func.func @_dwconv_silu_kernel(%arg0: i32, %arg1: i32, %arg2: memref<1x10x10x64xf32, #tpu.memory_space<vmem>>, %arg3: memref<3x3x1x64xf32, #tpu.memory_space<vmem>>, %arg4: memref<1x64xf32, #tpu.memory_space<vmem>>, %arg5: memref<1x8x8x64xf32, #tpu.memory_space<vmem>>) attributes {dimension_semantics = [#tpu.dimension_semantics<parallel>, #tpu.dimension_semantics<parallel>], iteration_bounds = array<i64: 2, 1>, scalar_prefetch = 0 : i64, scratch_operands = 0 : i64, tpu.core_type = #tpu.core_type<tc>, window_params = [{transform_indices = @transform_0, window_bounds = array<i64: 1, 10, 10, 64>}, {transform_indices = @transform_1, window_bounds = array<i64: 3, 3, 1, 64>}, {transform_indices = @transform_2, window_bounds = array<i64: 1, 64>}, {transform_indices = @transform_3, window_bounds = array<i64: 1, 8, 8, 64>}]} {
    %cst = arith.constant 0.000000e+00 : f32
    %0 = vector.broadcast %cst : f32 to vector<1x8x8x64xf32>
    %c0 = arith.constant 0 : index
    %c0_0 = arith.constant 0 : index
    %c0_1 = arith.constant 0 : index
    %c0_2 = arith.constant 0 : index
    %1 = vector.load %arg2[%c0, %c0_0, %c0_1, %c0_2] : memref<1x10x10x64xf32, #tpu.memory_space<vmem>>, vector<1x8x8x64xf32>
    %c0_3 = arith.constant 0 : index
    %c0_4 = arith.constant 0 : index
    %c0_5 = arith.constant 0 : index
    %c0_6 = arith.constant 0 : index
    %2 = vector.load %arg3[%c0_3, %c0_4, %c0_5, %c0_6] : memref<3x3x1x64xf32, #tpu.memory_space<vmem>>, vector<1x1x1x64xf32>
    %3 = vector.shape_cast %2 : vector<1x1x1x64xf32> to vector<1x64xf32>
    %4 = vector.shape_cast %3 : vector<1x64xf32> to vector<1x1x1x64xf32>
    %5 = vector.broadcast %4 : vector<1x1x1x64xf32> to vector<1x8x8x64xf32>
    %6 = arith.mulf %1, %5 : vector<1x8x8x64xf32>
    %7 = arith.addf %0, %6 : vector<1x8x8x64xf32>
    %c0_7 = arith.constant 0 : index
    %c0_8 = arith.constant 0 : index
    %c1 = arith.constant 1 : index
    %c0_9 = arith.constant 0 : index
    %8 = vector.load %arg2[%c0_7, %c0_8, %c1, %c0_9] : memref<1x10x10x64xf32, #tpu.memory_space<vmem>>, vector<1x8x8x64xf32>
    %c0_10 = arith.constant 0 : index
    %c1_11 = arith.constant 1 : index
    %c0_12 = arith.constant 0 : index
    %c0_13 = arith.constant 0 : index
    %9 = vector.load %arg3[%c0_10, %c1_11, %c0_12, %c0_13] : memref<3x3x1x64xf32, #tpu.memory_space<vmem>>, vector<1x1x1x64xf32>
    %10 = vector.shape_cast %9 : vector<1x1x1x64xf32> to vector<1x64xf32>
    %11 = vector.shape_cast %10 : vector<1x64xf32> to vector<1x1x1x64xf32>
    %12 = vector.broadcast %11 : vector<1x1x1x64xf32> to vector<1x8x8x64xf32>
    %13 = arith.mulf %8, %12 : vector<1x8x8x64xf32>
    %14 = arith.addf %7, %13 : vector<1x8x8x64xf32>
    %c0_14 = arith.constant 0 : index
    %c0_15 = arith.constant 0 : index
    %c2 = arith.constant 2 : index
    %c0_16 = arith.constant 0 : index
    %15 = vector.load %arg2[%c0_14, %c0_15, %c2, %c0_16] : memref<1x10x10x64xf32, #tpu.memory_space<vmem>>, vector<1x8x8x64xf32>
    %c0_17 = arith.constant 0 : index
    %c2_18 = arith.constant 2 : index
    %c0_19 = arith.constant 0 : index
    %c0_20 = arith.constant 0 : index
    %16 = vector.load %arg3[%c0_17, %c2_18, %c0_19, %c0_20] : memref<3x3x1x64xf32, #tpu.memory_space<vmem>>, vector<1x1x1x64xf32>
    %17 = vector.shape_cast %16 : vector<1x1x1x64xf32> to vector<1x64xf32>
    %18 = vector.shape_cast %17 : vector<1x64xf32> to vector<1x1x1x64xf32>
    %19 = vector.broadcast %18 : vector<1x1x1x64xf32> to vector<1x8x8x64xf32>
    %20 = arith.mulf %15, %19 : vector<1x8x8x64xf32>
    %21 = arith.addf %14, %20 : vector<1x8x8x64xf32>
    %c0_21 = arith.constant 0 : index
    %c1_22 = arith.constant 1 : index
    %c0_23 = arith.constant 0 : index
    %c0_24 = arith.constant 0 : index
    %22 = vector.load %arg2[%c0_21, %c1_22, %c0_23, %c0_24] : memref<1x10x10x64xf32, #tpu.memory_space<vmem>>, vector<1x8x8x64xf32>
    %c1_25 = arith.constant 1 : index
    %c0_26 = arith.constant 0 : index
    %c0_27 = arith.constant 0 : index
    %c0_28 = arith.constant 0 : index
    %23 = vector.load %arg3[%c1_25, %c0_26, %c0_27, %c0_28] : memref<3x3x1x64xf32, #tpu.memory_space<vmem>>, vector<1x1x1x64xf32>
    %24 = vector.shape_cast %23 : vector<1x1x1x64xf32> to vector<1x64xf32>
    %25 = vector.shape_cast %24 : vector<1x64xf32> to vector<1x1x1x64xf32>
    %26 = vector.broadcast %25 : vector<1x1x1x64xf32> to vector<1x8x8x64xf32>
    %27 = arith.mulf %22, %26 : vector<1x8x8x64xf32>
    %28 = arith.addf %21, %27 : vector<1x8x8x64xf32>
    %c0_29 = arith.constant 0 : index
    %c1_30 = arith.constant 1 : index
    %c1_31 = arith.constant 1 : index
    %c0_32 = arith.constant 0 : index
    %29 = vector.load %arg2[%c0_29, %c1_30, %c1_31, %c0_32] : memref<1x10x10x64xf32, #tpu.memory_space<vmem>>, vector<1x8x8x64xf32>
    %c1_33 = arith.constant 1 : index
    %c1_34 = arith.constant 1 : index
    %c0_35 = arith.constant 0 : index
    %c0_36 = arith.constant 0 : index
    %30 = vector.load %arg3[%c1_33, %c1_34, %c0_35, %c0_36] : memref<3x3x1x64xf32, #tpu.memory_space<vmem>>, vector<1x1x1x64xf32>
    %31 = vector.shape_cast %30 : vector<1x1x1x64xf32> to vector<1x64xf32>
    %32 = vector.shape_cast %31 : vector<1x64xf32> to vector<1x1x1x64xf32>
    %33 = vector.broadcast %32 : vector<1x1x1x64xf32> to vector<1x8x8x64xf32>
    %34 = arith.mulf %29, %33 : vector<1x8x8x64xf32>
    %35 = arith.addf %28, %34 : vector<1x8x8x64xf32>
    %c0_37 = arith.constant 0 : index
    %c1_38 = arith.constant 1 : index
    %c2_39 = arith.constant 2 : index
    %c0_40 = arith.constant 0 : index
    %36 = vector.load %arg2[%c0_37, %c1_38, %c2_39, %c0_40] : memref<1x10x10x64xf32, #tpu.memory_space<vmem>>, vector<1x8x8x64xf32>
    %c1_41 = arith.constant 1 : index
    %c2_42 = arith.constant 2 : index
    %c0_43 = arith.constant 0 : index
    %c0_44 = arith.constant 0 : index
    %37 = vector.load %arg3[%c1_41, %c2_42, %c0_43, %c0_44] : memref<3x3x1x64xf32, #tpu.memory_space<vmem>>, vector<1x1x1x64xf32>
    %38 = vector.shape_cast %37 : vector<1x1x1x64xf32> to vector<1x64xf32>
    %39 = vector.shape_cast %38 : vector<1x64xf32> to vector<1x1x1x64xf32>
    %40 = vector.broadcast %39 : vector<1x1x1x64xf32> to vector<1x8x8x64xf32>
    %41 = arith.mulf %36, %40 : vector<1x8x8x64xf32>
    %42 = arith.addf %35, %41 : vector<1x8x8x64xf32>
    %c0_45 = arith.constant 0 : index
    %c2_46 = arith.constant 2 : index
    %c0_47 = arith.constant 0 : index
    %c0_48 = arith.constant 0 : index
    %43 = vector.load %arg2[%c0_45, %c2_46, %c0_47, %c0_48] : memref<1x10x10x64xf32, #tpu.memory_space<vmem>>, vector<1x8x8x64xf32>
    %c2_49 = arith.constant 2 : index
    %c0_50 = arith.constant 0 : index
    %c0_51 = arith.constant 0 : index
    %c0_52 = arith.constant 0 : index
    %44 = vector.load %arg3[%c2_49, %c0_50, %c0_51, %c0_52] : memref<3x3x1x64xf32, #tpu.memory_space<vmem>>, vector<1x1x1x64xf32>
    %45 = vector.shape_cast %44 : vector<1x1x1x64xf32> to vector<1x64xf32>
    %46 = vector.shape_cast %45 : vector<1x64xf32> to vector<1x1x1x64xf32>
    %47 = vector.broadcast %46 : vector<1x1x1x64xf32> to vector<1x8x8x64xf32>
    %48 = arith.mulf %43, %47 : vector<1x8x8x64xf32>
    %49 = arith.addf %42, %48 : vector<1x8x8x64xf32>
    %c0_53 = arith.constant 0 : index
    %c2_54 = arith.constant 2 : index
    %c1_55 = arith.constant 1 : index
    %c0_56 = arith.constant 0 : index
    %50 = vector.load %arg2[%c0_53, %c2_54, %c1_55, %c0_56] : memref<1x10x10x64xf32, #tpu.memory_space<vmem>>, vector<1x8x8x64xf32>
    %c2_57 = arith.constant 2 : index
    %c1_58 = arith.constant 1 : index
    %c0_59 = arith.constant 0 : index
    %c0_60 = arith.constant 0 : index
    %51 = vector.load %arg3[%c2_57, %c1_58, %c0_59, %c0_60] : memref<3x3x1x64xf32, #tpu.memory_space<vmem>>, vector<1x1x1x64xf32>
    %52 = vector.shape_cast %51 : vector<1x1x1x64xf32> to vector<1x64xf32>
    %53 = vector.shape_cast %52 : vector<1x64xf32> to vector<1x1x1x64xf32>
    %54 = vector.broadcast %53 : vector<1x1x1x64xf32> to vector<1x8x8x64xf32>
    %55 = arith.mulf %50, %54 : vector<1x8x8x64xf32>
    %56 = arith.addf %49, %55 : vector<1x8x8x64xf32>
    %c0_61 = arith.constant 0 : index
    %c2_62 = arith.constant 2 : index
    %c2_63 = arith.constant 2 : index
    %c0_64 = arith.constant 0 : index
    %57 = vector.load %arg2[%c0_61, %c2_62, %c2_63, %c0_64] : memref<1x10x10x64xf32, #tpu.memory_space<vmem>>, vector<1x8x8x64xf32>
    %c2_65 = arith.constant 2 : index
    %c2_66 = arith.constant 2 : index
    %c0_67 = arith.constant 0 : index
    %c0_68 = arith.constant 0 : index
    %58 = vector.load %arg3[%c2_65, %c2_66, %c0_67, %c0_68] : memref<3x3x1x64xf32, #tpu.memory_space<vmem>>, vector<1x1x1x64xf32>
    %59 = vector.shape_cast %58 : vector<1x1x1x64xf32> to vector<1x64xf32>
    %60 = vector.shape_cast %59 : vector<1x64xf32> to vector<1x1x1x64xf32>
    %61 = vector.broadcast %60 : vector<1x1x1x64xf32> to vector<1x8x8x64xf32>
    %62 = arith.mulf %57, %61 : vector<1x8x8x64xf32>
    %63 = arith.addf %56, %62 : vector<1x8x8x64xf32>
    %c0_69 = arith.constant 0 : index
    %c0_70 = arith.constant 0 : index
    %64 = vector.load %arg4[%c0_69, %c0_70] : memref<1x64xf32, #tpu.memory_space<vmem>>, vector<1x64xf32>
    %65 = vector.shape_cast %64 : vector<1x64xf32> to vector<1x1x1x64xf32>
    %66 = vector.broadcast %65 : vector<1x1x1x64xf32> to vector<1x8x8x64xf32>
    %67 = arith.addf %63, %66 : vector<1x8x8x64xf32>
    %68 = arith.negf %67 : vector<1x8x8x64xf32>
    %69 = math.exp %68 : vector<1x8x8x64xf32>
    %cst_71 = arith.constant 1.000000e+00 : f32
    %70 = vector.broadcast %cst_71 : f32 to vector<1x8x8x64xf32>
    %71 = arith.addf %70, %69 : vector<1x8x8x64xf32>
    %72 = arith.divf %70, %71 : vector<1x8x8x64xf32>
    %73 = arith.mulf %67, %72 : vector<1x8x8x64xf32>
    %c0_72 = arith.constant 0 : index
    %c0_73 = arith.constant 0 : index
    %c0_74 = arith.constant 0 : index
    %c0_75 = arith.constant 0 : index
    %74 = vector.load %arg5[%c0_72, %c0_73, %c0_74, %c0_75] : memref<1x8x8x64xf32, #tpu.memory_space<vmem>>, vector<1x8x8x64xf32>
    tpu.vector_store %arg5[%c0_72, %c0_73, %c0_74, %c0_75], %73 {strides = array<i32>} : memref<1x8x8x64xf32, #tpu.memory_space<vmem>>, vector<1x8x8x64xf32>,
    return
  }
  func.func @transform_0(%arg0: i32, %arg1: i32) -> (i32, i32, i32, i32) {
    %c0_i32 = arith.constant 0 : i32
    %c0_i32_0 = arith.constant 0 : i32
    %c0_i32_1 = arith.constant 0 : i32
    return %arg0, %c0_i32, %c0_i32_0, %arg1 : i32, i32, i32, i32
  }
  func.func @transform_1(%arg0: i32, %arg1: i32) -> (i32, i32, i32, i32) {
    %c0_i32 = arith.constant 0 : i32
    %c0_i32_0 = arith.constant 0 : i32
    %c0_i32_1 = arith.constant 0 : i32
    %c0_i32_2 = arith.constant 0 : i32
    return %c0_i32, %c0_i32_0, %c0_i32_1, %arg1 : i32, i32, i32, i32
  }
  func.func @transform_2(%arg0: i32, %arg1: i32) -> (i32, i32) {
    %c0_i32 = arith.constant 0 : i32
    %c0_i32_0 = arith.constant 0 : i32
    return %c0_i32, %arg1 : i32, i32
  }
  func.func @transform_3(%arg0: i32, %arg1: i32) -> (i32, i32, i32, i32) {
    %c0_i32 = arith.constant 0 : i32
    %c0_i32_0 = arith.constant 0 : i32
    %c0_i32_1 = arith.constant 0 : i32
    return %arg0, %c0_i32, %c0_i32_0, %arg1 : i32, i32, i32, i32
  }
}

module attributes {stable_mosaic.version = 11 : i64} {
  func.func @_bk_matmul_kernel(%arg0: i32, %arg1: i32, %arg2: i32, %arg3: memref<1x1x64x128xbf16, #tpu.memory_space<vmem>>, %arg4: memref<1x128x128xbf16, #tpu.memory_space<vmem>>, %arg5: memref<1x1x64x128xf32, #tpu.memory_space<vmem>>) attributes {dimension_semantics = [#tpu.dimension_semantics<parallel>, #tpu.dimension_semantics<parallel>, #tpu.dimension_semantics<parallel>], iteration_bounds = array<i64: 2, 4, 1>, scalar_prefetch = 0 : i64, scratch_operands = 0 : i64, tpu.core_type = #tpu.core_type<tc>, window_params = [{transform_indices = @transform_0, window_bounds = array<i64: 1, 1, 64, 128>}, {transform_indices = @transform_1, window_bounds = array<i64: 1, 128, 128>}, {transform_indices = @transform_2, window_bounds = array<i64: 1, 1, 64, 128>}]} {
    %c0 = arith.constant 0 : index
    %c0_0 = arith.constant 0 : index
    %c0_1 = arith.constant 0 : index
    %c0_2 = arith.constant 0 : index
    %0 = vector.load %arg3[%c0, %c0_0, %c0_1, %c0_2] : memref<1x1x64x128xbf16, #tpu.memory_space<vmem>>, vector<1x1x64x128xbf16>
    %1 = vector.shape_cast %0 : vector<1x1x64x128xbf16> to vector<64x128xbf16>
    %c0_3 = arith.constant 0 : index
    %c0_4 = arith.constant 0 : index
    %c0_5 = arith.constant 0 : index
    %2 = vector.load %arg4[%c0_3, %c0_4, %c0_5] : memref<1x128x128xbf16, #tpu.memory_space<vmem>>, vector<1x128x128xbf16>
    %3 = vector.shape_cast %2 : vector<1x128x128xbf16> to vector<128x128xbf16>
    %cst = arith.constant dense<0.000000e+00> : vector<64x128xf32>
    %4 = tpu.matmul %1, %3, %cst {dimension_numbers = #tpu.dot_dimension_numbers<[1], [0], [0], [1], [0, 0, 1, 1], [], []>} : vector<64x128xbf16>, vector<128x128xbf16>, vector<64x128xf32> -> vector<64x128xf32>
    %c0_6 = arith.constant 0 : index
    %c0_7 = arith.constant 0 : index
    %c0_8 = arith.constant 0 : index
    %c0_9 = arith.constant 0 : index
    %5 = vector.load %arg5[%c0_6, %c0_7, %c0_8, %c0_9] : memref<1x1x64x128xf32, #tpu.memory_space<vmem>>, vector<1x1x64x128xf32>
    %6 = vector.shape_cast %5 : vector<1x1x64x128xf32> to vector<64x128xf32>
    %7 = vector.shape_cast %4 : vector<64x128xf32> to vector<1x1x64x128xf32>
    tpu.vector_store %arg5[%c0_6, %c0_7, %c0_8, %c0_9], %7 {strides = array<i32>} : memref<1x1x64x128xf32, #tpu.memory_space<vmem>>, vector<1x1x64x128xf32>,
    return
  }
  func.func @transform_0(%arg0: i32, %arg1: i32, %arg2: i32) -> (i32, i32, i32, i32) {
    %c0_i32 = arith.constant 0 : i32
    %c0_i32_0 = arith.constant 0 : i32
    return %arg0, %arg1, %arg2, %c0_i32 : i32, i32, i32, i32
  }
  func.func @transform_1(%arg0: i32, %arg1: i32, %arg2: i32) -> (i32, i32, i32) {
    %c0_i32 = arith.constant 0 : i32
    %c0_i32_0 = arith.constant 0 : i32
    %c0_i32_1 = arith.constant 0 : i32
    return %arg1, %c0_i32, %c0_i32_0 : i32, i32, i32
  }
  func.func @transform_2(%arg0: i32, %arg1: i32, %arg2: i32) -> (i32, i32, i32, i32) {
    %c0_i32 = arith.constant 0 : i32
    %c0_i32_0 = arith.constant 0 : i32
    return %arg0, %arg1, %arg2, %c0_i32 : i32, i32, i32, i32
  }
}

module attributes {stable_mosaic.version = 11 : i64} {
  func.func @_norm_gate_pool_kernel(%arg0: i32, %arg1: i32, %arg2: memref<1x64x64xf32, #tpu.memory_space<vmem>>, %arg3: memref<1x64x64xf32, #tpu.memory_space<vmem>>, %arg4: memref<1x64xf32, #tpu.memory_space<vmem>>, %arg5: memref<1x64xf32, #tpu.memory_space<vmem>>, %arg6: memref<1x64x64xf32, #tpu.memory_space<vmem>>, %arg7: memref<1x1x64xf32, #tpu.memory_space<vmem>>) attributes {dimension_semantics = [#tpu.dimension_semantics<parallel>, #tpu.dimension_semantics<arbitrary>], iteration_bounds = array<i64: 2, 1>, scalar_prefetch = 0 : i64, scratch_operands = 0 : i64, tpu.core_type = #tpu.core_type<tc>, window_params = [{transform_indices = @transform_0, window_bounds = array<i64: 1, 64, 64>}, {transform_indices = @transform_1, window_bounds = array<i64: 1, 64, 64>}, {pipeline_mode = #tpu.pipeline_mode<synchronous>, transform_indices = @transform_2, window_bounds = array<i64: 1, 64>}, {pipeline_mode = #tpu.pipeline_mode<synchronous>, transform_indices = @transform_3, window_bounds = array<i64: 1, 64>}, {transform_indices = @transform_4, window_bounds = array<i64: 1, 64, 64>}, {transform_indices = @transform_5, window_bounds = array<i64: 1, 1, 64>}]} {
    %c0_i32 = arith.constant 0 : i32
    %0 = arith.cmpi eq, %arg1, %c0_i32 : i32
    %1 = arith.extui %0 : i1 to i32
    %c0_i32_0 = arith.constant 0 : i32
    %2 = arith.cmpi ne, %1, %c0_i32_0 : i32
    scf.if %2 {
      %cst_25 = arith.constant 0.000000e+00 : f32
      %47 = vector.broadcast %cst_25 : f32 to vector<1x1x64xf32>
      %c0_26 = arith.constant 0 : index
      %c0_27 = arith.constant 0 : index
      %c0_28 = arith.constant 0 : index
      %48 = vector.load %arg7[%c0_26, %c0_27, %c0_28] : memref<1x1x64xf32, #tpu.memory_space<vmem>>, vector<1x1x64xf32>
      tpu.vector_store %arg7[%c0_26, %c0_27, %c0_28], %47 {strides = array<i32>} : memref<1x1x64xf32, #tpu.memory_space<vmem>>, vector<1x1x64xf32>,
    } else {
    }
    %c0 = arith.constant 0 : index
    %c0_1 = arith.constant 0 : index
    %c0_2 = arith.constant 0 : index
    %3 = vector.load %arg2[%c0, %c0_1, %c0_2] : memref<1x64x64xf32, #tpu.memory_space<vmem>>, vector<1x64x64xf32>
    %4 = vector.shape_cast %3 : vector<1x64x64xf32> to vector<64x64xf32>
    %cst = arith.constant dense<0.000000e+00> : vector<64xf32>
    %5 = vector.multi_reduction <add>, %4, %cst [1] : vector<64x64xf32> to vector<64xf32>
    %6 = vector.shape_cast %5 : vector<64xf32> to vector<64x1xf32>
    %cst_3 = arith.constant 6.400000e+01 : f32
    %7 = vector.broadcast %cst_3 : f32 to vector<64x1xf32>
    %8 = arith.divf %6, %7 : vector<64x1xf32>
    %9 = vector.broadcast %8 : vector<64x1xf32> to vector<64x64xf32>
    %10 = arith.subf %4, %9 : vector<64x64xf32>
    %11 = arith.mulf %10, %10 : vector<64x64xf32>
    %cst_4 = arith.constant dense<0.000000e+00> : vector<64xf32>
    %12 = vector.multi_reduction <add>, %11, %cst_4 [1] : vector<64x64xf32> to vector<64xf32>
    %13 = vector.shape_cast %12 : vector<64xf32> to vector<64x1xf32>
    %cst_5 = arith.constant 6.400000e+01 : f32
    %14 = vector.broadcast %cst_5 : f32 to vector<64x1xf32>
    %15 = arith.divf %13, %14 : vector<64x1xf32>
    %cst_6 = arith.constant 9.99999974E-6 : f32
    %16 = vector.broadcast %cst_6 : f32 to vector<64x1xf32>
    %17 = arith.addf %15, %16 : vector<64x1xf32>
    %18 = math.rsqrt %17 : vector<64x1xf32>
    %19 = vector.broadcast %18 : vector<64x1xf32> to vector<64x64xf32>
    %20 = arith.mulf %10, %19 : vector<64x64xf32>
    %c0_7 = arith.constant 0 : index
    %c0_8 = arith.constant 0 : index
    %21 = vector.load %arg4[%c0_7, %c0_8] : memref<1x64xf32, #tpu.memory_space<vmem>>, vector<1x64xf32>
    %22 = vector.broadcast %21 : vector<1x64xf32> to vector<64x64xf32>
    %23 = arith.mulf %20, %22 : vector<64x64xf32>
    %c0_9 = arith.constant 0 : index
    %c0_10 = arith.constant 0 : index
    %24 = vector.load %arg5[%c0_9, %c0_10] : memref<1x64xf32, #tpu.memory_space<vmem>>, vector<1x64xf32>
    %25 = vector.broadcast %24 : vector<1x64xf32> to vector<64x64xf32>
    %26 = arith.addf %23, %25 : vector<64x64xf32>
    %c0_11 = arith.constant 0 : index
    %c0_12 = arith.constant 0 : index
    %c0_13 = arith.constant 0 : index
    %27 = vector.load %arg3[%c0_11, %c0_12, %c0_13] : memref<1x64x64xf32, #tpu.memory_space<vmem>>, vector<1x64x64xf32>
    %28 = vector.shape_cast %27 : vector<1x64x64xf32> to vector<64x64xf32>
    %29 = arith.negf %28 : vector<64x64xf32>
    %30 = math.exp %29 : vector<64x64xf32>
    %cst_14 = arith.constant 1.000000e+00 : f32
    %31 = vector.broadcast %cst_14 : f32 to vector<64x64xf32>
    %32 = arith.addf %31, %30 : vector<64x64xf32>
    %33 = arith.divf %31, %32 : vector<64x64xf32>
    %34 = arith.mulf %28, %33 : vector<64x64xf32>
    %35 = arith.mulf %26, %34 : vector<64x64xf32>
    %c0_15 = arith.constant 0 : index
    %c0_16 = arith.constant 0 : index
    %c0_17 = arith.constant 0 : index
    %36 = vector.load %arg6[%c0_15, %c0_16, %c0_17] : memref<1x64x64xf32, #tpu.memory_space<vmem>>, vector<1x64x64xf32>
    %37 = vector.shape_cast %36 : vector<1x64x64xf32> to vector<64x64xf32>
    %38 = vector.shape_cast %35 : vector<64x64xf32> to vector<1x64x64xf32>
    tpu.vector_store %arg6[%c0_15, %c0_16, %c0_17], %38 {strides = array<i32>} : memref<1x64x64xf32, #tpu.memory_space<vmem>>, vector<1x64x64xf32>,
    %c0_18 = arith.constant 0 : index
    %c0_19 = arith.constant 0 : index
    %c0_20 = arith.constant 0 : index
    %39 = vector.load %arg7[%c0_18, %c0_19, %c0_20] : memref<1x1x64xf32, #tpu.memory_space<vmem>>, vector<1x1x64xf32>
    %40 = vector.shape_cast %39 : vector<1x1x64xf32> to vector<1x64xf32>
    %cst_21 = arith.constant dense<0.000000e+00> : vector<64xf32>
    %41 = vector.multi_reduction <add>, %35, %cst_21 [0] : vector<64x64xf32> to vector<64xf32>
    %42 = vector.shape_cast %41 : vector<64xf32> to vector<1x64xf32>
    %43 = arith.addf %40, %42 : vector<1x64xf32>
    %c0_22 = arith.constant 0 : index
    %c0_23 = arith.constant 0 : index
    %c0_24 = arith.constant 0 : index
    %44 = vector.load %arg7[%c0_22, %c0_23, %c0_24] : memref<1x1x64xf32, #tpu.memory_space<vmem>>, vector<1x1x64xf32>
    %45 = vector.shape_cast %44 : vector<1x1x64xf32> to vector<1x64xf32>
    %46 = vector.shape_cast %43 : vector<1x64xf32> to vector<1x1x64xf32>
    tpu.vector_store %arg7[%c0_22, %c0_23, %c0_24], %46 {strides = array<i32>} : memref<1x1x64xf32, #tpu.memory_space<vmem>>, vector<1x1x64xf32>,
    return
  }
  func.func @transform_0(%arg0: i32, %arg1: i32) -> (i32, i32, i32) {
    %c0_i32 = arith.constant 0 : i32
    %c0_i32_0 = arith.constant 0 : i32
    return %arg0, %arg1, %c0_i32 : i32, i32, i32
  }
  func.func @transform_1(%arg0: i32, %arg1: i32) -> (i32, i32, i32) {
    %c0_i32 = arith.constant 0 : i32
    %c0_i32_0 = arith.constant 0 : i32
    return %arg0, %arg1, %c0_i32 : i32, i32, i32
  }
  func.func @transform_2(%arg0: i32, %arg1: i32) -> (i32, i32) {
    %c0_i32 = arith.constant 0 : i32
    %c0_i32_0 = arith.constant 0 : i32
    %c0_i32_1 = arith.constant 0 : i32
    return %c0_i32, %c0_i32_0 : i32, i32
  }
  func.func @transform_3(%arg0: i32, %arg1: i32) -> (i32, i32) {
    %c0_i32 = arith.constant 0 : i32
    %c0_i32_0 = arith.constant 0 : i32
    %c0_i32_1 = arith.constant 0 : i32
    return %c0_i32, %c0_i32_0 : i32, i32
  }
  func.func @transform_4(%arg0: i32, %arg1: i32) -> (i32, i32, i32) {
    %c0_i32 = arith.constant 0 : i32
    %c0_i32_0 = arith.constant 0 : i32
    return %arg0, %arg1, %c0_i32 : i32, i32, i32
  }
  func.func @transform_5(%arg0: i32, %arg1: i32) -> (i32, i32, i32) {
    %c0_i32 = arith.constant 0 : i32
    %c0_i32_0 = arith.constant 0 : i32
    %c0_i32_1 = arith.constant 0 : i32
    return %arg0, %c0_i32, %c0_i32_0 : i32, i32, i32
  }
}

module attributes {stable_mosaic.version = 11 : i64} {
  func.func @_selective_scan_kernel(%arg0: i32, %arg1: i32, %arg2: memref<1x64x64xf32, #tpu.memory_space<vmem>>, %arg3: memref<1x64x64xf32, #tpu.memory_space<vmem>>, %arg4: memref<1x16x64xf32, #tpu.memory_space<vmem>>, %arg5: memref<1x64x16x1xf32, #tpu.memory_space<vmem>>, %arg6: memref<1x64x16x1xf32, #tpu.memory_space<vmem>>, %arg7: memref<1x1x64xf32, #tpu.memory_space<vmem>>, %arg8: memref<1x1x64xf32, #tpu.memory_space<vmem>>, %arg9: memref<1x64x64xf32, #tpu.memory_space<vmem>>, %arg10: memref<16x64xf32, #tpu.memory_space<vmem>>) attributes {dimension_semantics = [#tpu.dimension_semantics<parallel>, #tpu.dimension_semantics<arbitrary>], iteration_bounds = array<i64: 8, 1>, scalar_prefetch = 0 : i64, scratch_operands = 1 : i64, tpu.core_type = #tpu.core_type<tc>, window_params = [{transform_indices = @transform_0, window_bounds = array<i64: 1, 64, 64>}, {transform_indices = @transform_1, window_bounds = array<i64: 1, 64, 64>}, {transform_indices = @transform_2, window_bounds = array<i64: 1, 16, 64>}, {transform_indices = @transform_3, window_bounds = array<i64: 1, 64, 16, 1>}, {transform_indices = @transform_4, window_bounds = array<i64: 1, 64, 16, 1>}, {transform_indices = @transform_5, window_bounds = array<i64: 1, 1, 64>}, {transform_indices = @transform_6, window_bounds = array<i64: 1, 1, 64>}, {transform_indices = @transform_7, window_bounds = array<i64: 1, 64, 64>}]} {
    %c0_i32 = arith.constant 0 : i32
    %0 = arith.cmpi eq, %arg1, %c0_i32 : i32
    %1 = arith.extui %0 : i1 to i32
    %c0_i32_0 = arith.constant 0 : i32
    %2 = arith.cmpi ne, %1, %c0_i32_0 : i32
    scf.if %2 {
      %cst = arith.constant 0.000000e+00 : f32
      %13 = vector.broadcast %cst : f32 to vector<16x64xf32>
      %c0_15 = arith.constant 0 : index
      %c0_16 = arith.constant 0 : index
      %14 = vector.load %arg10[%c0_15, %c0_16] : memref<16x64xf32, #tpu.memory_space<vmem>>, vector<16x64xf32>
      tpu.vector_store %arg10[%c0_15, %c0_16], %13 {strides = array<i32>} : memref<16x64xf32, #tpu.memory_space<vmem>>, vector<16x64xf32>,
    } else {
    }
    %c0 = arith.constant 0 : index
    %c0_1 = arith.constant 0 : index
    %c0_2 = arith.constant 0 : index
    %3 = vector.load %arg4[%c0, %c0_1, %c0_2] : memref<1x16x64xf32, #tpu.memory_space<vmem>>, vector<1x16x64xf32>
    %4 = vector.shape_cast %3 : vector<1x16x64xf32> to vector<16x64xf32>
    %c0_3 = arith.constant 0 : index
    %c0_4 = arith.constant 0 : index
    %c0_5 = arith.constant 0 : index
    %5 = vector.load %arg7[%c0_3, %c0_4, %c0_5] : memref<1x1x64xf32, #tpu.memory_space<vmem>>, vector<1x1x64xf32>
    %6 = vector.shape_cast %5 : vector<1x1x64xf32> to vector<1x64xf32>
    %c0_6 = arith.constant 0 : index
    %c0_7 = arith.constant 0 : index
    %c0_8 = arith.constant 0 : index
    %7 = vector.load %arg8[%c0_6, %c0_7, %c0_8] : memref<1x1x64xf32, #tpu.memory_space<vmem>>, vector<1x1x64xf32>
    %8 = vector.shape_cast %7 : vector<1x1x64xf32> to vector<1x64xf32>
    %c0_9 = arith.constant 0 : index
    %c0_10 = arith.constant 0 : index
    %9 = vector.load %arg10[%c0_9, %c0_10] : memref<16x64xf32, #tpu.memory_space<vmem>>, vector<16x64xf32>
    %c0_i32_11 = arith.constant 0 : i32
    %c8_i32 = arith.constant 8 : i32
    %10 = arith.addi %c0_i32_11, %c8_i32 : i32
    %c1_i32 = arith.constant 1 : i32
    %11 = scf.for %arg11 = %c0_i32_11 to %10 step %c1_i32 iter_args(%arg12 = %9) -> (vector<16x64xf32>)  : i32 {
      %c8_i32_15 = arith.constant 8 : i32
      %13 = arith.muli %arg11, %c8_i32_15 : i32
      %14 = tpu.assume_multiple %13, 8 : i32
      %c0_i32_16 = arith.constant 0 : i32
      %15 = arith.addi %14, %c0_i32_16 : i32
      %c0_17 = arith.constant 0 : index
      %16 = arith.index_cast %15 : i32 to index
      %c0_18 = arith.constant 0 : index
      %17 = vector.load %arg2[%c0_17, %16, %c0_18] : memref<1x64x64xf32, #tpu.memory_space<vmem>>, vector<1x1x64xf32>
      %18 = vector.shape_cast %17 : vector<1x1x64xf32> to vector<1x64xf32>
      %c0_19 = arith.constant 0 : index
      %19 = arith.index_cast %15 : i32 to index
      %c0_20 = arith.constant 0 : index
      %20 = vector.load %arg3[%c0_19, %19, %c0_20] : memref<1x64x64xf32, #tpu.memory_space<vmem>>, vector<1x1x64xf32>
      %21 = vector.shape_cast %20 : vector<1x1x64xf32> to vector<1x64xf32>
      %22 = arith.addf %21, %8 : vector<1x64xf32>
      %cst = arith.constant 0.000000e+00 : f32
      %23 = vector.broadcast %cst : f32 to vector<1x64xf32>
      %24 = arith.maximumf %22, %23 : vector<1x64xf32>
      %25 = math.absf %22 : vector<1x64xf32>
      %cst_21 = arith.constant 0.000000e+00 : f32
      %26 = vector.broadcast %cst_21 : f32 to vector<1x64xf32>
      %27 = arith.subf %26, %25 : vector<1x64xf32>
      %28 = math.exp %27 : vector<1x64xf32>
      %cst_22 = arith.constant 1.000000e+00 : f32
      %29 = vector.broadcast %cst_22 : f32 to vector<1x64xf32>
      %30 = arith.addf %29, %28 : vector<1x64xf32>
      %31 = math.log %30 : vector<1x64xf32>
      %32 = arith.addf %24, %31 : vector<1x64xf32>
      %c0_23 = arith.constant 0 : index
      %33 = arith.index_cast %15 : i32 to index
      %c0_24 = arith.constant 0 : index
      %c0_25 = arith.constant 0 : index
      %34 = vector.load %arg5[%c0_23, %33, %c0_24, %c0_25] : memref<1x64x16x1xf32, #tpu.memory_space<vmem>>, vector<1x1x16x1xf32>
      %35 = vector.shape_cast %34 : vector<1x1x16x1xf32> to vector<1x16x1xf32>
      %36 = vector.shape_cast %35 : vector<1x16x1xf32> to vector<16x1xf32>
      %c0_26 = arith.constant 0 : index
      %37 = arith.index_cast %15 : i32 to index
      %c0_27 = arith.constant 0 : index
      %c0_28 = arith.constant 0 : index
      %38 = vector.load %arg6[%c0_26, %37, %c0_27, %c0_28] : memref<1x64x16x1xf32, #tpu.memory_space<vmem>>, vector<1x1x16x1xf32>
      %39 = vector.shape_cast %38 : vector<1x1x16x1xf32> to vector<1x16x1xf32>
      %40 = vector.shape_cast %39 : vector<1x16x1xf32> to vector<16x1xf32>
      %41 = vector.broadcast %32 : vector<1x64xf32> to vector<16x64xf32>
      %42 = arith.mulf %41, %4 : vector<16x64xf32>
      %43 = math.exp %42 : vector<16x64xf32>
      %44 = arith.mulf %43, %arg12 : vector<16x64xf32>
      %45 = arith.mulf %32, %18 : vector<1x64xf32>
      %46 = vector.broadcast %36 : vector<16x1xf32> to vector<16x64xf32>
      %47 = vector.broadcast %45 : vector<1x64xf32> to vector<16x64xf32>
      %48 = arith.mulf %46, %47 : vector<16x64xf32>
      %49 = arith.addf %44, %48 : vector<16x64xf32>
      %50 = vector.broadcast %40 : vector<16x1xf32> to vector<16x64xf32>
      %51 = arith.mulf %50, %49 : vector<16x64xf32>
      %cst_29 = arith.constant dense<0.000000e+00> : vector<64xf32>
      %52 = vector.multi_reduction <add>, %51, %cst_29 [0] : vector<16x64xf32> to vector<64xf32>
      %53 = vector.shape_cast %52 : vector<64xf32> to vector<1x64xf32>
      %54 = arith.mulf %6, %18 : vector<1x64xf32>
      %55 = arith.addf %53, %54 : vector<1x64xf32>
      %c1_i32_30 = arith.constant 1 : i32
      %56 = arith.addi %14, %c1_i32_30 : i32
      %c0_31 = arith.constant 0 : index
      %57 = arith.index_cast %56 : i32 to index
      %c0_32 = arith.constant 0 : index
      %58 = vector.load %arg2[%c0_31, %57, %c0_32] : memref<1x64x64xf32, #tpu.memory_space<vmem>>, vector<1x1x64xf32>
      %59 = vector.shape_cast %58 : vector<1x1x64xf32> to vector<1x64xf32>
      %c0_33 = arith.constant 0 : index
      %60 = arith.index_cast %56 : i32 to index
      %c0_34 = arith.constant 0 : index
      %61 = vector.load %arg3[%c0_33, %60, %c0_34] : memref<1x64x64xf32, #tpu.memory_space<vmem>>, vector<1x1x64xf32>
      %62 = vector.shape_cast %61 : vector<1x1x64xf32> to vector<1x64xf32>
      %63 = arith.addf %62, %8 : vector<1x64xf32>
      %cst_35 = arith.constant 0.000000e+00 : f32
      %64 = vector.broadcast %cst_35 : f32 to vector<1x64xf32>
      %65 = arith.maximumf %63, %64 : vector<1x64xf32>
      %66 = math.absf %63 : vector<1x64xf32>
      %cst_36 = arith.constant 0.000000e+00 : f32
      %67 = vector.broadcast %cst_36 : f32 to vector<1x64xf32>
      %68 = arith.subf %67, %66 : vector<1x64xf32>
      %69 = math.exp %68 : vector<1x64xf32>
      %cst_37 = arith.constant 1.000000e+00 : f32
      %70 = vector.broadcast %cst_37 : f32 to vector<1x64xf32>
      %71 = arith.addf %70, %69 : vector<1x64xf32>
      %72 = math.log %71 : vector<1x64xf32>
      %73 = arith.addf %65, %72 : vector<1x64xf32>
      %c0_38 = arith.constant 0 : index
      %74 = arith.index_cast %56 : i32 to index
      %c0_39 = arith.constant 0 : index
      %c0_40 = arith.constant 0 : index
      %75 = vector.load %arg5[%c0_38, %74, %c0_39, %c0_40] : memref<1x64x16x1xf32, #tpu.memory_space<vmem>>, vector<1x1x16x1xf32>
      %76 = vector.shape_cast %75 : vector<1x1x16x1xf32> to vector<1x16x1xf32>
      %77 = vector.shape_cast %76 : vector<1x16x1xf32> to vector<16x1xf32>
      %c0_41 = arith.constant 0 : index
      %78 = arith.index_cast %56 : i32 to index
      %c0_42 = arith.constant 0 : index
      %c0_43 = arith.constant 0 : index
      %79 = vector.load %arg6[%c0_41, %78, %c0_42, %c0_43] : memref<1x64x16x1xf32, #tpu.memory_space<vmem>>, vector<1x1x16x1xf32>
      %80 = vector.shape_cast %79 : vector<1x1x16x1xf32> to vector<1x16x1xf32>
      %81 = vector.shape_cast %80 : vector<1x16x1xf32> to vector<16x1xf32>
      %82 = vector.broadcast %73 : vector<1x64xf32> to vector<16x64xf32>
      %83 = arith.mulf %82, %4 : vector<16x64xf32>
      %84 = math.exp %83 : vector<16x64xf32>
      %85 = arith.mulf %84, %49 : vector<16x64xf32>
      %86 = arith.mulf %73, %59 : vector<1x64xf32>
      %87 = vector.broadcast %77 : vector<16x1xf32> to vector<16x64xf32>
      %88 = vector.broadcast %86 : vector<1x64xf32> to vector<16x64xf32>
      %89 = arith.mulf %87, %88 : vector<16x64xf32>
      %90 = arith.addf %85, %89 : vector<16x64xf32>
      %91 = vector.broadcast %81 : vector<16x1xf32> to vector<16x64xf32>
      %92 = arith.mulf %91, %90 : vector<16x64xf32>
      %cst_44 = arith.constant dense<0.000000e+00> : vector<64xf32>
      %93 = vector.multi_reduction <add>, %92, %cst_44 [0] : vector<16x64xf32> to vector<64xf32>
      %94 = vector.shape_cast %93 : vector<64xf32> to vector<1x64xf32>
      %95 = arith.mulf %6, %59 : vector<1x64xf32>
      %96 = arith.addf %94, %95 : vector<1x64xf32>
      %c2_i32 = arith.constant 2 : i32
      %97 = arith.addi %14, %c2_i32 : i32
      %c0_45 = arith.constant 0 : index
      %98 = arith.index_cast %97 : i32 to index
      %c0_46 = arith.constant 0 : index
      %99 = vector.load %arg2[%c0_45, %98, %c0_46] : memref<1x64x64xf32, #tpu.memory_space<vmem>>, vector<1x1x64xf32>
      %100 = vector.shape_cast %99 : vector<1x1x64xf32> to vector<1x64xf32>
      %c0_47 = arith.constant 0 : index
      %101 = arith.index_cast %97 : i32 to index
      %c0_48 = arith.constant 0 : index
      %102 = vector.load %arg3[%c0_47, %101, %c0_48] : memref<1x64x64xf32, #tpu.memory_space<vmem>>, vector<1x1x64xf32>
      %103 = vector.shape_cast %102 : vector<1x1x64xf32> to vector<1x64xf32>
      %104 = arith.addf %103, %8 : vector<1x64xf32>
      %cst_49 = arith.constant 0.000000e+00 : f32
      %105 = vector.broadcast %cst_49 : f32 to vector<1x64xf32>
      %106 = arith.maximumf %104, %105 : vector<1x64xf32>
      %107 = math.absf %104 : vector<1x64xf32>
      %cst_50 = arith.constant 0.000000e+00 : f32
      %108 = vector.broadcast %cst_50 : f32 to vector<1x64xf32>
      %109 = arith.subf %108, %107 : vector<1x64xf32>
      %110 = math.exp %109 : vector<1x64xf32>
      %cst_51 = arith.constant 1.000000e+00 : f32
      %111 = vector.broadcast %cst_51 : f32 to vector<1x64xf32>
      %112 = arith.addf %111, %110 : vector<1x64xf32>
      %113 = math.log %112 : vector<1x64xf32>
      %114 = arith.addf %106, %113 : vector<1x64xf32>
      %c0_52 = arith.constant 0 : index
      %115 = arith.index_cast %97 : i32 to index
      %c0_53 = arith.constant 0 : index
      %c0_54 = arith.constant 0 : index
      %116 = vector.load %arg5[%c0_52, %115, %c0_53, %c0_54] : memref<1x64x16x1xf32, #tpu.memory_space<vmem>>, vector<1x1x16x1xf32>
      %117 = vector.shape_cast %116 : vector<1x1x16x1xf32> to vector<1x16x1xf32>
      %118 = vector.shape_cast %117 : vector<1x16x1xf32> to vector<16x1xf32>
      %c0_55 = arith.constant 0 : index
      %119 = arith.index_cast %97 : i32 to index
      %c0_56 = arith.constant 0 : index
      %c0_57 = arith.constant 0 : index
      %120 = vector.load %arg6[%c0_55, %119, %c0_56, %c0_57] : memref<1x64x16x1xf32, #tpu.memory_space<vmem>>, vector<1x1x16x1xf32>
      %121 = vector.shape_cast %120 : vector<1x1x16x1xf32> to vector<1x16x1xf32>
      %122 = vector.shape_cast %121 : vector<1x16x1xf32> to vector<16x1xf32>
      %123 = vector.broadcast %114 : vector<1x64xf32> to vector<16x64xf32>
      %124 = arith.mulf %123, %4 : vector<16x64xf32>
      %125 = math.exp %124 : vector<16x64xf32>
      %126 = arith.mulf %125, %90 : vector<16x64xf32>
      %127 = arith.mulf %114, %100 : vector<1x64xf32>
      %128 = vector.broadcast %118 : vector<16x1xf32> to vector<16x64xf32>
      %129 = vector.broadcast %127 : vector<1x64xf32> to vector<16x64xf32>
      %130 = arith.mulf %128, %129 : vector<16x64xf32>
      %131 = arith.addf %126, %130 : vector<16x64xf32>
      %132 = vector.broadcast %122 : vector<16x1xf32> to vector<16x64xf32>
      %133 = arith.mulf %132, %131 : vector<16x64xf32>
      %cst_58 = arith.constant dense<0.000000e+00> : vector<64xf32>
      %134 = vector.multi_reduction <add>, %133, %cst_58 [0] : vector<16x64xf32> to vector<64xf32>
      %135 = vector.shape_cast %134 : vector<64xf32> to vector<1x64xf32>
      %136 = arith.mulf %6, %100 : vector<1x64xf32>
      %137 = arith.addf %135, %136 : vector<1x64xf32>
      %c3_i32 = arith.constant 3 : i32
      %138 = arith.addi %14, %c3_i32 : i32
      %c0_59 = arith.constant 0 : index
      %139 = arith.index_cast %138 : i32 to index
      %c0_60 = arith.constant 0 : index
      %140 = vector.load %arg2[%c0_59, %139, %c0_60] : memref<1x64x64xf32, #tpu.memory_space<vmem>>, vector<1x1x64xf32>
      %141 = vector.shape_cast %140 : vector<1x1x64xf32> to vector<1x64xf32>
      %c0_61 = arith.constant 0 : index
      %142 = arith.index_cast %138 : i32 to index
      %c0_62 = arith.constant 0 : index
      %143 = vector.load %arg3[%c0_61, %142, %c0_62] : memref<1x64x64xf32, #tpu.memory_space<vmem>>, vector<1x1x64xf32>
      %144 = vector.shape_cast %143 : vector<1x1x64xf32> to vector<1x64xf32>
      %145 = arith.addf %144, %8 : vector<1x64xf32>
      %cst_63 = arith.constant 0.000000e+00 : f32
      %146 = vector.broadcast %cst_63 : f32 to vector<1x64xf32>
      %147 = arith.maximumf %145, %146 : vector<1x64xf32>
      %148 = math.absf %145 : vector<1x64xf32>
      %cst_64 = arith.constant 0.000000e+00 : f32
      %149 = vector.broadcast %cst_64 : f32 to vector<1x64xf32>
      %150 = arith.subf %149, %148 : vector<1x64xf32>
      %151 = math.exp %150 : vector<1x64xf32>
      %cst_65 = arith.constant 1.000000e+00 : f32
      %152 = vector.broadcast %cst_65 : f32 to vector<1x64xf32>
      %153 = arith.addf %152, %151 : vector<1x64xf32>
      %154 = math.log %153 : vector<1x64xf32>
      %155 = arith.addf %147, %154 : vector<1x64xf32>
      %c0_66 = arith.constant 0 : index
      %156 = arith.index_cast %138 : i32 to index
      %c0_67 = arith.constant 0 : index
      %c0_68 = arith.constant 0 : index
      %157 = vector.load %arg5[%c0_66, %156, %c0_67, %c0_68] : memref<1x64x16x1xf32, #tpu.memory_space<vmem>>, vector<1x1x16x1xf32>
      %158 = vector.shape_cast %157 : vector<1x1x16x1xf32> to vector<1x16x1xf32>
      %159 = vector.shape_cast %158 : vector<1x16x1xf32> to vector<16x1xf32>
      %c0_69 = arith.constant 0 : index
      %160 = arith.index_cast %138 : i32 to index
      %c0_70 = arith.constant 0 : index
      %c0_71 = arith.constant 0 : index
      %161 = vector.load %arg6[%c0_69, %160, %c0_70, %c0_71] : memref<1x64x16x1xf32, #tpu.memory_space<vmem>>, vector<1x1x16x1xf32>
      %162 = vector.shape_cast %161 : vector<1x1x16x1xf32> to vector<1x16x1xf32>
      %163 = vector.shape_cast %162 : vector<1x16x1xf32> to vector<16x1xf32>
      %164 = vector.broadcast %155 : vector<1x64xf32> to vector<16x64xf32>
      %165 = arith.mulf %164, %4 : vector<16x64xf32>
      %166 = math.exp %165 : vector<16x64xf32>
      %167 = arith.mulf %166, %131 : vector<16x64xf32>
      %168 = arith.mulf %155, %141 : vector<1x64xf32>
      %169 = vector.broadcast %159 : vector<16x1xf32> to vector<16x64xf32>
      %170 = vector.broadcast %168 : vector<1x64xf32> to vector<16x64xf32>
      %171 = arith.mulf %169, %170 : vector<16x64xf32>
      %172 = arith.addf %167, %171 : vector<16x64xf32>
      %173 = vector.broadcast %163 : vector<16x1xf32> to vector<16x64xf32>
      %174 = arith.mulf %173, %172 : vector<16x64xf32>
      %cst_72 = arith.constant dense<0.000000e+00> : vector<64xf32>
      %175 = vector.multi_reduction <add>, %174, %cst_72 [0] : vector<16x64xf32> to vector<64xf32>
      %176 = vector.shape_cast %175 : vector<64xf32> to vector<1x64xf32>
      %177 = arith.mulf %6, %141 : vector<1x64xf32>
      %178 = arith.addf %176, %177 : vector<1x64xf32>
      %c4_i32 = arith.constant 4 : i32
      %179 = arith.addi %14, %c4_i32 : i32
      %c0_73 = arith.constant 0 : index
      %180 = arith.index_cast %179 : i32 to index
      %c0_74 = arith.constant 0 : index
      %181 = vector.load %arg2[%c0_73, %180, %c0_74] : memref<1x64x64xf32, #tpu.memory_space<vmem>>, vector<1x1x64xf32>
      %182 = vector.shape_cast %181 : vector<1x1x64xf32> to vector<1x64xf32>
      %c0_75 = arith.constant 0 : index
      %183 = arith.index_cast %179 : i32 to index
      %c0_76 = arith.constant 0 : index
      %184 = vector.load %arg3[%c0_75, %183, %c0_76] : memref<1x64x64xf32, #tpu.memory_space<vmem>>, vector<1x1x64xf32>
      %185 = vector.shape_cast %184 : vector<1x1x64xf32> to vector<1x64xf32>
      %186 = arith.addf %185, %8 : vector<1x64xf32>
      %cst_77 = arith.constant 0.000000e+00 : f32
      %187 = vector.broadcast %cst_77 : f32 to vector<1x64xf32>
      %188 = arith.maximumf %186, %187 : vector<1x64xf32>
      %189 = math.absf %186 : vector<1x64xf32>
      %cst_78 = arith.constant 0.000000e+00 : f32
      %190 = vector.broadcast %cst_78 : f32 to vector<1x64xf32>
      %191 = arith.subf %190, %189 : vector<1x64xf32>
      %192 = math.exp %191 : vector<1x64xf32>
      %cst_79 = arith.constant 1.000000e+00 : f32
      %193 = vector.broadcast %cst_79 : f32 to vector<1x64xf32>
      %194 = arith.addf %193, %192 : vector<1x64xf32>
      %195 = math.log %194 : vector<1x64xf32>
      %196 = arith.addf %188, %195 : vector<1x64xf32>
      %c0_80 = arith.constant 0 : index
      %197 = arith.index_cast %179 : i32 to index
      %c0_81 = arith.constant 0 : index
      %c0_82 = arith.constant 0 : index
      %198 = vector.load %arg5[%c0_80, %197, %c0_81, %c0_82] : memref<1x64x16x1xf32, #tpu.memory_space<vmem>>, vector<1x1x16x1xf32>
      %199 = vector.shape_cast %198 : vector<1x1x16x1xf32> to vector<1x16x1xf32>
      %200 = vector.shape_cast %199 : vector<1x16x1xf32> to vector<16x1xf32>
      %c0_83 = arith.constant 0 : index
      %201 = arith.index_cast %179 : i32 to index
      %c0_84 = arith.constant 0 : index
      %c0_85 = arith.constant 0 : index
      %202 = vector.load %arg6[%c0_83, %201, %c0_84, %c0_85] : memref<1x64x16x1xf32, #tpu.memory_space<vmem>>, vector<1x1x16x1xf32>
      %203 = vector.shape_cast %202 : vector<1x1x16x1xf32> to vector<1x16x1xf32>
      %204 = vector.shape_cast %203 : vector<1x16x1xf32> to vector<16x1xf32>
      %205 = vector.broadcast %196 : vector<1x64xf32> to vector<16x64xf32>
      %206 = arith.mulf %205, %4 : vector<16x64xf32>
      %207 = math.exp %206 : vector<16x64xf32>
      %208 = arith.mulf %207, %172 : vector<16x64xf32>
      %209 = arith.mulf %196, %182 : vector<1x64xf32>
      %210 = vector.broadcast %200 : vector<16x1xf32> to vector<16x64xf32>
      %211 = vector.broadcast %209 : vector<1x64xf32> to vector<16x64xf32>
      %212 = arith.mulf %210, %211 : vector<16x64xf32>
      %213 = arith.addf %208, %212 : vector<16x64xf32>
      %214 = vector.broadcast %204 : vector<16x1xf32> to vector<16x64xf32>
      %215 = arith.mulf %214, %213 : vector<16x64xf32>
      %cst_86 = arith.constant dense<0.000000e+00> : vector<64xf32>
      %216 = vector.multi_reduction <add>, %215, %cst_86 [0] : vector<16x64xf32> to vector<64xf32>
      %217 = vector.shape_cast %216 : vector<64xf32> to vector<1x64xf32>
      %218 = arith.mulf %6, %182 : vector<1x64xf32>
      %219 = arith.addf %217, %218 : vector<1x64xf32>
      %c5_i32 = arith.constant 5 : i32
      %220 = arith.addi %14, %c5_i32 : i32
      %c0_87 = arith.constant 0 : index
      %221 = arith.index_cast %220 : i32 to index
      %c0_88 = arith.constant 0 : index
      %222 = vector.load %arg2[%c0_87, %221, %c0_88] : memref<1x64x64xf32, #tpu.memory_space<vmem>>, vector<1x1x64xf32>
      %223 = vector.shape_cast %222 : vector<1x1x64xf32> to vector<1x64xf32>
      %c0_89 = arith.constant 0 : index
      %224 = arith.index_cast %220 : i32 to index
      %c0_90 = arith.constant 0 : index
      %225 = vector.load %arg3[%c0_89, %224, %c0_90] : memref<1x64x64xf32, #tpu.memory_space<vmem>>, vector<1x1x64xf32>
      %226 = vector.shape_cast %225 : vector<1x1x64xf32> to vector<1x64xf32>
      %227 = arith.addf %226, %8 : vector<1x64xf32>
      %cst_91 = arith.constant 0.000000e+00 : f32
      %228 = vector.broadcast %cst_91 : f32 to vector<1x64xf32>
      %229 = arith.maximumf %227, %228 : vector<1x64xf32>
      %230 = math.absf %227 : vector<1x64xf32>
      %cst_92 = arith.constant 0.000000e+00 : f32
      %231 = vector.broadcast %cst_92 : f32 to vector<1x64xf32>
      %232 = arith.subf %231, %230 : vector<1x64xf32>
      %233 = math.exp %232 : vector<1x64xf32>
      %cst_93 = arith.constant 1.000000e+00 : f32
      %234 = vector.broadcast %cst_93 : f32 to vector<1x64xf32>
      %235 = arith.addf %234, %233 : vector<1x64xf32>
      %236 = math.log %235 : vector<1x64xf32>
      %237 = arith.addf %229, %236 : vector<1x64xf32>
      %c0_94 = arith.constant 0 : index
      %238 = arith.index_cast %220 : i32 to index
      %c0_95 = arith.constant 0 : index
      %c0_96 = arith.constant 0 : index
      %239 = vector.load %arg5[%c0_94, %238, %c0_95, %c0_96] : memref<1x64x16x1xf32, #tpu.memory_space<vmem>>, vector<1x1x16x1xf32>
      %240 = vector.shape_cast %239 : vector<1x1x16x1xf32> to vector<1x16x1xf32>
      %241 = vector.shape_cast %240 : vector<1x16x1xf32> to vector<16x1xf32>
      %c0_97 = arith.constant 0 : index
      %242 = arith.index_cast %220 : i32 to index
      %c0_98 = arith.constant 0 : index
      %c0_99 = arith.constant 0 : index
      %243 = vector.load %arg6[%c0_97, %242, %c0_98, %c0_99] : memref<1x64x16x1xf32, #tpu.memory_space<vmem>>, vector<1x1x16x1xf32>
      %244 = vector.shape_cast %243 : vector<1x1x16x1xf32> to vector<1x16x1xf32>
      %245 = vector.shape_cast %244 : vector<1x16x1xf32> to vector<16x1xf32>
      %246 = vector.broadcast %237 : vector<1x64xf32> to vector<16x64xf32>
      %247 = arith.mulf %246, %4 : vector<16x64xf32>
      %248 = math.exp %247 : vector<16x64xf32>
      %249 = arith.mulf %248, %213 : vector<16x64xf32>
      %250 = arith.mulf %237, %223 : vector<1x64xf32>
      %251 = vector.broadcast %241 : vector<16x1xf32> to vector<16x64xf32>
      %252 = vector.broadcast %250 : vector<1x64xf32> to vector<16x64xf32>
      %253 = arith.mulf %251, %252 : vector<16x64xf32>
      %254 = arith.addf %249, %253 : vector<16x64xf32>
      %255 = vector.broadcast %245 : vector<16x1xf32> to vector<16x64xf32>
      %256 = arith.mulf %255, %254 : vector<16x64xf32>
      %cst_100 = arith.constant dense<0.000000e+00> : vector<64xf32>
      %257 = vector.multi_reduction <add>, %256, %cst_100 [0] : vector<16x64xf32> to vector<64xf32>
      %258 = vector.shape_cast %257 : vector<64xf32> to vector<1x64xf32>
      %259 = arith.mulf %6, %223 : vector<1x64xf32>
      %260 = arith.addf %258, %259 : vector<1x64xf32>
      %c6_i32 = arith.constant 6 : i32
      %261 = arith.addi %14, %c6_i32 : i32
      %c0_101 = arith.constant 0 : index
      %262 = arith.index_cast %261 : i32 to index
      %c0_102 = arith.constant 0 : index
      %263 = vector.load %arg2[%c0_101, %262, %c0_102] : memref<1x64x64xf32, #tpu.memory_space<vmem>>, vector<1x1x64xf32>
      %264 = vector.shape_cast %263 : vector<1x1x64xf32> to vector<1x64xf32>
      %c0_103 = arith.constant 0 : index
      %265 = arith.index_cast %261 : i32 to index
      %c0_104 = arith.constant 0 : index
      %266 = vector.load %arg3[%c0_103, %265, %c0_104] : memref<1x64x64xf32, #tpu.memory_space<vmem>>, vector<1x1x64xf32>
      %267 = vector.shape_cast %266 : vector<1x1x64xf32> to vector<1x64xf32>
      %268 = arith.addf %267, %8 : vector<1x64xf32>
      %cst_105 = arith.constant 0.000000e+00 : f32
      %269 = vector.broadcast %cst_105 : f32 to vector<1x64xf32>
      %270 = arith.maximumf %268, %269 : vector<1x64xf32>
      %271 = math.absf %268 : vector<1x64xf32>
      %cst_106 = arith.constant 0.000000e+00 : f32
      %272 = vector.broadcast %cst_106 : f32 to vector<1x64xf32>
      %273 = arith.subf %272, %271 : vector<1x64xf32>
      %274 = math.exp %273 : vector<1x64xf32>
      %cst_107 = arith.constant 1.000000e+00 : f32
      %275 = vector.broadcast %cst_107 : f32 to vector<1x64xf32>
      %276 = arith.addf %275, %274 : vector<1x64xf32>
      %277 = math.log %276 : vector<1x64xf32>
      %278 = arith.addf %270, %277 : vector<1x64xf32>
      %c0_108 = arith.constant 0 : index
      %279 = arith.index_cast %261 : i32 to index
      %c0_109 = arith.constant 0 : index
      %c0_110 = arith.constant 0 : index
      %280 = vector.load %arg5[%c0_108, %279, %c0_109, %c0_110] : memref<1x64x16x1xf32, #tpu.memory_space<vmem>>, vector<1x1x16x1xf32>
      %281 = vector.shape_cast %280 : vector<1x1x16x1xf32> to vector<1x16x1xf32>
      %282 = vector.shape_cast %281 : vector<1x16x1xf32> to vector<16x1xf32>
      %c0_111 = arith.constant 0 : index
      %283 = arith.index_cast %261 : i32 to index
      %c0_112 = arith.constant 0 : index
      %c0_113 = arith.constant 0 : index
      %284 = vector.load %arg6[%c0_111, %283, %c0_112, %c0_113] : memref<1x64x16x1xf32, #tpu.memory_space<vmem>>, vector<1x1x16x1xf32>
      %285 = vector.shape_cast %284 : vector<1x1x16x1xf32> to vector<1x16x1xf32>
      %286 = vector.shape_cast %285 : vector<1x16x1xf32> to vector<16x1xf32>
      %287 = vector.broadcast %278 : vector<1x64xf32> to vector<16x64xf32>
      %288 = arith.mulf %287, %4 : vector<16x64xf32>
      %289 = math.exp %288 : vector<16x64xf32>
      %290 = arith.mulf %289, %254 : vector<16x64xf32>
      %291 = arith.mulf %278, %264 : vector<1x64xf32>
      %292 = vector.broadcast %282 : vector<16x1xf32> to vector<16x64xf32>
      %293 = vector.broadcast %291 : vector<1x64xf32> to vector<16x64xf32>
      %294 = arith.mulf %292, %293 : vector<16x64xf32>
      %295 = arith.addf %290, %294 : vector<16x64xf32>
      %296 = vector.broadcast %286 : vector<16x1xf32> to vector<16x64xf32>
      %297 = arith.mulf %296, %295 : vector<16x64xf32>
      %cst_114 = arith.constant dense<0.000000e+00> : vector<64xf32>
      %298 = vector.multi_reduction <add>, %297, %cst_114 [0] : vector<16x64xf32> to vector<64xf32>
      %299 = vector.shape_cast %298 : vector<64xf32> to vector<1x64xf32>
      %300 = arith.mulf %6, %264 : vector<1x64xf32>
      %301 = arith.addf %299, %300 : vector<1x64xf32>
      %c7_i32 = arith.constant 7 : i32
      %302 = arith.addi %14, %c7_i32 : i32
      %c0_115 = arith.constant 0 : index
      %303 = arith.index_cast %302 : i32 to index
      %c0_116 = arith.constant 0 : index
      %304 = vector.load %arg2[%c0_115, %303, %c0_116] : memref<1x64x64xf32, #tpu.memory_space<vmem>>, vector<1x1x64xf32>
      %305 = vector.shape_cast %304 : vector<1x1x64xf32> to vector<1x64xf32>
      %c0_117 = arith.constant 0 : index
      %306 = arith.index_cast %302 : i32 to index
      %c0_118 = arith.constant 0 : index
      %307 = vector.load %arg3[%c0_117, %306, %c0_118] : memref<1x64x64xf32, #tpu.memory_space<vmem>>, vector<1x1x64xf32>
      %308 = vector.shape_cast %307 : vector<1x1x64xf32> to vector<1x64xf32>
      %309 = arith.addf %308, %8 : vector<1x64xf32>
      %cst_119 = arith.constant 0.000000e+00 : f32
      %310 = vector.broadcast %cst_119 : f32 to vector<1x64xf32>
      %311 = arith.maximumf %309, %310 : vector<1x64xf32>
      %312 = math.absf %309 : vector<1x64xf32>
      %cst_120 = arith.constant 0.000000e+00 : f32
      %313 = vector.broadcast %cst_120 : f32 to vector<1x64xf32>
      %314 = arith.subf %313, %312 : vector<1x64xf32>
      %315 = math.exp %314 : vector<1x64xf32>
      %cst_121 = arith.constant 1.000000e+00 : f32
      %316 = vector.broadcast %cst_121 : f32 to vector<1x64xf32>
      %317 = arith.addf %316, %315 : vector<1x64xf32>
      %318 = math.log %317 : vector<1x64xf32>
      %319 = arith.addf %311, %318 : vector<1x64xf32>
      %c0_122 = arith.constant 0 : index
      %320 = arith.index_cast %302 : i32 to index
      %c0_123 = arith.constant 0 : index
      %c0_124 = arith.constant 0 : index
      %321 = vector.load %arg5[%c0_122, %320, %c0_123, %c0_124] : memref<1x64x16x1xf32, #tpu.memory_space<vmem>>, vector<1x1x16x1xf32>
      %322 = vector.shape_cast %321 : vector<1x1x16x1xf32> to vector<1x16x1xf32>
      %323 = vector.shape_cast %322 : vector<1x16x1xf32> to vector<16x1xf32>
      %c0_125 = arith.constant 0 : index
      %324 = arith.index_cast %302 : i32 to index
      %c0_126 = arith.constant 0 : index
      %c0_127 = arith.constant 0 : index
      %325 = vector.load %arg6[%c0_125, %324, %c0_126, %c0_127] : memref<1x64x16x1xf32, #tpu.memory_space<vmem>>, vector<1x1x16x1xf32>
      %326 = vector.shape_cast %325 : vector<1x1x16x1xf32> to vector<1x16x1xf32>
      %327 = vector.shape_cast %326 : vector<1x16x1xf32> to vector<16x1xf32>
      %328 = vector.broadcast %319 : vector<1x64xf32> to vector<16x64xf32>
      %329 = arith.mulf %328, %4 : vector<16x64xf32>
      %330 = math.exp %329 : vector<16x64xf32>
      %331 = arith.mulf %330, %295 : vector<16x64xf32>
      %332 = arith.mulf %319, %305 : vector<1x64xf32>
      %333 = vector.broadcast %323 : vector<16x1xf32> to vector<16x64xf32>
      %334 = vector.broadcast %332 : vector<1x64xf32> to vector<16x64xf32>
      %335 = arith.mulf %333, %334 : vector<16x64xf32>
      %336 = arith.addf %331, %335 : vector<16x64xf32>
      %337 = vector.broadcast %327 : vector<16x1xf32> to vector<16x64xf32>
      %338 = arith.mulf %337, %336 : vector<16x64xf32>
      %cst_128 = arith.constant dense<0.000000e+00> : vector<64xf32>
      %339 = vector.multi_reduction <add>, %338, %cst_128 [0] : vector<16x64xf32> to vector<64xf32>
      %340 = vector.shape_cast %339 : vector<64xf32> to vector<1x64xf32>
      %341 = arith.mulf %6, %305 : vector<1x64xf32>
      %342 = arith.addf %340, %341 : vector<1x64xf32>
      %343 = tpu.concatenate %55, %96, %137, %178, %219, %260, %301, %342 in 0 : vector<1x64xf32>, vector<1x64xf32>, vector<1x64xf32>, vector<1x64xf32>, vector<1x64xf32>, vector<1x64xf32>, vector<1x64xf32>, vector<1x64xf32> -> vector<8x64xf32>
      %c0_129 = arith.constant 0 : index
      %344 = arith.index_cast %14 : i32 to index
      %c0_130 = arith.constant 0 : index
      %345 = vector.load %arg9[%c0_129, %344, %c0_130] : memref<1x64x64xf32, #tpu.memory_space<vmem>>, vector<1x8x64xf32>
      %346 = vector.shape_cast %345 : vector<1x8x64xf32> to vector<8x64xf32>
      %347 = vector.shape_cast %343 : vector<8x64xf32> to vector<1x8x64xf32>
      tpu.vector_store %arg9[%c0_129, %344, %c0_130], %347 {strides = array<i32>} : memref<1x64x64xf32, #tpu.memory_space<vmem>>, vector<1x8x64xf32>,
      scf.yield %336 : vector<16x64xf32>
    }
    %c8_i32_12 = arith.constant 8 : i32
    %c0_13 = arith.constant 0 : index
    %c0_14 = arith.constant 0 : index
    %12 = vector.load %arg10[%c0_13, %c0_14] : memref<16x64xf32, #tpu.memory_space<vmem>>, vector<16x64xf32>
    tpu.vector_store %arg10[%c0_13, %c0_14], %11 {strides = array<i32>} : memref<16x64xf32, #tpu.memory_space<vmem>>, vector<16x64xf32>,
    return
  }
  func.func @transform_0(%arg0: i32, %arg1: i32) -> (i32, i32, i32) {
    %c0_i32 = arith.constant 0 : i32
    %c0_i32_0 = arith.constant 0 : i32
    return %arg0, %arg1, %c0_i32 : i32, i32, i32
  }
  func.func @transform_1(%arg0: i32, %arg1: i32) -> (i32, i32, i32) {
    %c0_i32 = arith.constant 0 : i32
    %c0_i32_0 = arith.constant 0 : i32
    return %arg0, %arg1, %c0_i32 : i32, i32, i32
  }
  func.func @transform_2(%arg0: i32, %arg1: i32) -> (i32, i32, i32) {
    %c0_i32 = arith.constant 0 : i32
    %c0_i32_0 = arith.constant 0 : i32
    %c0_i32_1 = arith.constant 0 : i32
    return %arg0, %c0_i32, %c0_i32_0 : i32, i32, i32
  }
  func.func @transform_3(%arg0: i32, %arg1: i32) -> (i32, i32, i32, i32) {
    %c0_i32 = arith.constant 0 : i32
    %c0_i32_0 = arith.constant 0 : i32
    %c0_i32_1 = arith.constant 0 : i32
    return %arg0, %arg1, %c0_i32, %c0_i32_0 : i32, i32, i32, i32
  }
  func.func @transform_4(%arg0: i32, %arg1: i32) -> (i32, i32, i32, i32) {
    %c0_i32 = arith.constant 0 : i32
    %c0_i32_0 = arith.constant 0 : i32
    %c0_i32_1 = arith.constant 0 : i32
    return %arg0, %arg1, %c0_i32, %c0_i32_0 : i32, i32, i32, i32
  }
  func.func @transform_5(%arg0: i32, %arg1: i32) -> (i32, i32, i32) {
    %c0_i32 = arith.constant 0 : i32
    %c0_i32_0 = arith.constant 0 : i32
    %c0_i32_1 = arith.constant 0 : i32
    return %arg0, %c0_i32, %c0_i32_0 : i32, i32, i32
  }
  func.func @transform_6(%arg0: i32, %arg1: i32) -> (i32, i32, i32) {
    %c0_i32 = arith.constant 0 : i32
    %c0_i32_0 = arith.constant 0 : i32
    %c0_i32_1 = arith.constant 0 : i32
    return %arg0, %c0_i32, %c0_i32_0 : i32, i32, i32
  }
  func.func @transform_7(%arg0: i32, %arg1: i32) -> (i32, i32, i32) {
    %c0_i32 = arith.constant 0 : i32
    %c0_i32_0 = arith.constant 0 : i32
    return %arg0, %arg1, %c0_i32 : i32, i32, i32
  }
}

module attributes {stable_mosaic.version = 11 : i64} {
  func.func @_gate_proj_res_kernel(%arg0: i32, %arg1: i32, %arg2: memref<1x64x64xf32, #tpu.memory_space<vmem>>, %arg3: memref<1x1x64xf32, #tpu.memory_space<vmem>>, %arg4: memref<64x32xbf16, #tpu.memory_space<vmem>>, %arg5: memref<1x64x32xf32, #tpu.memory_space<vmem>>, %arg6: memref<1x64x32xf32, #tpu.memory_space<vmem>>) attributes {dimension_semantics = [#tpu.dimension_semantics<parallel>, #tpu.dimension_semantics<parallel>], iteration_bounds = array<i64: 2, 1>, scalar_prefetch = 0 : i64, scratch_operands = 0 : i64, tpu.core_type = #tpu.core_type<tc>, window_params = [{transform_indices = @transform_0, window_bounds = array<i64: 1, 64, 64>}, {transform_indices = @transform_1, window_bounds = array<i64: 1, 1, 64>}, {pipeline_mode = #tpu.pipeline_mode<synchronous>, transform_indices = @transform_2, window_bounds = array<i64: 64, 32>}, {transform_indices = @transform_3, window_bounds = array<i64: 1, 64, 32>}, {transform_indices = @transform_4, window_bounds = array<i64: 1, 64, 32>}]} {
    %c0 = arith.constant 0 : index
    %c0_0 = arith.constant 0 : index
    %c0_1 = arith.constant 0 : index
    %0 = vector.load %arg2[%c0, %c0_0, %c0_1] : memref<1x64x64xf32, #tpu.memory_space<vmem>>, vector<1x64x64xf32>
    %1 = vector.shape_cast %0 : vector<1x64x64xf32> to vector<64x64xf32>
    %c0_2 = arith.constant 0 : index
    %c0_3 = arith.constant 0 : index
    %c0_4 = arith.constant 0 : index
    %2 = vector.load %arg3[%c0_2, %c0_3, %c0_4] : memref<1x1x64xf32, #tpu.memory_space<vmem>>, vector<1x1x64xf32>
    %3 = vector.shape_cast %2 : vector<1x1x64xf32> to vector<1x64xf32>
    %cst = arith.constant 1.000000e+00 : f32
    %4 = vector.broadcast %cst : f32 to vector<1x64xf32>
    %5 = arith.addf %4, %3 : vector<1x64xf32>
    %6 = vector.broadcast %5 : vector<1x64xf32> to vector<64x64xf32>
    %7 = arith.mulf %1, %6 : vector<64x64xf32>
    %8 = arith.truncf %7 : vector<64x64xf32> to vector<64x64xbf16>
    %c0_5 = arith.constant 0 : index
    %c0_6 = arith.constant 0 : index
    %9 = vector.load %arg4[%c0_5, %c0_6] : memref<64x32xbf16, #tpu.memory_space<vmem>>, vector<64x32xbf16>
    %cst_7 = arith.constant dense<0.000000e+00> : vector<64x32xf32>
    %10 = tpu.matmul %8, %9, %cst_7 {dimension_numbers = #tpu.dot_dimension_numbers<[1], [0], [0], [1], [0, 0, 1, 1], [], []>} : vector<64x64xbf16>, vector<64x32xbf16>, vector<64x32xf32> -> vector<64x32xf32>
    %c0_8 = arith.constant 0 : index
    %c0_9 = arith.constant 0 : index
    %c0_10 = arith.constant 0 : index
    %11 = vector.load %arg5[%c0_8, %c0_9, %c0_10] : memref<1x64x32xf32, #tpu.memory_space<vmem>>, vector<1x64x32xf32>
    %12 = vector.shape_cast %11 : vector<1x64x32xf32> to vector<64x32xf32>
    %13 = arith.addf %10, %12 : vector<64x32xf32>
    %c0_11 = arith.constant 0 : index
    %c0_12 = arith.constant 0 : index
    %c0_13 = arith.constant 0 : index
    %14 = vector.load %arg6[%c0_11, %c0_12, %c0_13] : memref<1x64x32xf32, #tpu.memory_space<vmem>>, vector<1x64x32xf32>
    %15 = vector.shape_cast %14 : vector<1x64x32xf32> to vector<64x32xf32>
    %16 = vector.shape_cast %13 : vector<64x32xf32> to vector<1x64x32xf32>
    tpu.vector_store %arg6[%c0_11, %c0_12, %c0_13], %16 {strides = array<i32>} : memref<1x64x32xf32, #tpu.memory_space<vmem>>, vector<1x64x32xf32>,
    return
  }
  func.func @transform_0(%arg0: i32, %arg1: i32) -> (i32, i32, i32) {
    %c0_i32 = arith.constant 0 : i32
    %c0_i32_0 = arith.constant 0 : i32
    return %arg0, %arg1, %c0_i32 : i32, i32, i32
  }
  func.func @transform_1(%arg0: i32, %arg1: i32) -> (i32, i32, i32) {
    %c0_i32 = arith.constant 0 : i32
    %c0_i32_0 = arith.constant 0 : i32
    %c0_i32_1 = arith.constant 0 : i32
    return %arg0, %c0_i32, %c0_i32_0 : i32, i32, i32
  }
  func.func @transform_2(%arg0: i32, %arg1: i32) -> (i32, i32) {
    %c0_i32 = arith.constant 0 : i32
    %c0_i32_0 = arith.constant 0 : i32
    %c0_i32_1 = arith.constant 0 : i32
    return %c0_i32, %c0_i32_0 : i32, i32
  }
  func.func @transform_3(%arg0: i32, %arg1: i32) -> (i32, i32, i32) {
    %c0_i32 = arith.constant 0 : i32
    %c0_i32_0 = arith.constant 0 : i32
    return %arg0, %arg1, %c0_i32 : i32, i32, i32
  }
  func.func @transform_4(%arg0: i32, %arg1: i32) -> (i32, i32, i32) {
    %c0_i32 = arith.constant 0 : i32
    %c0_i32_0 = arith.constant 0 : i32
    return %arg0, %arg1, %c0_i32 : i32, i32, i32
  }
}

</mosaic_0001>

<bundles_post_ra>
// kernel: vss_block_forward.7
= control target key start
LH: loop header
LB: loop body
LE: loop exit
PB: predicated region body
PF: predicated region fallthrough
CT: control target
= control target key end

     0   :  { %9 = vsyncpa [#allocation3], 0  ;;  %s1339_s0 = inlined_call_operand.hbm [shape: f32[128,32], index: 0, kind: input, shape index: {}]   ;;  %s1340_s1 = inlined_call_operand.hbm [shape: f32[1,32], index: 1, kind: input, shape index: {}]   ;;  %s1341_s2 = inlined_call_operand.hbm [shape: f32[1,32], index: 2, kind: input, shape index: {}]   ;;  %s1342_s3 = inlined_call_operand.vmem [shape: bf16[32,128], index: 3, kind: input, shape index: {}]   ;;  %s1343_s4 = inlined_call_operand.vmem [shape: f32[128,128], index: 4, kind: output, shape index: {}]  }
   0x1   :  { %10 = vsyncpa [#allocation5], 0  ;;  %s29_s17 = sshll.u32 %s1340_s1, 4  ;;  %s738_s18 = smov [#allocation4]   ;;  %s30_s17 = int_to_ptr.hbm [resolvable:$true] %s29_s17 }
   0x2   :  { %s31_s19 = sshll.u32 %s738_s18, 4  ;;  %s15_s22 = sshll.u32 %s1339_s0, 4  ;;  %s32_s19 = int_to_ptr.vmem [resolvable:$true] %s31_s19  ;;  %s16_s22 = int_to_ptr.hbm [resolvable:$true] %s15_s22 }
   0x3   :  { %34 = dma.hbm_to_vmem [thread:$0]  %s30_s17, 16, %s32_s19, [#allocation5]  }
   0x4   :  { %s739_s23 = smov [#allocation2]   ;;  %s740_s25 = smov 128  }
   0x5   :  { %s17_s24 = sshll.u32 %s739_s23, 4  ;;  %s741_s26 = smov 8   ;;  %s18_s24 = int_to_ptr.vmem [resolvable:$true] %s17_s24 }
   0x6   :  { %23 = dma.hbm_to_vmem [thread:$0]  %s16_s22, 2048, %s18_s24, [#allocation3], %s740_s25, %s740_s25, %s741_s26  }
   0x7   :  { %s40_s1 = sshll.u32 %s1341_s2, 4  ;;  %s742_s29 = smov [#allocation6]   ;;  %s41_s1 = int_to_ptr.hbm [resolvable:$true] %s40_s1 }
   0x8   :  { %s42_s30 = sshll.u32 %s742_s29, 4  ;;  %s43_s30 = int_to_ptr.vmem [resolvable:$true] %s42_s30 }
   0x9   :  { %45 = dma.hbm_to_vmem [thread:$0]  %s41_s1, 16, %s43_s30, [#allocation5]  }
   0xa   :  { %734 = dma.done.wait [#allocation3], 2048  }
   0xb   :  { %735 = vsyncadd [#allocation3], 4294965248 }
   0xc   :  { %736 = dma.done.wait [#allocation5], 32  }
   0xd   :  { %737 = vsyncadd [#allocation5], 4294967264  ;;  %vm77_vm0 = vcmask 261120   ;;  %v73_v0 = vld [vmem:[#allocation2 + $0x60] sm:$0xff]  ;;  %v784_v6 = vld [vmem:[#allocation2 + $0x68] sm:$0xff]  ;;  %v743_v32 = vmov 32.0  }
   0xe   :  { %v69_v1 = vld [vmem:[#allocation2 + $0x40] sm:$0xff]  ;;  %v114_v3 = vsel %vm77_vm0, %v73_v0, 0.0  ;;  %v786_v7 = vld [vmem:[#allocation2 + $0x48] sm:$0xff]  ;;  %v117_v9 = vsel %vm77_vm0, %v784_v6, 0.0  ;;  %v800_v14 = vld [vmem:[#allocation2 + $0x50] sm:$0xff]  ;;  %628 = vrcp.f32 %v743_v32 }
   0xf   :  { %v778_v2 = vld [vmem:[#allocation2] sm:$0xff]  ;;  %v102_v4 = vsel %vm77_vm0, %v69_v1, 0.0  ;;  %115 = vadd.xlane.f32.xlu1 %v114_v3  ;;  %v788_v8 = vld [vmem:[#allocation2 + $0x8] sm:$0xff]  ;;  %v105_v10 = vsel %vm77_vm0, %v786_v7, 0.0  ;;  %v108_v17 = vsel %vm77_vm0, %v800_v14, 0.0  ;;  %v808_v18 = vld [vmem:[#allocation2 + $0x58] sm:$0xff] }
  0x10   :  { %v78_v5 = vsel %vm77_vm0, %v778_v2, 0.0  ;;  %103 = vadd.xlane.f32.xlu0 %v102_v4  ;;  %v81_v11 = vsel %vm77_vm0, %v788_v8, 0.0  ;;  %v796_v12 = vld [vmem:[#allocation2 + $0x20] sm:$0xff]  ;;  %v798_v13 = vld [vmem:[#allocation2 + $0x28] sm:$0xff]  ;;  %v810_v19 = vld [vmem:[#allocation2 + $0x70] sm:$0xff]  ;;  %v111_v21 = vsel %vm77_vm0, %v808_v18, 0.0 }
  0x11   :  { %79 = vadd.xlane.f32.xlu2 %v78_v5  ;;  %v90_v15 = vsel %vm77_vm0, %v796_v12, 0.0  ;;  %v93_v16 = vsel %vm77_vm0, %v798_v13, 0.0  ;;  %v812_v20 = vld [vmem:[#allocation2 + $0x78] sm:$0xff]  ;;  %v120_v22 = vsel %vm77_vm0, %v810_v19, 0.0  ;;  %v820_v24 = vld [vmem:[#allocation2 + $0x10] sm:$0xff] }
  0x12   :  { %v123_v23 = vsel %vm77_vm0, %v812_v20, 0.0  ;;  %v822_v25 = vld [vmem:[#allocation2 + $0x18] sm:$0xff]  ;;  %v824_v26 = vld [vmem:[#allocation2 + $0x30] sm:$0xff]  ;;  %v84_v27 = vsel %vm77_vm0, %v820_v24, 0.0 }
  0x13   :  { %v87_v28 = vsel %vm77_vm0, %v822_v25, 0.0  ;;  %v96_v29 = vsel %vm77_vm0, %v824_v26, 0.0  ;;  %v832_v30 = vld [vmem:[#allocation2 + $0x38] sm:$0xff] }
  0x14   :  { %v99_v31 = vsel %vm77_vm0, %v832_v30, 0.0  ;;  %v629_v33 = vpop.eup %628 }
  0x15   :  { %v127_v34 = vmul.f32 32.0, %v629_v33  ;;  %vm131_vm1 = vweird.f32 %v629_v33 }
  0x17   :  { %118 = vadd.xlane.f32.xlu1 %v117_v9  ;;  %v128_v35 = vsub.f32 1.0, %v127_v34 }
  0x18   :  { %106 = vadd.xlane.f32.xlu0 %v105_v10 }
  0x19   :  { %82 = vadd.xlane.f32.xlu2 %v81_v11  ;;  %v129_v36 = vmul.f32 %v629_v33, %v128_v35 }
  0x1b   :  { %v130_v37 = vadd.f32 %v629_v33, %v129_v36 }
  0x1d   :  { %v836_v38 = vsel %vm131_vm1, %v629_v33, %v130_v37 }
  0x1f   :  { %94 = vadd.xlane.f32.xlu1 %v93_v16 }
  0x20   :  { %91 = vadd.xlane.f32.xlu0 %v90_v15 }
  0x21   :  { %109 = vadd.xlane.f32.xlu2 %v108_v17 }
  0x27   :  { %121 = vadd.xlane.f32.xlu1 %v120_v22 }
  0x28   :  { %112 = vadd.xlane.f32.xlu0 %v111_v21 }
  0x29   :  { %124 = vadd.xlane.f32.xlu2 %v123_v23 }
  0x2f   :  { %88 = vadd.xlane.f32.xlu1 %v87_v28 }
  0x30   :  { %85 = vadd.xlane.f32.xlu0 %v84_v27 }
  0x31   :  { %97 = vadd.xlane.f32.xlu2 %v96_v29 }
  0x38   :  { %100 = vadd.xlane.f32.xlu0 %v99_v31 }
  0x82   :  { %v116_v39 = vpop.xlane.xlu1 %115 }
  0x83   :  { %v104_v40 = vpop.xlane.xlu0 %103  ;;  %v145_v41 = vmul.f32 %v836_v38, %v116_v39 }
  0x84   :  { %v141_v42 = vmul.f32 %v836_v38, %v104_v40  ;;  %v80_v43 = vpop.xlane.xlu2 %79 }
  0x85   :  { %v840_v44 = vsub.f32 %v73_v0, %v145_v41  ;;  %v133_v56 = vmul.f32 %v836_v38, %v80_v43 }
  0x86   :  { %v842_v45 = vsub.f32 %v69_v1, %v141_v42 }
  0x87   :  { %v177_v47 = vmul.f32 %v840_v44, %v840_v44  ;;  %v870_v63 = vsub.f32 %v778_v2, %v133_v56 }
  0x88   :  { %v173_v46 = vmul.f32 %v842_v45, %v842_v45 }
  0x89   :  { %v217_v49 = vsel %vm77_vm0, %v177_v47, 0.0  ;;  %v165_v10 = vmul.f32 %v870_v63, %v870_v63 }
  0x8a   :  { %v205_v48 = vsel %vm77_vm0, %v173_v46, 0.0  ;;  %v119_v50 = vpop.xlane.xlu1 %118  ;;  %218 = vadd.xlane.f32.xlu0 %v217_v49 }
  0x8b   :  { %v107_v51 = vpop.xlane.xlu0 %106  ;;  %206 = vadd.xlane.f32.xlu1 %v205_v48  ;;  %v146_v52 = vmul.f32 %v836_v38, %v119_v50 }
  0x8c   :  { %v142_v53 = vmul.f32 %v836_v38, %v107_v51  ;;  %v83_v54 = vpop.xlane.xlu2 %82 }
  0x8d   :  { %v134_v55 = vmul.f32 %v836_v38, %v83_v54  ;;  %v855_v57 = vsub.f32 %v784_v6, %v146_v52 }
  0x8e   :  { %v858_v58 = vsub.f32 %v786_v7, %v142_v53 }
  0x8f   :  { %v861_v59 = vsub.f32 %v788_v8, %v134_v55  ;;  %v178_v60 = vmul.f32 %v855_v57, %v855_v57 }
  0x90   :  { %v174_v61 = vmul.f32 %v858_v58, %v858_v58 }
  0x91   :  { %v166_v62 = vmul.f32 %v861_v59, %v861_v59  ;;  %v220_v0 = vsel %vm77_vm0, %v178_v60, 0.0 }
  0x92   :  { %v208_v1 = vsel %vm77_vm0, %v174_v61, 0.0  ;;  %v95_v5 = vpop.xlane.xlu1 %94 }
  0x93   :  { %v92_v3 = vpop.xlane.xlu0 %91  ;;  %221 = vadd.xlane.f32.xlu1 %v220_v0  ;;  %209 = vadd.xlane.f32.xlu2 %v208_v1  ;;  %v184_v4 = vsel %vm77_vm0, %v166_v62, 0.0  ;;  %v138_v8 = vmul.f32 %v836_v38, %v95_v5 }
  0x94   :  { %v137_v6 = vmul.f32 %v836_v38, %v92_v3  ;;  %185 = vadd.xlane.f32.xlu0 %v184_v4  ;;  %v110_v7 = vpop.xlane.xlu2 %109 }
  0x95   :  { %v143_v9 = vmul.f32 %v836_v38, %v110_v7  ;;  %v887_v15 = vsub.f32 %v798_v13, %v138_v8 }
  0x96   :  { %v879_v2 = vsub.f32 %v796_v12, %v137_v6  ;;  %v181_v12 = vsel %vm77_vm0, %v165_v10, 0.0 }
  0x97   :  { %v884_v11 = vsub.f32 %v800_v14, %v143_v9  ;;  %v170_v29 = vmul.f32 %v887_v15, %v887_v15 }
  0x98   :  { %v169_v16 = vmul.f32 %v879_v2, %v879_v2 }
  0x99   :  { %v175_v17 = vmul.f32 %v884_v11, %v884_v11  ;;  %v196_v36 = vsel %vm77_vm0, %v170_v29, 0.0 }
  0x9a   :  { %v193_v21 = vsel %vm77_vm0, %v169_v16, 0.0  ;;  %v122_v14 = vpop.xlane.xlu1 %121 }
  0x9b   :  { %v113_v22 = vpop.xlane.xlu0 %112  ;;  %194 = vadd.xlane.f32.xlu1 %v193_v21  ;;  %182 = vadd.xlane.f32.xlu2 %v181_v12  ;;  %v211_v23 = vsel %vm77_vm0, %v175_v17, 0.0  ;;  %v147_v28 = vmul.f32 %v836_v38, %v122_v14  ;;  %v612_v17 = vld [vmem:[%s1342_s3] sm:$0xff] }
  0x9c   :  { %v144_v27 = vmul.f32 %v836_v38, %v113_v22  ;;  %212 = vadd.xlane.f32.xlu0 %v211_v23  ;;  %v125_v13 = vpop.xlane.xlu2 %124 }
  0x9d   :  { %v148_v31 = vmul.f32 %v836_v38, %v125_v13  ;;  %v908_v34 = vsub.f32 %v810_v19, %v147_v28 }
  0x9e   :  { %v902_v32 = vsub.f32 %v808_v18, %v144_v27 }
  0x9f   :  { %v905_v33 = vsub.f32 %v812_v20, %v148_v31  ;;  %v179_v43 = vmul.f32 %v908_v34, %v908_v34 }
  0xa0   :  { %v176_v35 = vmul.f32 %v902_v32, %v902_v32 }
  0xa1   :  { %v180_v37 = vmul.f32 %v905_v33, %v905_v33  ;;  %v223_v51 = vsel %vm77_vm0, %v179_v43, 0.0 }
  0xa2   :  { %v214_v39 = vsel %vm77_vm0, %v176_v35, 0.0  ;;  %v89_v20 = vpop.xlane.xlu1 %88 }
  0xa3   :  { %215 = vadd.xlane.f32.xlu1 %v214_v39  ;;  %v86_v40 = vpop.xlane.xlu0 %85  ;;  %197 = vadd.xlane.f32.xlu2 %v196_v36  ;;  %v226_v18 = vsel %vm77_vm0, %v180_v37, 0.0  ;;  %v136_v42 = vmul.f32 %v836_v38, %v89_v20 }
  0xa4   :  { %v135_v41 = vmul.f32 %v836_v38, %v86_v40  ;;  %227 = vadd.xlane.f32.xlu0 %v226_v18  ;;  %v98_v19 = vpop.xlane.xlu2 %97 }
  0xa5   :  { %v139_v46 = vmul.f32 %v836_v38, %v98_v19  ;;  %v929_v49 = vsub.f32 %v822_v25, %v136_v42 }
  0xa6   :  { %v923_v47 = vsub.f32 %v820_v24, %v135_v41 }
  0xa7   :  { %v926_v48 = vsub.f32 %v824_v26, %v139_v46  ;;  %v168_v25 = vmul.f32 %v929_v49, %v929_v49 }
  0xa8   :  { %v167_v50 = vmul.f32 %v923_v47, %v923_v47 }
  0xa9   :  { %v171_v52 = vmul.f32 %v926_v48, %v926_v48  ;;  %v190_v60 = vsel %vm77_vm0, %v168_v25, 0.0 }
  0xaa   :  { %v187_v53 = vsel %vm77_vm0, %v167_v50, 0.0 }
  0xab   :  { %188 = vadd.xlane.f32.xlu1 %v187_v53  ;;  %v101_v54 = vpop.xlane.xlu0 %100  ;;  %224 = vadd.xlane.f32.xlu2 %v223_v51  ;;  %v199_v24 = vsel %vm77_vm0, %v171_v52, 0.0 }
  0xac   :  { %v140_v26 = vmul.f32 %v836_v38, %v101_v54  ;;  %200 = vadd.xlane.f32.xlu0 %v199_v24 }
  0xae   :  { %v942_v55 = vsub.f32 %v832_v30, %v140_v26  ;;  %v613_v30 = vld [vmem:[%s1342_s3 + $0x8] sm:$0xff] }
  0xaf   :  { %615 = vmatpush.bf16.msra.mxu2 %v613_v30  ;;  %616 = vmatpush.bf16.msra.mxu3 %v613_v30 }
  0xb0   :  { %v172_v56 = vmul.f32 %v942_v55, %v942_v55  ;;  %531 = vmatpush.bf16.msra.mxu0 %v613_v30  ;;  %614 = vmatpush.bf16.msra.mxu1 %v613_v30 }
  0xb2   :  { %v202_v61 = vsel %vm77_vm0, %v172_v56, 0.0 }
  0xb3   :  { %203 = vadd.xlane.f32.xlu1 %v202_v61  ;;  %191 = vadd.xlane.f32.xlu2 %v190_v60 }
  0xb4   :  { %618 = vmatpush.bf16.msra.mxu2 %v612_v17  ;;  %619 = vmatpush.bf16.msra.mxu3 %v612_v17 }
  0xb5   :  { %532 = vmatpush.bf16.msra.mxu0 %v612_v17  ;;  %617 = vmatpush.bf16.msra.mxu1 %v612_v17 }
  0xfd   :  { %v219_v0 = vpop.xlane.xlu0 %218 }
  0xfe   :  { %v207_v62 = vpop.xlane.xlu1 %206  ;;  %v241_v3 = vmul.f32 %v219_v0, %v836_v38 }
  0xff   :  { %v237_v1 = vmul.f32 %v207_v62, %v836_v38 }
 0x100   :  { %v257_v5 = vadd.f32 1e-06, %v241_v3 }
 0x101   :  { %v253_v4 = vadd.f32 1e-06, %v237_v1 }
 0x102   :  { %vm387_vm6 = vweird.f32 %v257_v5 }
 0x103   :  { %630 = vrsqrt.f32 %v253_v4  ;;  %vm347_vm4 = vweird.f32 %v253_v4 }
 0x104   :  { %632 = vrsqrt.f32 %v257_v5 }
 0x106   :  { %v222_v6 = vpop.xlane.xlu1 %221  ;;  %v210_v7 = vpop.xlane.xlu2 %209 }
 0x107   :  { %v242_v8 = vmul.f32 %v222_v6, %v836_v38  ;;  %v186_v9 = vpop.xlane.xlu0 %185  ;;  %v238_v10 = vmul.f32 %v210_v7, %v836_v38 }
 0x108   :  { %v230_v16 = vmul.f32 %v186_v9, %v836_v38 }
 0x109   :  { %v959_v21 = vpop.eup %630  ;;  %v961_v12 = vadd.f32 1e-06, %v242_v8  ;;  %v963_v22 = vadd.f32 1e-06, %v238_v10 }
 0x10a   :  { %v965_v23 = vpop.eup %632  ;;  %v342_v14 = vmul.f32 %v959_v21, %v253_v4  ;;  %v968_v27 = vadd.f32 1e-06, %v230_v16  ;;  %vm348_vm2 = vweird.f32 %v959_v21 }
 0x10b   :  { %v382_v13 = vmul.f32 %v965_v23, %v257_v5  ;;  %634 = vrsqrt.f32 %v961_v12  ;;  %vm388_vm3 = vweird.f32 %v965_v23  ;;  %vm1002_vm5 = vmor %vm347_vm4, %vm348_vm2  ;;  %vm397_vm8 = vweird.f32 %v961_v12 }
 0x10c   :  { %v343_v28 = vmul.f32 %v959_v21, %v342_v14  ;;  %636 = vrsqrt.f32 %v968_v27  ;;  %vm1009_vm7 = vmor %vm387_vm6, %vm388_vm3  ;;  %vm277_vm9 = vweird.f32 %v968_v27  ;;  %vm357_vm11 = vweird.f32 %v963_v22 }
 0x10d   :  { %v383_v29 = vmul.f32 %v965_v23, %v382_v13  ;;  %638 = vrsqrt.f32 %v963_v22 }
 0x10e   :  { %v344_v31 = vmul.f32 0.5, %v343_v28  ;;  %v195_v35 = vpop.xlane.xlu1 %194  ;;  %v183_v36 = vpop.xlane.xlu2 %182 }
 0x10f   :  { %v384_v37 = vmul.f32 0.5, %v383_v29  ;;  %v233_v39 = vmul.f32 %v195_v35, %v836_v38  ;;  %v213_v40 = vpop.xlane.xlu0 %212  ;;  %v229_v18 = vmul.f32 %v183_v36, %v836_v38 }
 0x110   :  { %v345_v20 = vsub.f32 1.5, %v344_v31  ;;  %v239_v41 = vmul.f32 %v213_v40, %v836_v38  ;;  %v1035_v31 = vld [vmem:[#allocation4] ss:$0 sm:$0xff] }
 0x111   :  { %v979_v19 = vpop.eup %634  ;;  %v385_v42 = vsub.f32 1.5, %v384_v37  ;;  %v982_v43 = vadd.f32 1e-06, %v233_v39  ;;  %v991_v52 = vadd.f32 1e-06, %v229_v18 }
 0x112   :  { %v984_v46 = vpop.eup %636  ;;  %v392_v50 = vmul.f32 %v979_v19, %v961_v12  ;;  %v989_v51 = vadd.f32 1e-06, %v239_v41  ;;  %v346_v54 = vmul.f32 %v959_v21, %v345_v20  ;;  %vm398_vm12 = vweird.f32 %v979_v19 }
 0x113   :  { %v639_v53 = vpop.eup %638  ;;  %v386_v24 = vmul.f32 %v965_v23, %v385_v42  ;;  %v272_v26 = vmul.f32 %v984_v46, %v968_v27  ;;  %640 = vrsqrt.f32 %v982_v43  ;;  %vm278_vm14 = vweird.f32 %v984_v46  ;;  %vm1066_vm2 = vmor %vm397_vm8, %vm398_vm12 }
 0x114   :  { %v393_v25 = vmul.f32 %v979_v19, %v392_v50  ;;  %v352_v56 = vmul.f32 %v639_v53, %v963_v22  ;;  %642 = vrsqrt.f32 %v989_v51  ;;  %v350_v30 = vsel %vm1002_vm5, %v959_v21, %v346_v54  ;;  %vm1088_vm5 = vmor %vm277_vm9, %vm278_vm14 }
 0x115   :  { %v273_v61 = vmul.f32 %v984_v46, %v272_v26  ;;  %v390_v5 = vsel %vm1009_vm7, %v965_v23, %v386_v24  ;;  %644 = vrsqrt.f32 %v991_v52  ;;  %vm358_vm10 = vweird.f32 %v639_v53 }
 0x116   :  { %v394_v0 = vmul.f32 0.5, %v393_v25  ;;  %v353_v1 = vmul.f32 %v639_v53, %v352_v56  ;;  %v216_v3 = vpop.xlane.xlu1 %215  ;;  %v198_v4 = vpop.xlane.xlu2 %197  ;;  %v429_v13 = vmul.f32 %v350_v30, %v842_v45  ;;  %v433_v28 = vmul.f32 %v390_v5, %v840_v44  ;;  %vm359_vm13 = vmor %vm357_vm11, %vm358_vm10  ;;  %v1060_v56 = vld [vmem:[#allocation6] ss:$0 sm:$0xff] }
 0x117   :  { %v228_v6 = vpop.xlane.xlu0 %227  ;;  %v274_v7 = vmul.f32 0.5, %v273_v61  ;;  %v240_v9 = vmul.f32 %v216_v3, %v836_v38  ;;  %v234_v21 = vmul.f32 %v198_v4, %v836_v38  ;;  %vm307_vm15 = vweird.f32 %v982_v43 }
 0x118   :  { %v354_v8 = vmul.f32 0.5, %v353_v1  ;;  %v244_v10 = vmul.f32 %v228_v6, %v836_v38  ;;  %v395_v17 = vsub.f32 1.5, %v394_v0  ;;  %vm367_vm1 = vweird.f32 %v989_v51 }
 0x119   :  { %v1023_v16 = vpop.eup %640  ;;  %v1033_v29 = vadd.f32 1e-06, %v240_v9  ;;  %v275_v36 = vsub.f32 1.5, %v274_v7  ;;  %v1049_v22 = vadd.f32 1e-06, %v234_v21  ;;  %v449_v25 = vmul.f32 %v1035_v31, %v429_v13 }
 0x11a   :  { %v355_v14 = vsub.f32 1.5, %v354_v8  ;;  %v302_v23 = vmul.f32 %v1023_v16, %v982_v43  ;;  %v1037_v35 = vpop.eup %642  ;;  %v1040_v40 = vadd.f32 1e-06, %v244_v10  ;;  %v396_v45 = vmul.f32 %v979_v19, %v395_v17 }
 0x11b   :  { %v1042_v18 = vpop.eup %644  ;;  %v362_v44 = vmul.f32 %v1037_v35, %v989_v51  ;;  %646 = vrsqrt.f32 %v1033_v29  ;;  %vm267_vm3 = vweird.f32 %v991_v52  ;;  %v453_v62 = vmul.f32 %v1035_v31, %v433_v28 }
 0x11c   :  { %v356_v37 = vmul.f32 %v639_v53, %v355_v14  ;;  %v303_v39 = vmul.f32 %v1023_v16, %v302_v23  ;;  %v262_v42 = vmul.f32 %v1042_v18, %v991_v52  ;;  %648 = vrsqrt.f32 %v1040_v40 }
 0x11d   :  { %v363_v54 = vmul.f32 %v1037_v35, %v362_v44  ;;  %v400_v12 = vsel %vm1066_vm2, %v979_v19, %v396_v45  ;;  %650 = vrsqrt.f32 %v1049_v22  ;;  %vm308_vm4 = vweird.f32 %v1023_v16 }
 0x11e   :  { %v360_v20 = vsel %vm359_vm13, %v639_v53, %v356_v37  ;;  %v304_v41 = vmul.f32 0.5, %v303_v39  ;;  %v189_v24 = vpop.xlane.xlu1 %188  ;;  %v1071_v53 = vmul.f32 %v984_v46, %v275_v36  ;;  %v263_v60 = vmul.f32 %v1042_v18, %v262_v42  ;;  %v225_v61 = vpop.xlane.xlu2 %224  ;;  %vm1130_vm9 = vmor %vm307_vm15, %vm308_vm4 }
 0x11f   :  { %v430_v50 = vmul.f32 %v360_v20, %v858_v58  ;;  %v201_v26 = vpop.xlane.xlu0 %200  ;;  %v364_v1 = vmul.f32 0.5, %v363_v54  ;;  %v231_v4 = vmul.f32 %v189_v24, %v836_v38  ;;  %v243_v6 = vmul.f32 %v225_v61, %v836_v38 }
 0x120   :  { %v305_v0 = vsub.f32 1.5, %v304_v41  ;;  %v264_v3 = vmul.f32 0.5, %v263_v60  ;;  %v235_v30 = vmul.f32 %v201_v26, %v836_v38  ;;  %v469_v8 = vadd.f32 %v1060_v56, %v449_v25 }
 0x121   :  { %v365_v19 = vsub.f32 1.5, %v364_v1  ;;  %v450_v7 = vmul.f32 %v1035_v31, %v430_v50  ;;  %v434_v9 = vmul.f32 %v400_v12, %v855_v57  ;;  %v280_v10 = vsel %vm1088_vm5, %v984_v46, %v1071_v53  ;;  %v1102_v21 = vpop.eup %646 }
 0x122   :  { %v265_v17 = vsub.f32 1.5, %v264_v3  ;;  %v1100_v27 = vadd.f32 1e-06, %v231_v4  ;;  %v1105_v14 = vmul.f32 %v1023_v16, %v305_v0  ;;  %vm368_vm6 = vweird.f32 %v1037_v35  ;;  %v1111_v57 = vpop.eup %648 }
 0x123   :  { %vm268_vm7 = vweird.f32 %v1042_v18  ;;  %v1109_v23 = vadd.f32 1e-06, %v235_v30  ;;  %v372_v28 = vmul.f32 %v1102_v21, %v1033_v29  ;;  %v1117_v36 = vadd.f32 1e-06, %v243_v6  ;;  %v1119_v37 = vpop.eup %650  ;;  %vm1159_vm14 = vmor %vm367_vm1, %vm368_vm6 }
 0x124   :  { %v266_v13 = vmul.f32 %v1042_v18, %v265_v17  ;;  %652 = vrsqrt.f32 %v1100_v27  ;;  %v366_v39 = vmul.f32 %v1037_v35, %v365_v19  ;;  %vm377_vm8 = vweird.f32 %v1033_v29  ;;  %vm1148_vm12 = vmor %vm267_vm3, %vm268_vm7 }
 0x125   :  { %v412_v45 = vmul.f32 %v1111_v57, %v1040_v40  ;;  %v470_v44 = vadd.f32 %v1060_v56, %v450_v7  ;;  %v373_v41 = vmul.f32 %v1102_v21, %v372_v28  ;;  %vm417_vm10 = vweird.f32 %v1040_v40 }
 0x126   :  { %v312_v42 = vmul.f32 %v1119_v37, %v1049_v22  ;;  %vm317_vm11 = vweird.f32 %v1049_v22  ;;  %v454_v50 = vmul.f32 %v1035_v31, %v434_v9  ;;  %v310_v43 = vsel %vm1130_vm9, %v1023_v16, %v1105_v14  ;;  %v204_v26 = vpop.xlane.xlu1 %203  ;;  %v192_v60 = vpop.xlane.xlu2 %191 }
 0x127   :  { %vm378_vm13 = vweird.f32 %v1102_v21  ;;  %v413_v24 = vmul.f32 %v1111_v57, %v412_v45  ;;  %654 = vrsqrt.f32 %v1109_v23  ;;  %v270_v52 = vsel %vm1148_vm12, %v1042_v18, %v266_v13 }
 0x128   :  { %v374_v25 = vmul.f32 0.5, %v373_v41  ;;  %v313_v58 = vmul.f32 %v1119_v37, %v312_v42  ;;  %656 = vrsqrt.f32 %v1117_v36  ;;  %v370_v61 = vsel %vm1159_vm14, %v1037_v35, %v366_v39  ;;  %vm1189_vm1 = vmor %vm377_vm8, %vm378_vm13 }
 0x129   :  { %v414_v12 = vmul.f32 0.5, %v413_v24  ;;  %v481_v51 = vpack.c.bf16 %v470_v44, %v469_v8  ;;  %v473_v0 = vadd.f32 %v1060_v56, %v453_v62  ;;  %v474_v18 = vadd.f32 %v1060_v56, %v454_v50 }
 0x12a   :  { %v1172_v1 = vpop.eup %652  ;;  %v375_v3 = vsub.f32 1.5, %v374_v25  ;;  %v314_v4 = vmul.f32 0.5, %v313_v58  ;;  %v236_v30 = vmul.f32 %v204_v26, %v836_v38  ;;  %v421_v19 = vmul.f32 %v270_v52, %v870_v63 }
 0x12b   :  { %v415_v6 = vsub.f32 1.5, %v414_v12  ;;  %v282_v7 = vmul.f32 %v1172_v1, %v1100_v27  ;;  %608 = vmatmul.msk.bf16.vlgmr.msra.gmra.mxu2 %vm77_vm0, %v481_v51  ;;  %v232_v35 = vmul.f32 %v192_v60, %v836_v38  ;;  %vm318_vm15 = vweird.f32 %v1119_v37 }
 0x12c   :  { %v376_v62 = vmul.f32 %v1102_v21, %v375_v3  ;;  %v315_v8 = vsub.f32 1.5, %v314_v4  ;;  %v483_v9 = vpack.c.bf16 %v474_v18, %v473_v0  ;;  %vm418_vm2 = vweird.f32 %v1111_v57  ;;  %vm319_vm3 = vmor %vm317_vm11, %vm318_vm15 }
 0x12d   :  { %v1183_v17 = vpop.eup %654  ;;  %v416_v14 = vmul.f32 %v1111_v57, %v415_v6  ;;  %v283_v38 = vmul.f32 %v1172_v1, %v282_v7  ;;  %v1196_v13 = vadd.f32 1e-06, %v236_v30  ;;  %v1205_v44 = vadd.f32 1e-06, %v232_v35  ;;  %vm1228_vm4 = vmor %vm417_vm10, %vm418_vm2 }
 0x12e   :  { %v657_v28 = vpop.eup %656  ;;  %v380_v39 = vsel %vm1189_vm1, %v1102_v21, %v376_v62  ;;  %v316_v45 = vmul.f32 %v1119_v37, %v315_v8  ;;  %v322_v29 = vmul.f32 %v1183_v17, %v1109_v23  ;;  %610 = vmatmul.msk.bf16.vlgmr.msra.gmra.mxu3 %vm77_vm0, %v483_v9  ;;  %v422_v20 = vmul.f32 %v280_v10, %v861_v59 }
 0x12f   :  { %v425_v41 = vmul.f32 %v310_v43, %v879_v2  ;;  %v402_v21 = vmul.f32 %v657_v28, %v1117_v36  ;;  %v441_v42 = vmul.f32 %v1035_v31, %v421_v19  ;;  %v431_v50 = vmul.f32 %v370_v61, %v884_v11 }
 0x130   :  { %v432_v54 = vmul.f32 %v380_v39, %v902_v32  ;;  %v320_v5 = vsel %vm319_vm3, %v1119_v37, %v316_v45  ;;  %v323_v46 = vmul.f32 %v1183_v17, %v322_v29  ;;  %v284_v22 = vmul.f32 0.5, %v283_v38 }
 0x131   :  { %v426_v2 = vmul.f32 %v320_v5, %v887_v15  ;;  %v403_v53 = vmul.f32 %v657_v28, %v402_v21  ;;  %658 = vrsqrt.f32 %v1196_v13  ;;  %v420_v11 = vsel %vm1228_vm4, %v1111_v57, %v416_v14 }
 0x132   :  { %v324_v32 = vmul.f32 0.5, %v323_v46  ;;  %vm327_vm5 = vweird.f32 %v1109_v23  ;;  %660 = vrsqrt.f32 %v1205_v44  ;;  %vm408_vm6 = vweird.f32 %v657_v28 }
 0x133   :  { %v404_v40 = vmul.f32 0.5, %v403_v53  ;;  %v442_v10 = vmul.f32 %v1035_v31, %v422_v20  ;;  %v461_v37 = vadd.f32 %v1060_v56, %v441_v42  ;;  %v445_v43 = vmul.f32 %v1035_v31, %v425_v41 }
 0x134   :  { %v325_v15 = vsub.f32 1.5, %v324_v32  ;;  %v446_v24 = vmul.f32 %v1035_v31, %v426_v2  ;;  %v451_v26 = vmul.f32 %v1035_v31, %v431_v50  ;;  %v285_v16 = vsub.f32 1.5, %v284_v22 }
 0x135   :  { %v405_v57 = vsub.f32 1.5, %v404_v40  ;;  %v462_v52 = vadd.f32 %v1060_v56, %v442_v10  ;;  %v452_v25 = vmul.f32 %v1035_v31, %v432_v54  ;;  %v436_v58 = vmul.f32 %v420_v11, %v905_v33 }
 0x136   :  { %vm407_vm7 = vweird.f32 %v1117_v36  ;;  %v465_v60 = vadd.f32 %v1060_v56, %v445_v43  ;;  %v466_v61 = vadd.f32 %v1060_v56, %v446_v24  ;;  %vm328_vm8 = vweird.f32 %v1183_v17 }
 0x137   :  { %v659_v12 = vpop.eup %658  ;;  %v406_v51 = vmul.f32 %v657_v28, %v405_v57  ;;  %v477_v0 = vpack.c.bf16 %v462_v52, %v461_v37  ;;  %v472_v3 = vadd.f32 %v1060_v56, %v452_v25  ;;  %v326_v18 = vmul.f32 %v1183_v17, %v325_v15  ;;  %vm409_vm9 = vmor %vm407_vm7, %vm408_vm6 }
 0x138   :  { %v661_v4 = vpop.eup %660  ;;  %v332_v33 = vmul.f32 %v659_v12, %v1196_v13  ;;  %v479_v30 = vpack.c.bf16 %v466_v61, %v465_v60  ;;  %v471_v36 = vadd.f32 %v1060_v56, %v451_v26  ;;  %v286_v19 = vmul.f32 %v1172_v1, %v285_v16  ;;  %vm329_vm12 = vmor %vm327_vm5, %vm328_vm8 }
 0x139   :  { %vm288_vm10 = vweird.f32 %v1172_v1  ;;  %v410_v6 = vsel %vm409_vm9, %v657_v28, %v406_v51  ;;  %v292_v7 = vmul.f32 %v661_v4, %v1205_v44  ;;  %604 = vmatmul.msk.bf16.vlgmr.msra.gmra.mxu0 %vm77_vm0, %v477_v0  ;;  %v456_v9 = vmul.f32 %v1035_v31, %v436_v58 }
 0x13a   :  { %v435_v35 = vmul.f32 %v410_v6, %v908_v34  ;;  %v333_v62 = vmul.f32 %v659_v12, %v332_v33  ;;  %606 = vmatmul.msk.bf16.vlgmr.msra.gmra.mxu1 %vm77_vm0, %v479_v30  ;;  %v482_v8 = vpack.c.bf16 %v472_v3, %v471_v36  ;;  %vm287_vm11 = vweird.f32 %v1100_v27 }
 0x13b   :  { %v293_v63 = vmul.f32 %v661_v4, %v292_v7  ;;  %vm289_vm13 = vmor %vm287_vm11, %vm288_vm10  ;;  %v330_v14 = vsel %vm329_vm12, %v1183_v17, %v326_v18  ;;  %vm338_vm14 = vweird.f32 %v659_v12  ;;  %v476_v29 = vadd.f32 %v1060_v56, %v456_v9 }
 0x13c   :  { %v334_v38 = vmul.f32 0.5, %v333_v62  ;;  %609 = vmatmul.msk.bf16.gmra.mxu2 %vm77_vm0, %v482_v8  ;;  %v455_v34 = vmul.f32 %v1035_v31, %v435_v35  ;;  %v290_v28 = vsel %vm289_vm13, %v1172_v1, %v286_v19  ;;  %v427_v23 = vmul.f32 %v330_v14, %v926_v48 }
 0x13d   :  { %v294_v39 = vmul.f32 0.5, %v293_v63  ;;  %vm298_vm15 = vweird.f32 %v661_v4  ;;  %v423_v17 = vmul.f32 %v290_v28, %v923_v47  ;;  %vm337_vm1 = vweird.f32 %v1196_v13 }
 0x13e   :  { %v335_v45 = vsub.f32 1.5, %v334_v38  ;;  %v475_v27 = vadd.f32 %v1060_v56, %v455_v34  ;;  %vm339_vm2 = vmor %vm337_vm1, %vm338_vm14  ;;  %vm297_vm3 = vweird.f32 %v1205_v44  ;;  %v447_v48 = vmul.f32 %v1035_v31, %v427_v23 }
 0x13f   :  { %v295_v20 = vsub.f32 1.5, %v294_v39  ;;  %vm299_vm4 = vmor %vm297_vm3, %vm298_vm15  ;;  %v443_v47 = vmul.f32 %v1035_v31, %v423_v17 }
 0x140   :  { %v336_v41 = vmul.f32 %v659_v12, %v335_v45  ;;  %v484_v21 = vpack.c.bf16 %v476_v29, %v475_v27  ;;  %v467_v59 = vadd.f32 %v1060_v56, %v447_v48 }
 0x141   :  { %v296_v42 = vmul.f32 %v661_v4, %v295_v20  ;;  %v463_v2 = vadd.f32 %v1060_v56, %v443_v47 }
 0x142   :  { %v340_v1 = vsel %vm339_vm2, %v659_v12, %v336_v41  ;;  %611 = vmatmul.msk.bf16.gmra.mxu3 %vm77_vm0, %v484_v21 }
 0x143   :  { %v428_v50 = vmul.f32 %v340_v1, %v942_v55  ;;  %v300_v54 = vsel %vm299_vm4, %v661_v4, %v296_v42 }
 0x144   :  { %v424_v5 = vmul.f32 %v300_v54, %v929_v49 }
 0x145   :  { %v448_v13 = vmul.f32 %v1035_v31, %v428_v50 }
 0x146   :  { %v444_v46 = vmul.f32 %v1035_v31, %v424_v5 }
 0x147   :  { %v468_v44 = vadd.f32 %v1060_v56, %v448_v13 }
 0x148   :  { %v464_v22 = vadd.f32 %v1060_v56, %v444_v46 }
 0x149   :  { %v480_v55 = vpack.c.bf16 %v468_v44, %v467_v59 }
 0x14a   :  { %v478_v53 = vpack.c.bf16 %v464_v22, %v463_v2 }
 0x14b   :  { %607 = vmatmul.msk.bf16.gmra.mxu1 %vm77_vm0, %v480_v55 }
 0x14c   :  { %605 = vmatmul.msk.bf16.gmra.mxu0 %vm77_vm0, %v478_v53 }
 0x1ae   :  { %v554_v49 = vpop.f32.mrf.mxu2 }
 0x1af   :  { %582 = vst [vmem:[%s1343_s4 + $0x40] sm:$0xff] %v554_v49 }
 0x1b1   :  { %v564_v31 = vpop.f32.mrf.mxu3 }
 0x1b2   :  { %586 = vst [vmem:[%s1343_s4 + $0x60] sm:$0xff] %v564_v31 }
 0x1b6   :  { %v534_v11 = vpop.f32.mrf.mxu0  ;;  %v556_v32 = vpop.f32.mrf.mxu2 }
 0x1b7   :  { %574 = vst [vmem:[%s1343_s4] sm:$0xff] %v534_v11  ;;  %v544_v56 = vpop.f32.mrf.mxu1 }
 0x1b8   :  { %583 = vst [vmem:[%s1343_s4 + $0x48] sm:$0xff] %v556_v32 }
 0x1b9   :  { %v566_v40 = vpop.f32.mrf.mxu3  ;;  %578 = vst [vmem:[%s1343_s4 + $0x20] sm:$0xff] %v544_v56 }
 0x1ba   :  { %587 = vst [vmem:[%s1343_s4 + $0x68] sm:$0xff] %v566_v40 }
 0x1be   :  { %v536_v10 = vpop.f32.mrf.mxu0 }
 0x1bf   :  { %575 = vst [vmem:[%s1343_s4 + $0x8] sm:$0xff] %v536_v10  ;;  %v559_v37 = vpop.f32.mrf.mxu2  ;;  %v546_v15 = vpop.f32.mrf.mxu1 }
 0x1c0   :  { %584 = vst [vmem:[%s1343_s4 + $0x50] sm:$0xff] %v559_v37 }
 0x1c1   :  { %579 = vst [vmem:[%s1343_s4 + $0x28] sm:$0xff] %v546_v15 }
 0x1c5   :  { %v569_v43 = vpop.f32.mrf.mxu3 }
 0x1c6   :  { %588 = vst [vmem:[%s1343_s4 + $0x70] sm:$0xff] %v569_v43 }
 0x1c7   :  { %v561_v24 = vpop.f32.mrf.mxu2 }
 0x1c8   :  { %585 = vst [vmem:[%s1343_s4 + $0x58] sm:$0xff] %v561_v24  ;;  %v549_v26 = vpop.f32.mrf.mxu1 }
 0x1c9   :  { %v539_v16 = vpop.f32.mrf.mxu0  ;;  %580 = vst [vmem:[%s1343_s4 + $0x30] sm:$0xff] %v549_v26 }
 0x1ca   :  { %576 = vst [vmem:[%s1343_s4 + $0x10] sm:$0xff] %v539_v16 }
 0x1cd   :  { %v571_v57 = vpop.f32.mrf.mxu3 }
 0x1ce   :  { %589 = vst [vmem:[%s1343_s4 + $0x78] sm:$0xff] %v571_v57 }
 0x1d0   :  { %v551_v52 = vpop.f32.mrf.mxu1 }
 0x1d1   :  { %v541_v25 = vpop.f32.mrf.mxu0  ;;  %581 = vst [vmem:[%s1343_s4 + $0x38] sm:$0xff] %v551_v52 }
 0x1d2   :  { %577 = vst [vmem:[%s1343_s4 + $0x18] sm:$0xff] %v541_v25 }
 0x1d3   :  { %594 = vsyncpa [#allocation3], 1 }
 0x1d4   :  { %595 = vsyncpa [#allocation5], 1 }

// kernel: vss_block_forward.8
= control target key start
LH: loop header
LB: loop body
LE: loop exit
PB: predicated region body
PF: predicated region fallthrough
CT: control target
= control target key end

     0   :  { %8 = vsyncpa [#allocation3], 0  ;;  %s1427_s0 = inlined_call_operand.vmem [shape: f32[2,10,10,64], index: 0, kind: input, shape index: {}]   ;;  %s1428_s1 = inlined_call_operand.hbm [shape: f32[3,3,1,64], index: 1, kind: input, shape index: {}]   ;;  %s1429_s2 = inlined_call_operand.hbm [shape: f32[1,64], index: 2, kind: input, shape index: {}]   ;;  %s1430_s3 = inlined_call_operand.vmem [shape: f32[2,8,8,64], index: 3, kind: output, shape index: {}]  }
   0x1   :  { %9 = vsyncpa [#allocation5], 0  ;;  %s1074_s12 = smov 0   ;;  %s1076_s13 = smov 0  }
   0x2   :  { %s1078_s14 = smov 0  }
   0x3 LB: > { %s797_s15 = sadd.s32 4294967295, %s1048_s14   ;;  %s27_s16 = sadd.s32 1, %s1044_s13  ;;  %s1048_s14 = sphi %s1078_s14, %s15_s14   ;;  %s1044_s13 = sphi %s1076_s13, %s1450_s13   ;;  %s1040_s12 = sphi %s1074_s12, %s1449_s12  }
   0x4   : > { %p29_p0 = scmp.ge.s32.totalorder %s27_s16, 2  ;;  %p799_p1 = scmp.ge.s32.totalorder %s1048_s14, 1 }
   0x5   : > { %p140_p2 = scmp.lt.s32.totalorder %s1048_s14, 3  ;;  %p1099_p4 = scmp.eq.s32.totalorder %s797_s15, 0 }
   0x6   : > { %s1452_s16 = smov (%p29_p0, %s27_s16), 0  ;;  %s152_s21 = sshll.u32 %s1428_s1, 4  ;;  %s153_s21 = int_to_ptr.hbm [resolvable:$true] %s152_s21 }
   0x7   : > { %p1095_p3 = pnand %p799_p1, %p140_p2  ;;  %s1050_s22 = smov [#allocation2]  }
   0x8   : > { %s154_s23 = sshll.u32 %s1050_s22, 4  ;;  %s168_s26 = sshll.u32 %s1429_s2, 4  ;;  %s155_s23 = int_to_ptr.vmem [resolvable:$true] %s154_s23  ;;  %s169_s26 = int_to_ptr.hbm [resolvable:$true] %s168_s26 }
   0x9   : > { %p877_p5 = pneg %p1095_p3  ;;  %s1051_s27 = smov 16  }
   0xa   : > { %s1052_s28 = smov 1   ;;  %s1053_s29 = smov [#allocation4]  }
   0xb   : > { %p878_p6 = pnand %p1099_p4, %p877_p5  ;;  %s170_s30 = sshll.u32 %s1053_s29, 4  ;;  %s171_s30 = int_to_ptr.vmem [resolvable:$true] %s170_s30 }
   0xc   : > { %194 = sbr.rel (%p1095_p3) target bundleno = 120 (0x78), region = 32 }
   0xd   : > { %880 = dma.hbm_to_vmem [thread:$0]  (!%p878_p6), %s153_s21, 144, %s155_s23, [#allocation3], %s1051_s27, %s1051_s27, %s1052_s28  }
   0xe   : > { %883 = dma.hbm_to_vmem [thread:$0]  (!%p878_p6), %s169_s26, 16, %s171_s30, [#allocation5]  }
  0x11   : > { %1031 = dma.done.wait (%p1099_p4), [#allocation3], 144  }
  0x12   : > { %1033 = vsyncadd (%p1099_p4), [#allocation3], 4294967152 }
  0x13   : > { %1035 = dma.done.wait (%p1099_p4), [#allocation5], 16  }
  0x14   : > { %1037 = vsyncadd (%p1099_p4), [#allocation5], 4294967280  ;;  %p230_p7 = scmp.lt.s32.totalorder %s1040_s12, 1  ;;  %v1134_v1 = vld [vmem:[#allocation2] ss:$0 sm:$0xff]  ;;  %vm680_vm3 = vcmask 523264  }
  0x15   : > { %v1137_v3 = vld [vmem:[#allocation2 + $0x1] ss:$0 sm:$0xff]  ;;  %v1141_v6 = vld [vmem:[#allocation2 + $0x2] ss:$0 sm:$0xff]  ;;  %v1145_v9 = vld [vmem:[#allocation2 + $0x3] ss:$0 sm:$0xff] }
  0x16   : > { %s1454_s12 = smov (!%p230_p7, %s1040_s12), 1  ;;  %v1149_v12 = vld [vmem:[#allocation2 + $0x4] ss:$0 sm:$0xff]  ;;  %v1154_v17 = vld [vmem:[#allocation2 + $0x5] ss:$0 sm:$0xff] }
  0x17   : > { %s868_s4 = smul.u32 160, %s1454_s12  ;;  %v1158_v20 = vld [vmem:[#allocation2 + $0x6] ss:$0 sm:$0xff]  ;;  %v1163_v25 = vld [vmem:[#allocation2 + $0x7] ss:$0 sm:$0xff]  ;;  %s867_s8 = sshll.u32 %s1454_s12, 6 }
  0x18   : > { %v1167_v29 = vld [vmem:[#allocation2 + $0x8] ss:$0 sm:$0xff]  ;;  %s1331_s11 = scalar_lea.vmem %s1430_s3, %s867_s8 }
  0x19   : > { %s1131_s7 = scalar_lea.vmem %s1427_s0, %s868_s4 }
  0x1a   : > { %v246_v0 = vld [vmem:[%s1131_s7] sm:$0xff]  ;;  %v809_v8 = vld [vmem:[%s1131_s7 + $0x10] sm:$0xff] }
  0x1b   : > { %v274_v2 = vld [vmem:[%s1131_s7 + $0x1] sm:$0xff]  ;;  %v258_v4 = vmul.f32 %v1134_v1, %v246_v0  ;;  %v817_v11 = vld [vmem:[%s1131_s7 + $0x11] sm:$0xff]  ;;  %v259_v13 = vmul.f32 %v1134_v1, %v809_v8  ;;  %v346_v15 = vmul.f32 %v1145_v9, %v809_v8 }
  0x1c   : > { %v303_v5 = vld [vmem:[%s1131_s7 + $0x2] sm:$0xff]  ;;  %v287_v7 = vmul.f32 %v1137_v3, %v274_v2  ;;  %v825_v16 = vld [vmem:[%s1131_s7 + $0x12] sm:$0xff]  ;;  %v288_v18 = vmul.f32 %v1137_v3, %v817_v11  ;;  %v375_v23 = vmul.f32 %v1149_v12, %v817_v11 }
  0x1d   : > { %v316_v10 = vmul.f32 %v1141_v6, %v303_v5  ;;  %v833_v19 = vld [vmem:[%s1131_s7 + $0x20] sm:$0xff]  ;;  %v317_v21 = vmul.f32 %v1141_v6, %v825_v16  ;;  %v404_v33 = vmul.f32 %v1154_v17, %v825_v16  ;;  %v834_v43 = vld [vmem:[%s1131_s7 + $0x30] sm:$0xff] }
  0x1e   : > { %v295_v14 = vadd.f32 %v287_v7, %v258_v4  ;;  %v841_v24 = vld [vmem:[%s1131_s7 + $0x21] sm:$0xff]  ;;  %v296_v26 = vadd.f32 %v288_v18, %v259_v13  ;;  %v347_v27 = vmul.f32 %v1145_v9, %v833_v19  ;;  %v260_v30 = vmul.f32 %v1134_v1, %v833_v19  ;;  %v842_v44 = vld [vmem:[%s1131_s7 + $0x31] sm:$0xff] }
  0x1f   : > { %v849_v28 = vld [vmem:[%s1131_s7 + $0x22] sm:$0xff]  ;;  %v289_v31 = vmul.f32 %v1137_v3, %v841_v24  ;;  %v376_v35 = vmul.f32 %v1149_v12, %v841_v24  ;;  %v434_v36 = vmul.f32 %v1158_v20, %v833_v19  ;;  %v463_v40 = vmul.f32 %v1163_v25, %v841_v24  ;;  %v850_v46 = vld [vmem:[%s1131_s7 + $0x32] sm:$0xff] }
  0x20   : > { %v324_v22 = vadd.f32 %v316_v10, %v295_v14  ;;  %v325_v34 = vadd.f32 %v317_v21, %v296_v26  ;;  %v318_v38 = vmul.f32 %v1141_v6, %v849_v28  ;;  %v405_v42 = vmul.f32 %v1154_v17, %v849_v28  ;;  %v835_v61 = vld [vmem:[%s1131_s7 + $0x40] sm:$0xff]  ;;  %v1195_v10 = vld [vmem:[#allocation4] ss:$0 sm:$0xff]  ;;  %v836_v24 = vld [vmem:[%s1131_s7 + $0x50] sm:$0xff] }
  0x21   : > { %v297_v37 = vadd.f32 %v289_v31, %v260_v30  ;;  %v492_v45 = vmul.f32 %v1167_v29, %v849_v28  ;;  %v348_v48 = vmul.f32 %v1145_v9, %v834_v43  ;;  %v377_v49 = vmul.f32 %v1149_v12, %v842_v44  ;;  %v843_v2 = vld [vmem:[%s1131_s7 + $0x41] sm:$0xff] }
  0x22   : > { %v354_v32 = vadd.f32 %v346_v15, %v324_v22  ;;  %v355_v41 = vadd.f32 %v347_v27, %v325_v34  ;;  %v435_v52 = vmul.f32 %v1158_v20, %v834_v43  ;;  %v464_v53 = vmul.f32 %v1163_v25, %v842_v44  ;;  %v851_v4 = vld [vmem:[%s1131_s7 + $0x42] sm:$0xff]  ;;  %v844_v34 = vld [vmem:[%s1131_s7 + $0x51] sm:$0xff] }
  0x23   : > { %v326_v47 = vadd.f32 %v318_v38, %v297_v37  ;;  %v406_v55 = vmul.f32 %v1154_v17, %v850_v46  ;;  %v261_v56 = vmul.f32 %v1134_v1, %v834_v43  ;;  %v290_v57 = vmul.f32 %v1137_v3, %v842_v44 }
  0x24   : > { %v383_v39 = vadd.f32 %v375_v23, %v354_v32  ;;  %v384_v51 = vadd.f32 %v376_v35, %v355_v41  ;;  %v493_v60 = vmul.f32 %v1167_v29, %v850_v46  ;;  %v319_v62 = vmul.f32 %v1141_v6, %v850_v46  ;;  %v852_v35 = vld [vmem:[%s1131_s7 + $0x52] sm:$0xff] }
  0x25   : > { %v356_v54 = vadd.f32 %v348_v48, %v326_v47  ;;  %v436_v0 = vmul.f32 %v1158_v20, %v835_v61  ;;  %v298_v5 = vadd.f32 %v290_v57, %v261_v56  ;;  %v349_v7 = vmul.f32 %v1145_v9, %v835_v61 }
  0x26   : > { %v412_v50 = vadd.f32 %v404_v33, %v383_v39  ;;  %v413_v59 = vadd.f32 %v405_v42, %v384_v51  ;;  %v465_v13 = vmul.f32 %v1163_v25, %v843_v2  ;;  %v494_v14 = vmul.f32 %v1167_v29, %v851_v4 }
  0x27   : > { %v385_v63 = vadd.f32 %v377_v49, %v356_v54  ;;  %v327_v16 = vadd.f32 %v319_v62, %v298_v5  ;;  %v378_v18 = vmul.f32 %v1149_v12, %v843_v2  ;;  %v262_v19 = vmul.f32 %v1134_v1, %v835_v61 }
  0x28   : > { %v442_v58 = vadd.f32 %v434_v36, %v412_v50  ;;  %v443_v11 = vadd.f32 %v435_v52, %v413_v59  ;;  %v407_v23 = vmul.f32 %v1154_v17, %v851_v4  ;;  %v291_v26 = vmul.f32 %v1137_v3, %v843_v2  ;;  %v837_v52 = vld [vmem:[%s1131_s7 + $0x60] sm:$0xff] }
  0x29   : > { %v414_v15 = vadd.f32 %v406_v55, %v385_v63  ;;  %v357_v28 = vadd.f32 %v349_v7, %v327_v16  ;;  %v437_v30 = vmul.f32 %v1158_v20, %v836_v24  ;;  %v320_v31 = vmul.f32 %v1141_v6, %v851_v4  ;;  %v845_v59 = vld [vmem:[%s1131_s7 + $0x61] sm:$0xff] }
  0x2a   : > { %v471_v8 = vadd.f32 %v463_v40, %v442_v58  ;;  %v472_v22 = vadd.f32 %v464_v53, %v443_v11  ;;  %v299_v36 = vadd.f32 %v291_v26, %v262_v19  ;;  %v350_v37 = vmul.f32 %v1145_v9, %v836_v24  ;;  %v853_v4 = vld [vmem:[%s1131_s7 + $0x62] sm:$0xff] }
  0x2b   : > { %v444_v27 = vadd.f32 %v436_v0, %v414_v15  ;;  %v386_v39 = vadd.f32 %v378_v18, %v357_v28  ;;  %v466_v40 = vmul.f32 %v1163_v25, %v844_v34  ;;  %v495_v41 = vmul.f32 %v1167_v29, %v852_v35 }
  0x2c   : > { %v500_v21 = vadd.f32 %v492_v45, %v471_v8  ;;  %v501_v33 = vadd.f32 %v493_v60, %v472_v22  ;;  %v328_v44 = vadd.f32 %v320_v31, %v299_v36  ;;  %v379_v45 = vmul.f32 %v1149_v12, %v844_v34  ;;  %v846_v31 = vld [vmem:[%s1131_s7 + $0x71] sm:$0xff] }
  0x2d   : > { %v473_v38 = vadd.f32 %v465_v13, %v444_v27  ;;  %v415_v47 = vadd.f32 %v407_v23, %v386_v39  ;;  %v408_v48 = vmul.f32 %v1154_v17, %v852_v35  ;;  %v263_v49 = vmul.f32 %v1134_v1, %v836_v24 }
  0x2e   : > { %v1207_v32 = vadd.f32 %v1195_v10, %v500_v21  ;;  %v1216_v43 = vadd.f32 %v1195_v10, %v501_v33  ;;  %v358_v51 = vadd.f32 %v350_v37, %v328_v44  ;;  %v292_v53 = vmul.f32 %v1137_v3, %v844_v34 }
  0x2f   : > { %v502_v46 = vadd.f32 %v494_v14, %v473_v38  ;;  %v445_v55 = vadd.f32 %v437_v30, %v415_v47  ;;  %v438_v56 = vmul.f32 %v1158_v20, %v837_v52  ;;  %v321_v57 = vmul.f32 %v1141_v6, %v852_v35  ;;  %v838_v30 = vld [vmem:[%s1131_s7 + $0x70] sm:$0xff] }
  0x30   : > { %v857_v42 = vmul.f32 -1.442695, %v1207_v32  ;;  %v858_v50 = vmul.f32 -1.442695, %v1216_v43  ;;  %v387_v58 = vadd.f32 %v379_v45, %v358_v51  ;;  %v300_v60 = vadd.f32 %v292_v53, %v263_v49  ;;  %v839_v53 = vld [vmem:[%s1131_s7 + $0x80] sm:$0xff] }
  0x31   : > { %v1225_v54 = vadd.f32 %v1195_v10, %v502_v46  ;;  %v351_v61 = vmul.f32 %v1145_v9, %v837_v52  ;;  %v474_v63 = vadd.f32 %v466_v40, %v445_v55  ;;  %v467_v2 = vmul.f32 %v1163_v25, %v845_v59  ;;  %v1255_v40 = vld [vmem:[%s1131_s7 + $0x72] sm:$0xff] }
  0x32   : > { %926 = vpow2.f32 %v857_v42  ;;  %v416_v0 = vadd.f32 %v408_v48, %v387_v58  ;;  %v329_v5 = vadd.f32 %v321_v57, %v300_v60  ;;  %v380_v7 = vmul.f32 %v1149_v12, %v845_v59  ;;  %v1276_v58 = vld [vmem:[%s1131_s7 + $0x81] sm:$0xff] }
  0x33   : > { %928 = vpow2.f32 %v858_v50  ;;  %v859_v62 = vmul.f32 -1.442695, %v1225_v54  ;;  %v503_v8 = vadd.f32 %v495_v41, %v474_v63  ;;  %v264_v11 = vmul.f32 %v1134_v1, %v837_v52 }
  0x34   : > { %v293_v13 = vmul.f32 %v1137_v3, %v845_v59  ;;  %v446_v15 = vadd.f32 %v438_v56, %v416_v0  ;;  %v496_v16 = vmul.f32 %v1167_v29, %v853_v4  ;;  %v359_v18 = vadd.f32 %v351_v61, %v329_v5 }
  0x35   : > { %930 = vpow2.f32 %v859_v62  ;;  %v409_v19 = vmul.f32 %v1154_v17, %v853_v4  ;;  %v1242_v22 = vadd.f32 %v1195_v10, %v503_v8  ;;  %v322_v24 = vmul.f32 %v1141_v6, %v853_v4  ;;  %v1289_v4 = vld [vmem:[%s1131_s7 + $0x82] sm:$0xff] }
  0x36   : > { %v301_v23 = vadd.f32 %v293_v13, %v264_v11  ;;  %v475_v27 = vadd.f32 %v467_v2, %v446_v15  ;;  %v388_v28 = vadd.f32 %v380_v7, %v359_v18  ;;  %v439_v33 = vmul.f32 %v1158_v20, %v838_v30 }
  0x37   : > { %v468_v34 = vmul.f32 %v1163_v25, %v846_v31  ;;  %v352_v35 = vmul.f32 %v1145_v9, %v838_v30  ;;  %v860_v37 = vmul.f32 -1.442695, %v1242_v22  ;;  %v497_v45 = vmul.f32 %v1167_v29, %v1255_v40 }
  0x38   : > { %v927_v14 = vpop.eup %926  ;;  %v504_v38 = vadd.f32 %v496_v16, %v475_v27  ;;  %v417_v39 = vadd.f32 %v409_v19, %v388_v28  ;;  %v330_v46 = vadd.f32 %v322_v24, %v301_v23  ;;  %v381_v49 = vmul.f32 %v1149_v12, %v846_v31 }
  0x39   : > { %v1239_v21 = vadd.f32 1.0, %v927_v14  ;;  %v929_v26 = vpop.eup %928  ;;  %v410_v56 = vmul.f32 %v1154_v17, %v1255_v40  ;;  %v440_v57 = vmul.f32 %v1158_v20, %v839_v53  ;;  %v469_v62 = vmul.f32 %v1163_v25, %v1276_v58 }
  0x3a   : > { %v1251_v36 = vadd.f32 1.0, %v929_v26  ;;  %v1268_v51 = vadd.f32 %v1195_v10, %v504_v38  ;;  %v447_v52 = vadd.f32 %v439_v33, %v417_v39  ;;  %v360_v55 = vadd.f32 %v352_v35, %v330_v46 }
  0x3b   : > { %932 = vrcp.f32 %v1239_v21  ;;  %v931_v41 = vpop.eup %930  ;;  %v561_v42 = vand.u32 2147483647, %v1239_v21  ;;  %v563_v44 = vand.u32 2147483648, %v1239_v21  ;;  %vm557_vm0 = vweird.f32 %v1239_v21 }
  0x3c   : > { %934 = vrcp.f32 %v1251_v36  ;;  %v576_v47 = vand.u32 2147483647, %v1251_v36  ;;  %v578_v48 = vand.u32 2147483648, %v1251_v36  ;;  %v1265_v50 = vadd.f32 1.0, %v931_v41 }
  0x3d   : > { %936 = vpow2.f32 %v860_v37  ;;  %vm1278_vm1 = vcmp.eq.f32.partialorder %v561_v42, 8.507059e+37  ;;  %v564_v61 = vor.u32 1.1754944e-38, %v563_v44  ;;  %vm572_vm2 = vweird.f32 %v1251_v36 }
  0x3e   : > { %938 = vrcp.f32 %v1265_v50  ;;  %v861_v0 = vmul.f32 -1.442695, %v1268_v51  ;;  %v476_v2 = vadd.f32 %v468_v34, %v447_v52  ;;  %vm1291_vm4 = vcmp.eq.f32.partialorder %v576_v47, 8.507059e+37 }
  0x3f   : > { %v579_v7 = vor.u32 1.1754944e-38, %v578_v48  ;;  %v389_v8 = vadd.f32 %v381_v49, %v360_v55  ;;  %v498_v11 = vmul.f32 %v1167_v29, %v1289_v4  ;;  %v265_v23 = vmul.f32 %v1134_v1, %v838_v30 }
  0x40   : > { %940 = vpow2.f32 %v861_v0  ;;  %v505_v15 = vadd.f32 %v497_v45, %v476_v2  ;;  %v294_v24 = vmul.f32 %v1137_v3, %v846_v31  ;;  %vm587_vm6 = vweird.f32 %v1265_v50  ;;  %v840_v2 = vld [vmem:[%s1131_s7 + $0x90] sm:$0xff] }
  0x41   : > { %v933_v59 = vpop.eup %932  ;;  %v418_v19 = vadd.f32 %v410_v56, %v389_v8  ;;  %v591_v1 = vand.u32 2147483647, %v1265_v50  ;;  %v593_v37 = vand.u32 2147483648, %v1265_v50  ;;  %v323_v39 = vmul.f32 %v1141_v6, %v1255_v40 }
  0x42   : > { %v553_v63 = vmul.f32 %v933_v59, %v1239_v21  ;;  %v935_v13 = vpop.eup %934  ;;  %vm558_vm5 = vweird.f32 %v933_v59  ;;  %v1304_v28 = vadd.f32 %v1195_v10, %v505_v15  ;;  %v302_v21 = vadd.f32 %v294_v24, %v265_v23  ;;  %v856_v23 = vld [vmem:[%s1131_s7 + $0x92] sm:$0xff] }
  0x43   : > { %v937_v16 = vpop.eup %936  ;;  %v568_v18 = vmul.f32 %v935_v13, %v1251_v36  ;;  %vm1308_vm7 = vmor %vm557_vm0, %vm558_vm5  ;;  %vm573_vm8 = vweird.f32 %v935_v13  ;;  %v448_v3 = vadd.f32 %v440_v57, %v418_v19  ;;  %vm1335_vm11 = vcmp.eq.f32.partialorder %v591_v1, 8.507059e+37 }
  0x44   : > { %v554_v14 = vsub.f32 1.0, %v553_v63  ;;  %v1301_v27 = vadd.f32 1.0, %v937_v16  ;;  %v939_v33 = vpop.eup %938  ;;  %vm1323_vm10 = vmor %vm572_vm2, %vm573_vm8  ;;  %v862_v46 = vmul.f32 -1.442695, %v1304_v28  ;;  %v353_v48 = vmul.f32 %v1145_v9, %v839_v53 }
  0x45   : > { %v569_v35 = vsub.f32 1.0, %v568_v18  ;;  %v583_v31 = vmul.f32 %v939_v33, %v1265_v50  ;;  %vm588_vm9 = vweird.f32 %v939_v33  ;;  %v477_v47 = vadd.f32 %v469_v62, %v448_v3 }
  0x46   : > { %v555_v26 = vmul.f32 %v933_v59, %v554_v14  ;;  %942 = vrcp.f32 %v1301_v27  ;;  %v941_v41 = vpop.eup %940  ;;  %vm1348_vm12 = vmor %vm587_vm6, %vm588_vm9  ;;  %v331_v9 = vadd.f32 %v323_v39, %v302_v21  ;;  %v382_v50 = vmul.f32 %v1149_v12, %v1276_v58 }
  0x47   : > { %v570_v38 = vmul.f32 %v935_v13, %v569_v35  ;;  %v584_v45 = vsub.f32 1.0, %v583_v31  ;;  %v1341_v55 = vadd.f32 1.0, %v941_v41  ;;  %944 = vpow2.f32 %v862_v46 }
  0x48   : > { %v556_v30 = vadd.f32 %v933_v59, %v555_v26  ;;  %v506_v60 = vadd.f32 %v498_v11, %v477_v47  ;;  %vm602_vm13 = vweird.f32 %v1301_v27  ;;  %v608_v0 = vand.u32 2147483648, %v1301_v27 }
  0x49   : > { %v571_v40 = vadd.f32 %v935_v13, %v570_v38  ;;  %v585_v52 = vmul.f32 %v939_v33, %v584_v45  ;;  %946 = vrcp.f32 %v1341_v55  ;;  %v361_v8 = vadd.f32 %v353_v48, %v331_v9 }
  0x4a   : > { %v560_v42 = vsel %vm1308_vm7, %v933_v59, %v556_v30  ;;  %v594_v59 = vor.u32 1.1754944e-38, %v593_v37  ;;  %v411_v12 = vmul.f32 %v1154_v17, %v1289_v4  ;;  %v606_v11 = vand.u32 2147483647, %v1301_v27 }
  0x4b   : > { %v565_v6 = vsel %vm1278_vm1, %v564_v61, %v560_v42  ;;  %v575_v56 = vsel %vm1323_vm10, %v935_v13, %v571_v40  ;;  %v586_v61 = vadd.f32 %v939_v33, %v585_v52  ;;  %v848_v13 = vld [vmem:[%s1131_s7 + $0x91] sm:$0xff]  ;;  %v390_v18 = vadd.f32 %v382_v50, %v361_v8 }
  0x4c   : > { %v672_v49 = vmul.f32 %v565_v6, %v1207_v32  ;;  %v943_v32 = vpop.eup %942  ;;  %v580_v53 = vsel %vm1291_vm4, %v579_v7, %v575_v56  ;;  %v1367_v7 = vadd.f32 %v1195_v10, %v506_v60  ;;  %v441_v19 = vmul.f32 %v1158_v20, %v840_v2 }
  0x4d   : > { %v673_v62 = vmul.f32 %v580_v53, %v1216_v43  ;;  %v598_v63 = vmul.f32 %v943_v32, %v1301_v27  ;;  %v590_v5 = vsel %vm1348_vm12, %v939_v33, %v586_v61  ;;  %vm603_vm14 = vweird.f32 %v943_v32  ;;  %v945_v14 = vpop.eup %944 }
  0x4e   : > { %681 = vst.msk [vmem:[%s1331_s11] sm:$0xff] %vm680_vm3, %v672_v49  ;;  %v595_v43 = vsel %vm1335_vm11, %v594_v59, %v590_v5  ;;  %v863_v16 = vmul.f32 -1.442695, %v1367_v7  ;;  %v549_v4 = vadd.f32 1.0, %v945_v14  ;;  %vm1385_vm15 = vmor %vm602_vm13, %vm603_vm14  ;;  %v609_v33 = vor.u32 1.1754944e-38, %v608_v0 }
  0x4f   : > { %682 = vst.msk [vmem:[%s1331_s11 + $0x8] sm:$0xff] %vm680_vm3, %v673_v62  ;;  %v599_v58 = vsub.f32 1.0, %v598_v63  ;;  %v674_v15 = vmul.f32 %v595_v43, %v1225_v54  ;;  %v947_v24 = vpop.eup %946  ;;  %v419_v54 = vadd.f32 %v411_v12, %v390_v18  ;;  %v470_v34 = vmul.f32 %v1163_v25, %v848_v13 }
  0x50   : > { %948 = vpow2.f32 %v863_v16  ;;  %vm607_vm0 = vcmp.eq.f32.partialorder %v606_v11, 8.507059e+37  ;;  %v613_v20 = vmul.f32 %v947_v24, %v1341_v55  ;;  %vm617_vm1 = vweird.f32 %v1341_v55 }
  0x51   : > { %v600_v17 = vmul.f32 %v943_v32, %v599_v58  ;;  %683 = vst.msk [vmem:[%s1331_s11 + $0x10] sm:$0xff] %vm680_vm3, %v674_v15  ;;  %950 = vrcp.f32 %v549_v4  ;;  %v623_v1 = vand.u32 2147483648, %v1341_v55  ;;  %v449_v27 = vadd.f32 %v441_v19, %v419_v54 }
  0x52   : > { %v499_v3 = vmul.f32 %v1167_v29, %v856_v23  ;;  %v614_v31 = vsub.f32 1.0, %v613_v20  ;;  %vm618_vm2 = vweird.f32 %v947_v24  ;;  %v621_v25 = vand.u32 2147483647, %v1341_v55 }
  0x53   : > { %v601_v35 = vadd.f32 %v943_v32, %v600_v17  ;;  %v478_v38 = vadd.f32 %v470_v34, %v449_v27  ;;  %vm1398_vm4 = vmor %vm617_vm1, %vm618_vm2  ;;  %v624_v44 = vor.u32 1.1754944e-38, %v623_v1  ;;  %vm632_vm6 = vweird.f32 %v549_v4 }
  0x54   : > { %v615_v39 = vmul.f32 %v947_v24, %v614_v31  ;;  %vm622_vm5 = vcmp.eq.f32.partialorder %v621_v25, 8.507059e+37  ;;  %v636_v36 = vand.u32 2147483647, %v549_v4  ;;  %v638_v48 = vand.u32 2147483648, %v549_v4 }
  0x55   : > { %v605_v30 = vsel %vm1385_vm15, %v943_v32, %v601_v35  ;;  %v507_v45 = vadd.f32 %v499_v3, %v478_v38 }
  0x56   : > { %v610_v37 = vsel %vm607_vm0, %v609_v33, %v605_v30  ;;  %v949_v41 = vpop.eup %948  ;;  %v616_v46 = vadd.f32 %v947_v24, %v615_v39  ;;  %v639_v59 = vor.u32 1.1754944e-38, %v638_v48  ;;  %vm637_vm9 = vcmp.eq.f32.partialorder %v636_v36, 8.507059e+37 }
  0x57   : > { %v675_v21 = vmul.f32 %v610_v37, %v1242_v22  ;;  %v951_v29 = vpop.eup %950  ;;  %v550_v47 = vadd.f32 1.0, %v949_v41  ;;  %v519_v40 = vadd.f32 %v1195_v10, %v507_v45 }
  0x58   : > { %v628_v6 = vmul.f32 %v951_v29, %v549_v4  ;;  %v620_v22 = vsel %vm1398_vm4, %v947_v24, %v616_v46  ;;  %vm633_vm7 = vweird.f32 %v951_v29 }
  0x59   : > { %684 = vst.msk [vmem:[%s1331_s11 + $0x18] sm:$0xff] %vm680_vm3, %v675_v21  ;;  %952 = vrcp.f32 %v550_v47  ;;  %v625_v49 = vsel %vm622_vm5, %v624_v44, %v620_v22  ;;  %v864_v55 = vmul.f32 -1.442695, %v519_v40  ;;  %vm634_vm8 = vmor %vm632_vm6, %vm633_vm7  ;;  %vm647_vm10 = vweird.f32 %v550_v47 }
  0x5a   : > { %v629_v52 = vsub.f32 1.0, %v628_v6  ;;  %v676_v56 = vmul.f32 %v625_v49, %v1268_v51  ;;  %v653_v61 = vand.u32 2147483648, %v550_v47  ;;  %v651_v63 = vand.u32 2147483647, %v550_v47 }
  0x5b   : > { %954 = vpow2.f32 %v864_v55 }
  0x5c   : > { %v630_v57 = vmul.f32 %v951_v29, %v629_v52  ;;  %685 = vst.msk [vmem:[%s1331_s11 + $0x20] sm:$0xff] %vm680_vm3, %v676_v56  ;;  %v654_v5 = vor.u32 1.1754944e-38, %v653_v61  ;;  %vm652_vm13 = vcmp.eq.f32.partialorder %v651_v63, 8.507059e+37 }
  0x5e   : > { %v631_v10 = vadd.f32 %v951_v29, %v630_v57 }
  0x5f   : > { %v953_v60 = vpop.eup %952 }
  0x60   : > { %v635_v9 = vsel %vm634_vm8, %v951_v29, %v631_v10  ;;  %v643_v32 = vmul.f32 %v953_v60, %v550_v47  ;;  %vm648_vm11 = vweird.f32 %v953_v60 }
  0x61   : > { %v640_v53 = vsel %vm637_vm9, %v639_v59, %v635_v9  ;;  %v955_v50 = vpop.eup %954  ;;  %vm649_vm12 = vmor %vm647_vm10, %vm648_vm11 }
  0x62   : > { %v677_v62 = vmul.f32 %v640_v53, %v1304_v28  ;;  %v644_v51 = vsub.f32 1.0, %v643_v32  ;;  %v551_v0 = vadd.f32 1.0, %v955_v50 }
  0x64   : > { %686 = vst.msk [vmem:[%s1331_s11 + $0x28] sm:$0xff] %vm680_vm3, %v677_v62  ;;  %v645_v2 = vmul.f32 %v953_v60, %v644_v51  ;;  %956 = vrcp.f32 %v551_v0  ;;  %v668_v13 = vand.u32 2147483648, %v551_v0  ;;  %vm662_vm14 = vweird.f32 %v551_v0 }
  0x65   : > { %v666_v15 = vand.u32 2147483647, %v551_v0 }
  0x66   : > { %v646_v8 = vadd.f32 %v953_v60, %v645_v2  ;;  %v669_v18 = vor.u32 1.1754944e-38, %v668_v13 }
  0x67   : > { %vm667_vm1 = vcmp.eq.f32.partialorder %v666_v15, 8.507059e+37 }
  0x68   : > { %v650_v12 = vsel %vm649_vm12, %v953_v60, %v646_v8 }
  0x69   : > { %v655_v43 = vsel %vm652_vm13, %v654_v5, %v650_v12 }
  0x6a   : > { %v678_v58 = vmul.f32 %v655_v43, %v1367_v7  ;;  %v957_v11 = vpop.eup %956 }
  0x6b   : > { %v658_v28 = vmul.f32 %v957_v11, %v551_v0  ;;  %vm663_vm15 = vweird.f32 %v957_v11 }
  0x6c   : > { %687 = vst.msk [vmem:[%s1331_s11 + $0x30] sm:$0xff] %vm680_vm3, %v678_v58  ;;  %vm664_vm0 = vmor %vm662_vm14, %vm663_vm15 }
  0x6d   : > { %v659_v14 = vsub.f32 1.0, %v658_v28 }
  0x6f   : > { %v660_v16 = vmul.f32 %v957_v11, %v659_v14 }
  0x71   : > { %v661_v19 = vadd.f32 %v957_v11, %v660_v16 }
  0x73   : > { %v665_v17 = vsel %vm664_vm0, %v957_v11, %v661_v19 }
  0x74   : > { %v670_v4 = vsel %vm667_vm1, %v669_v18, %v665_v17 }
  0x75   : > { %v679_v23 = vmul.f32 %v670_v4, %v519_v40 }
  0x77   : > { %688 = vst.msk [vmem:[%s1331_s11 + $0x38] sm:$0xff] %vm680_vm3, %v679_v23 }
  0x78 PF: > { %s15_s14 = sadd.s32 1, %s1048_s14   ;;  %s1449_s12 = smov %s1044_s13 }
  0x79   : > { %p12_p8 = scmp.ge.s32.totalorder %s15_s14, 4   ;;  %s1450_s13 = smov %s1452_s16 }
  0x7b   :  { %14 = sbr.rel (!%p12_p8) target bundleno = 3 (0x3), region = 83 }
  0x80   :  { %716 = vsyncpa [#allocation3], 1 }
  0x81   :  { %718 = vsyncpa [#allocation3 + $0x1], 1 }
  0x82   :  { %719 = vsyncpa [#allocation5], 1 }

// kernel: vss_block_forward.9
= control target key start
LH: loop header
LB: loop body
LE: loop exit
PB: predicated region body
PF: predicated region fallthrough
CT: control target
= control target key end

     0   :  { %s689_s9 = smov 0   ;;  %s691_s10 = smov 0   ;;  %s761_s0 = inlined_call_operand.vmem [shape: bf16[2,4,64,128], index: 0, kind: input, shape index: {}]   ;;  %s762_s1 = inlined_call_operand.vmem [shape: bf16[4,128,128], index: 1, kind: input, shape index: {}]   ;;  %s763_s2 = inlined_call_operand.vmem [shape: f32[2,4,64,128], index: 2, kind: output, shape index: {}]  }
   0x1   :  { %s693_s11 = smov 0   ;;  %s695_s12 = smov 0  }
   0x2   :  { %s697_s13 = smov 0  }
   0x3 LB: > { %s27_s14 = sadd.s32 1, %s664_s11  ;;  %s31_s15 = sadd.s32 1, %s668_s12  ;;  %s672_s13 = sphi %s697_s13, %s12_s13   ;;  %s668_s12 = sphi %s695_s12, %s767_s12   ;;  %s664_s11 = sphi %s693_s11, %s766_s11   ;;  %s660_s10 = sphi %s691_s10, %s765_s10   ;;  %s656_s9 = sphi %s689_s9, %s764_s9  }
   0x4   : > { %p29_p0 = scmp.ge.s32.totalorder %s27_s14, 4  ;;  %p498_p1 = scmp.ge.s32.totalorder %s672_s13, 1 }
   0x5   : > { %p158_p2 = scmp.lt.s32.totalorder %s672_s13, 9 }
   0x6   : > { %s769_s14 = smov (%p29_p0, %s27_s14), 0  ;;  %s771_s15 = smov (!%p29_p0, %s31_s15), %s668_s12 }
   0x7   : > { %p159_p3 = pnand %p498_p1, %p158_p2  ;;  %p33_p4 = scmp.ge.s32.totalorder %s771_s15, 2 }
   0x8   : > { %p204_p5 = scmp.lt.s32.totalorder (!%p159_p3), %s656_s9, 3  ;;  %p202_p6 = scmp.lt.s32.totalorder (!%p159_p3), %s660_s10, 1 }
   0x9   : > { %s773_s15 = smov (%p33_p4, %s771_s15), 0  ;;  %162 = sbr.rel (%p159_p3) target bundleno = 192 (0xc0), region = 28 }
   0xe   : > { %s775_s9 = smov (!%p204_p5, %s656_s9), 3  ;;  %s777_s10 = smov (!%p202_p6, %s660_s10), 1 }
   0xf   : > { %s557_s16 = sshll.u32 %s775_s9, 6  ;;  %s499_s20 = sshll.u32 %s775_s9, 3 }
  0x10   : > { %s727_s19 = scalar_lea.vmem %s762_s1, %s557_s16  ;;  %s500_s21 = sshll.u32 %s777_s10, 5 }
  0x11   : > { %v569_v0 = vld [vmem:[%s727_s19 + $0x38] sm:$0xff]  ;;  %v568_v1 = vld [vmem:[%s727_s19 + $0x30] sm:$0xff]  ;;  %v567_v2 = vld [vmem:[%s727_s19 + $0x28] sm:$0xff]  ;;  %s211_s22 = sadd.s32 %s500_s21, %s499_s20 }
  0x12   : > { %330 = vmatpush.bf16.msra.mxu0 %v569_v0  ;;  %570 = vmatpush.bf16.msra.mxu1 %v569_v0  ;;  %v566_v3 = vld [vmem:[%s727_s19 + $0x20] sm:$0xff]  ;;  %v565_v4 = vld [vmem:[%s727_s19 + $0x18] sm:$0xff]  ;;  %v564_v5 = vld [vmem:[%s727_s19 + $0x10] sm:$0xff]  ;;  %s501_s23 = sshll.u32 %s211_s22, 2  ;;  %s506_s27 = sshll.u32 %s211_s22, 3 }
  0x13   : > { %571 = vmatpush.bf16.msra.mxu2 %v569_v0  ;;  %572 = vmatpush.bf16.msra.mxu3 %v569_v0  ;;  %v563_v6 = vld [vmem:[%s727_s19 + $0x8] sm:$0xff]  ;;  %v562_v7 = vld [vmem:[%s727_s19] sm:$0xff]  ;;  %s213_s26 = scalar_lea.vmem %s761_s0, %s501_s23  ;;  %s232_s30 = scalar_lea.vmem %s763_s2, %s506_s27 }
  0x14   : > { %v558_v8 = vld [vmem:[%s213_s26] sm:$0xff]  ;;  %v559_v9 = vld [vmem:[%s213_s26 + $0x8] sm:$0xff]  ;;  %v560_v10 = vld [vmem:[%s213_s26 + $0x10] sm:$0xff] }
  0x15   : > { %v561_v11 = vld [vmem:[%s213_s26 + $0x18] sm:$0xff] }
  0x16   : > { %331 = vmatpush.bf16.msra.mxu0 %v568_v1  ;;  %573 = vmatpush.bf16.msra.mxu1 %v568_v1 }
  0x17   : > { %574 = vmatpush.bf16.msra.mxu2 %v568_v1  ;;  %575 = vmatpush.bf16.msra.mxu3 %v568_v1 }
  0x1a   : > { %332 = vmatpush.bf16.msra.mxu0 %v567_v2  ;;  %576 = vmatpush.bf16.msra.mxu1 %v567_v2 }
  0x1b   : > { %577 = vmatpush.bf16.msra.mxu2 %v567_v2  ;;  %578 = vmatpush.bf16.msra.mxu3 %v567_v2 }
  0x1e   : > { %333 = vmatpush.bf16.msra.mxu0 %v566_v3  ;;  %579 = vmatpush.bf16.msra.mxu1 %v566_v3 }
  0x1f   : > { %580 = vmatpush.bf16.msra.mxu2 %v566_v3  ;;  %581 = vmatpush.bf16.msra.mxu3 %v566_v3 }
  0x22   : > { %334 = vmatpush.bf16.msra.mxu0 %v565_v4  ;;  %582 = vmatpush.bf16.msra.mxu1 %v565_v4 }
  0x23   : > { %583 = vmatpush.bf16.msra.mxu2 %v565_v4  ;;  %584 = vmatpush.bf16.msra.mxu3 %v565_v4 }
  0x26   : > { %335 = vmatpush.bf16.msra.mxu0 %v564_v5  ;;  %585 = vmatpush.bf16.msra.mxu1 %v564_v5 }
  0x27   : > { %586 = vmatpush.bf16.msra.mxu2 %v564_v5  ;;  %587 = vmatpush.bf16.msra.mxu3 %v564_v5 }
  0x2a   : > { %336 = vmatpush.bf16.msra.mxu0 %v563_v6  ;;  %588 = vmatpush.bf16.msra.mxu1 %v563_v6 }
  0x2b   : > { %589 = vmatpush.bf16.msra.mxu2 %v563_v6  ;;  %590 = vmatpush.bf16.msra.mxu3 %v563_v6 }
  0x2e   : > { %337 = vmatpush.bf16.msra.mxu0 %v562_v7  ;;  %591 = vmatpush.bf16.msra.mxu1 %v562_v7 }
  0x2f   : > { %592 = vmatpush.bf16.msra.mxu2 %v562_v7  ;;  %593 = vmatpush.bf16.msra.mxu3 %v562_v7 }
  0x31   : > { %338 = vmatmul.bf16.vlgmr.msra.gmra.mxu0 %v558_v8  ;;  %343 = vmatmul.bf16.vlgmr.msra.gmra.mxu1 %v559_v9 }
  0x32   : > { %348 = vmatmul.bf16.vlgmr.msra.gmra.mxu2 %v560_v10  ;;  %353 = vmatmul.bf16.vlgmr.msra.gmra.mxu3 %v561_v11 }
  0xae   : > { %v339_v12 = vpop.f32.mrf.mxu0  ;;  %v344_v13 = vpop.f32.mrf.mxu1 }
  0xaf   : > { %359 = vst [vmem:[%s232_s30] sm:$0xff] %v339_v12 }
  0xb0   : > { %361 = vst [vmem:[%s232_s30 + $0x10] sm:$0xff] %v344_v13 }
  0xb5   : > { %v349_v14 = vpop.f32.mrf.mxu2  ;;  %v354_v15 = vpop.f32.mrf.mxu3 }
  0xb6   : > { %363 = vst [vmem:[%s232_s30 + $0x20] sm:$0xff] %v349_v14  ;;  %v341_v16 = vpop.f32.mrf.mxu0  ;;  %v346_v17 = vpop.f32.mrf.mxu1 }
  0xb7   : > { %365 = vst [vmem:[%s232_s30 + $0x30] sm:$0xff] %v354_v15 }
  0xb8   : > { %360 = vst [vmem:[%s232_s30 + $0x8] sm:$0xff] %v341_v16 }
  0xb9   : > { %362 = vst [vmem:[%s232_s30 + $0x18] sm:$0xff] %v346_v17 }
  0xbd   : > { %v351_v18 = vpop.f32.mrf.mxu2  ;;  %v356_v19 = vpop.f32.mrf.mxu3 }
  0xbe   : > { %364 = vst [vmem:[%s232_s30 + $0x28] sm:$0xff] %v351_v18 }
  0xbf   : > { %366 = vst [vmem:[%s232_s30 + $0x38] sm:$0xff] %v356_v19 }
  0xc0 PF: > { %s12_s13 = sadd.s32 1, %s672_s13   ;;  %s764_s9 = smov %s664_s11 }
  0xc1   : > { %p9_p7 = scmp.ge.s32.totalorder %s12_s13, 10   ;;  %s765_s10 = smov %s668_s12 }
  0xc2   : > { %s766_s11 = smov %s769_s14  ;;  %s767_s12 = smov %s773_s15 }
  0xc3   :  { %11 = sbr.rel (!%p9_p7) target bundleno = 3 (0x3), region = 61 }

// kernel: vss_block_forward.12
= control target key start
LH: loop header
LB: loop body
LE: loop exit
PB: predicated region body
PF: predicated region fallthrough
CT: control target
= control target key end

     0   :  { %s1028_s18 = smov 0   ;;  %s1030_s19 = smov 0   ;;  %s1507_s0 = inlined_call_operand.vmem [shape: f32[2,64,64], index: 0, kind: input, shape index: {}]   ;;  %s1508_s1 = inlined_call_operand.vmem [shape: f32[2,64,64], index: 1, kind: input, shape index: {}]   ;;  %s1509_s2 = inlined_call_operand.vmem [shape: f32[1,64], index: 2, kind: input, shape index: {}]   ;;  %s1510_s3 = inlined_call_operand.vmem [shape: f32[1,64], index: 3, kind: input, shape index: {}]   ;;  %s1511_s4 = inlined_call_operand.vmem [shape: f32[2,64,64], index: 4, kind: output, shape index: {0}]   ;;  %s1512_s5 = inlined_call_operand.vmem [shape: f32[2,1,64], index: 5, kind: output, shape index: {1}]  }
   0x1   :  { %s1032_s20 = smov 0  }
   0x2 LB: > { %s28_s21 = sadd.s32 1, %s990_s19  ;;  %p874_p0 = scmp.ge.s32.totalorder %s994_s20, 1  ;;  %s994_s20 = sphi %s1032_s20, %s16_s20   ;;  %s990_s19 = sphi %s1030_s19, %s1534_s19   ;;  %s986_s18 = sphi %s1028_s18, %s1533_s18  }
   0x3   : > { %p30_p1 = scmp.ge.s32.totalorder %s28_s21, 2  ;;  %p228_p2 = scmp.lt.s32.totalorder %s994_s20, 3 }
   0x5   : > { %s1536_s21 = smov (%p30_p1, %s28_s21), 0  ;;  %p229_p3 = pnand %p874_p0, %p228_p2 }
   0x6   : > { %p277_p4 = scmp.lt.s32.totalorder (!%p229_p3), %s986_s18, 1 }
   0x7   : > { %232 = sbr.rel (%p229_p3) target bundleno = 337 (0x151), region = 36 }
   0xc   : > { %s1538_s18 = smov (!%p277_p4, %s986_s18), 1  ;;  %vm313_vm0 = vcmask 516096   ;;  %vm323_vm1 = vcmask 523264   ;;  %v996_v0 = vmov 0.0   ;;  %v997_v17 = vmov 64.0  }
   0xd   : > { %s1046_s22 = sshll.u32 %s1538_s18, 6  ;;  %s1051_s25 = scalar_lea.vmem %s1512_s5, %s1538_s18  ;;  %922 = vrcp.f32 %v997_v17 }
   0xe   : > { %s284_s28 = scalar_lea.vmem %s1507_s0, %s1046_s22  ;;  %314 = vst.msk [vmem:[%s1051_s25] sm:$0x1] %vm313_vm0, %v996_v0  ;;  %s1121_s6 = scalar_lea.vmem %s1508_s1, %s1046_s22 }
   0xf   : > { %v319_v1 = vld [vmem:[%s284_s28 + $0x20] sm:$0xff]  ;;  %v317_v2 = vld [vmem:[%s284_s28 + $0x10] sm:$0xff]  ;;  %v320_v7 = vld [vmem:[%s284_s28 + $0x28] sm:$0xff]  ;;  %s1363_s13 = scalar_lea.vmem %s1511_s4, %s1046_s22 }
  0x10   : > { %v315_v3 = vld [vmem:[%s284_s28] sm:$0xff]  ;;  %v336_v4 = vsel %vm323_vm1, %v319_v1, 0.0  ;;  %v330_v5 = vsel %vm323_vm1, %v317_v2, 0.0  ;;  %v318_v8 = vld [vmem:[%s284_s28 + $0x18] sm:$0xff]  ;;  %v316_v9 = vld [vmem:[%s284_s28 + $0x8] sm:$0xff]  ;;  %v339_v10 = vsel %vm323_vm1, %v320_v7, 0.0 }
  0x11   : > { %v324_v6 = vsel %vm323_vm1, %v315_v3, 0.0  ;;  %337 = vadd.xlane.f32.xlu2 %v336_v4  ;;  %331 = vadd.xlane.f32.xlu1 %v330_v5  ;;  %v333_v11 = vsel %vm323_vm1, %v318_v8, 0.0  ;;  %v327_v12 = vsel %vm323_vm1, %v316_v9, 0.0  ;;  %v322_v13 = vld [vmem:[%s284_s28 + $0x38] sm:$0xff]  ;;  %v321_v14 = vld [vmem:[%s284_s28 + $0x30] sm:$0xff] }
  0x12   : > { %325 = vadd.xlane.f32.xlu0 %v324_v6  ;;  %v345_v15 = vsel %vm323_vm1, %v322_v13, 0.0  ;;  %v342_v16 = vsel %vm323_vm1, %v321_v14, 0.0  ;;  %v1124_v0 = vld [vmem:[%s1121_s6 + $0x10] sm:$0xff]  ;;  %v1132_v6 = vld [vmem:[%s1121_s6 + $0x28] sm:$0xff] }
  0x13   : > { %v923_v18 = vpop.eup %922  ;;  %v1144_v17 = vld [vmem:[%s1121_s6 + $0x30] sm:$0xff] }
  0x14   : > { %v349_v19 = vmul.f32 64.0, %v923_v18  ;;  %vm353_vm2 = vweird.f32 %v923_v18 }
  0x16   : > { %v350_v20 = vsub.f32 1.0, %v349_v19 }
  0x18   : > { %v351_v21 = vmul.f32 %v923_v18, %v350_v20 }
  0x19   : > { %340 = vadd.xlane.f32.xlu2 %v339_v10  ;;  %334 = vadd.xlane.f32.xlu1 %v333_v11  ;;  %v886_v10 = vmul.f32 -1.442695, %v1132_v6 }
  0x1a   : > { %328 = vadd.xlane.f32.xlu0 %v327_v12  ;;  %v352_v22 = vadd.f32 %v923_v18, %v351_v21 }
  0x1c   : > { %v1067_v23 = vsel %vm353_vm2, %v923_v18, %v352_v22 }
  0x21   : > { %346 = vadd.xlane.f32.xlu1 %v345_v15 }
  0x22   : > { %343 = vadd.xlane.f32.xlu0 %v342_v16 }
  0x84   : > { %v338_v24 = vpop.xlane.xlu2 %337  ;;  %v332_v25 = vpop.xlane.xlu1 %331 }
  0x85   : > { %v357_v26 = vmul.f32 %v1067_v23, %v332_v25  ;;  %v326_v27 = vpop.xlane.xlu0 %325  ;;  %v359_v43 = vmul.f32 %v1067_v23, %v338_v24 }
  0x86   : > { %v355_v28 = vmul.f32 %v1067_v23, %v326_v27 }
  0x87   : > { %v1071_v29 = vsub.f32 %v317_v2, %v357_v26  ;;  %v1099_v50 = vsub.f32 %v319_v1, %v359_v43  ;;  %v883_v1 = vmul.f32 -1.442695, %v1124_v0  ;;  %v887_v26 = vmul.f32 -1.442695, %v1144_v17 }
  0x88   : > { %v1073_v30 = vsub.f32 %v315_v3, %v355_v28  ;;  %v1128_v3 = vld [vmem:[%s1121_s6] sm:$0xff] }
  0x89   : > { %v373_v31 = vmul.f32 %v1071_v29, %v1071_v29  ;;  %v375_v57 = vmul.f32 %v1099_v50, %v1099_v50  ;;  %924 = vpow2.f32 %v883_v1  ;;  %v881_v4 = vmul.f32 -1.442695, %v1128_v3 }
  0x8a   : > { %v371_v32 = vmul.f32 %v1073_v30, %v1073_v30 }
  0x8b   : > { %v385_v33 = vsel %vm323_vm1, %v373_v31, 0.0  ;;  %v391_v60 = vsel %vm323_vm1, %v375_v57, 0.0  ;;  %926 = vpow2.f32 %v881_v4 }
  0x8c   : > { %v341_v34 = vpop.xlane.xlu2 %340  ;;  %386 = vadd.xlane.f32.xlu1 %v385_v33  ;;  %v335_v35 = vpop.xlane.xlu1 %334  ;;  %v379_v36 = vsel %vm323_vm1, %v371_v32, 0.0 }
  0x8d   : > { %v360_v37 = vmul.f32 %v1067_v23, %v341_v34  ;;  %v358_v38 = vmul.f32 %v1067_v23, %v335_v35  ;;  %380 = vadd.xlane.f32.xlu2 %v379_v36  ;;  %v329_v39 = vpop.xlane.xlu0 %328 }
  0x8e   : > { %v356_v40 = vmul.f32 %v1067_v23, %v329_v39 }
  0x8f   : > { %v1084_v41 = vsub.f32 %v320_v7, %v360_v37  ;;  %v1086_v42 = vsub.f32 %v318_v8, %v358_v38  ;;  %v925_v2 = vpop.eup %924  ;;  %v1135_v7 = vld [vmem:[%s1121_s6 + $0x18] sm:$0xff]  ;;  %v1138_v8 = vld [vmem:[%s1121_s6 + $0x8] sm:$0xff]  ;;  %v1165_v38 = vld [vmem:[%s1121_s6 + $0x20] sm:$0xff] }
  0x90   : > { %v1089_v44 = vsub.f32 %v316_v9, %v356_v40  ;;  %v565_v5 = vadd.f32 1.0, %v925_v2  ;;  %v884_v11 = vmul.f32 -1.442695, %v1135_v7 }
  0x91   : > { %v376_v45 = vmul.f32 %v1084_v41, %v1084_v41  ;;  %v374_v46 = vmul.f32 %v1086_v42, %v1086_v42  ;;  %v927_v9 = vpop.eup %926 }
  0x92   : > { %v372_v47 = vmul.f32 %v1089_v44, %v1089_v44  ;;  %928 = vrcp.f32 %v565_v5  ;;  %v563_v12 = vadd.f32 1.0, %v927_v9  ;;  %vm606_vm3 = vweird.f32 %v565_v5 }
  0x93   : > { %v394_v48 = vsel %vm323_vm1, %v376_v45, 0.0  ;;  %v388_v49 = vsel %vm323_vm1, %v374_v46, 0.0  ;;  %930 = vpow2.f32 %v886_v10  ;;  %v610_v33 = vand.u32 2147483647, %v565_v5 }
  0x94   : > { %395 = vadd.xlane.f32.xlu1 %v394_v48  ;;  %v382_v51 = vsel %vm323_vm1, %v372_v47, 0.0  ;;  %v347_v52 = vpop.xlane.xlu1 %346  ;;  %932 = vrcp.f32 %v563_v12  ;;  %v612_v34 = vand.u32 2147483648, %v565_v5  ;;  %vm576_vm6 = vweird.f32 %v563_v12 }
  0x95   : > { %389 = vadd.xlane.f32.xlu2 %v388_v49  ;;  %383 = vadd.xlane.f32.xlu0 %v382_v51  ;;  %v344_v53 = vpop.xlane.xlu0 %343  ;;  %v362_v55 = vmul.f32 %v1067_v23, %v347_v52  ;;  %934 = vpow2.f32 %v884_v11  ;;  %vm611_vm8 = vcmp.eq.f32.partialorder %v610_v33, 8.507059e+37  ;;  %v582_v49 = vand.u32 2147483648, %v563_v12 }
  0x96   : > { %v361_v54 = vmul.f32 %v1067_v23, %v344_v53  ;;  %v613_v48 = vor.u32 1.1754944e-38, %v612_v34  ;;  %v885_v51 = vmul.f32 -1.442695, %v1165_v38 }
  0x97   : > { %v1108_v58 = vsub.f32 %v322_v13, %v362_v55  ;;  %v882_v13 = vmul.f32 -1.442695, %v1138_v8  ;;  %v583_v2 = vor.u32 1.1754944e-38, %v582_v49 }
  0x98   : > { %v1104_v56 = vsub.f32 %v321_v14, %v361_v54  ;;  %v929_v14 = vpop.eup %928  ;;  %v580_v54 = vand.u32 2147483647, %v563_v12 }
  0x99   : > { %v378_v62 = vmul.f32 %v1108_v58, %v1108_v58  ;;  %936 = vpow2.f32 %v882_v13  ;;  %v602_v15 = vmul.f32 %v929_v14, %v565_v5  ;;  %v931_v16 = vpop.eup %930  ;;  %vm607_vm4 = vweird.f32 %v929_v14 }
  0x9a   : > { %v377_v59 = vmul.f32 %v1104_v56, %v1104_v56  ;;  %v1146_v18 = vpop.eup %932  ;;  %v1148_v19 = vadd.f32 1.0, %v931_v16  ;;  %vm1169_vm5 = vmor %vm606_vm3, %vm607_vm4  ;;  %vm1195_vm10 = vcmp.eq.f32.partialorder %v580_v54, 8.507059e+37 }
  0x9b   : > { %v400_v63 = vsel %vm323_vm1, %v378_v62, 0.0  ;;  %v935_v20 = vpop.eup %934  ;;  %v603_v21 = vsub.f32 1.0, %v602_v15  ;;  %v572_v22 = vmul.f32 %v1146_v18, %v563_v12  ;;  %vm577_vm7 = vweird.f32 %v1146_v18 }
  0x9c   : > { %v397_v61 = vsel %vm323_vm1, %v377_v59, 0.0  ;;  %938 = vrcp.f32 %v1148_v19  ;;  %v1152_v25 = vadd.f32 1.0, %v935_v20  ;;  %vm1184_vm9 = vmor %vm576_vm6, %vm577_vm7  ;;  %vm651_vm11 = vweird.f32 %v1148_v19 }
  0x9d   : > { %392 = vadd.xlane.f32.xlu0 %v391_v60  ;;  %398 = vadd.xlane.f32.xlu2 %v397_v61  ;;  %v604_v28 = vmul.f32 %v929_v14, %v603_v21  ;;  %v573_v31 = vsub.f32 1.0, %v572_v22  ;;  %v657_v16 = vand.u32 2147483648, %v1148_v19 }
  0x9e   : > { %940 = vrcp.f32 %v1152_v25  ;;  %vm621_vm13 = vweird.f32 %v1152_v25  ;;  %v625_v34 = vand.u32 2147483647, %v1152_v25 }
  0x9f   : > { %v937_v24 = vpop.eup %936  ;;  %v605_v35 = vadd.f32 %v929_v14, %v604_v28  ;;  %v574_v36 = vmul.f32 %v1146_v18, %v573_v31  ;;  %v627_v28 = vand.u32 2147483648, %v1152_v25 }
  0xa0   : > { %v1155_v27 = vadd.f32 1.0, %v937_v24  ;;  %vm626_vm7 = vcmp.eq.f32.partialorder %v625_v34, 8.507059e+37 }
  0xa1   : > { %v609_v52 = vsel %vm1169_vm5, %v929_v14, %v605_v35  ;;  %v575_v53 = vadd.f32 %v1146_v18, %v574_v36  ;;  %v628_v54 = vor.u32 1.1754944e-38, %v627_v28  ;;  %v1315_v36 = vld [vmem:[%s1509_s2] ss:$0 sm:$0xff] }
  0xa2   : > { %942 = vrcp.f32 %v1155_v27  ;;  %v1159_v32 = vpop.eup %938  ;;  %vm591_vm3 = vweird.f32 %v1155_v27  ;;  %v595_v49 = vand.u32 2147483647, %v1155_v27 }
  0xa3   : > { %944 = vpow2.f32 %v887_v26  ;;  %v647_v37 = vmul.f32 %v1159_v32, %v1148_v19  ;;  %v579_v5 = vsel %vm1184_vm9, %v1146_v18, %v575_v53  ;;  %vm652_vm12 = vweird.f32 %v1159_v32 }
  0xa4   : > { %v1167_v39 = vpop.eup %940  ;;  %946 = vpow2.f32 %v885_v51  ;;  %v655_v18 = vand.u32 2147483647, %v1148_v19  ;;  %vm1215_vm15 = vmor %vm651_vm11, %vm652_vm12  ;;  %v584_v26 = vsel %vm1195_vm10, %v583_v2, %v579_v5 }
  0xa5   : > { %401 = vadd.xlane.f32.xlu0 %v400_v63  ;;  %v648_v45 = vsub.f32 1.0, %v647_v37  ;;  %v617_v46 = vmul.f32 %v1167_v39, %v1152_v25  ;;  %v614_v63 = vsel %vm611_vm8, %v613_v48, %v609_v52  ;;  %vm622_vm14 = vweird.f32 %v1167_v39 }
  0xa6   : > { %v1221_v24 = vmul.f32 %v614_v63, %v1124_v0  ;;  %vm1227_vm2 = vmor %vm621_vm13, %vm622_vm14  ;;  %v597_v0 = vand.u32 2147483648, %v1155_v27  ;;  %vm1238_vm5 = vcmp.eq.f32.partialorder %v655_v18, 8.507059e+37  ;;  %v658_v37 = vor.u32 1.1754944e-38, %v657_v16 }
  0xa7   : > { %v618_v59 = vsub.f32 1.0, %v617_v46  ;;  %v649_v61 = vmul.f32 %v1159_v32, %v648_v45  ;;  %vm596_vm8 = vcmp.eq.f32.partialorder %v595_v49, 8.507059e+37 }
  0xa8   : > { %v1173_v43 = vpop.eup %942 }
  0xa9   : > { %v945_v47 = vpop.eup %944  ;;  %v587_v55 = vmul.f32 %v1173_v43, %v1155_v27  ;;  %v619_v13 = vmul.f32 %v1167_v39, %v618_v59  ;;  %v650_v15 = vadd.f32 %v1159_v32, %v649_v61  ;;  %vm592_vm4 = vweird.f32 %v1173_v43 }
  0xaa   : > { %v1189_v62 = vadd.f32 1.0, %v945_v47  ;;  %v947_v22 = vpop.eup %946  ;;  %vm1260_vm6 = vmor %vm591_vm3, %vm592_vm4 }
  0xab   : > { %v588_v11 = vsub.f32 1.0, %v587_v55  ;;  %v620_v19 = vadd.f32 %v1167_v39, %v619_v13  ;;  %v654_v35 = vsel %vm1215_vm15, %v1159_v32, %v650_v15  ;;  %v1264_v57 = vadd.f32 1.0, %v947_v22 }
  0xac   : > { %948 = vrcp.f32 %v1189_v62  ;;  %v659_v27 = vsel %vm1238_vm5, %v658_v37, %v654_v35  ;;  %v1285_v13 = vmul.f32 %v584_v26, %v1128_v3  ;;  %v672_v3 = vand.u32 2147483648, %v1189_v62 }
  0xad   : > { %v589_v21 = vmul.f32 %v1173_v43, %v588_v11  ;;  %v624_v53 = vsel %vm1227_vm2, %v1167_v39, %v620_v19  ;;  %v1288_v15 = vmul.f32 %v659_v27, %v1132_v6  ;;  %vm666_vm3 = vweird.f32 %v1189_v62 }
  0xae   : > { %v629_v9 = vsel %vm626_vm7, %v628_v54, %v624_v53 }
  0xaf   : > { %v590_v48 = vadd.f32 %v1173_v43, %v589_v21  ;;  %v1295_v21 = vmul.f32 %v629_v9, %v1135_v7 }
  0xb2   : > { %v1243_v25 = vpop.eup %948 }
  0xb3   : > { %vm667_vm4 = vweird.f32 %v1243_v25 }
  0xff   : > { %v387_v60 = vpop.xlane.xlu1 %386 }
 0x100   : > { %v405_v1 = vmul.f32 %v387_v60, %v1067_v23  ;;  %v381_v4 = vpop.xlane.xlu2 %380 }
 0x101   : > { %v403_v10 = vmul.f32 %v381_v4, %v1067_v23  ;;  %v594_v4 = vsel %vm1260_vm6, %v1173_v43, %v590_v48  ;;  %v1340_v48 = vld [vmem:[%s1510_s3] ss:$0 sm:$0xff] }
 0x102   : > { %v1200_v12 = vadd.f32 1e-05, %v405_v1  ;;  %v598_v1 = vor.u32 1.1754944e-38, %v597_v0  ;;  %v670_v0 = vand.u32 2147483647, %v1189_v62 }
 0x103   : > { %v1205_v14 = vadd.f32 1e-05, %v403_v10  ;;  %v662_v10 = vmul.f32 %v1243_v25, %v1189_v62 }
 0x104   : > { %950 = vrsqrt.f32 %v1200_v12  ;;  %vm445_vm9 = vweird.f32 %v1200_v12  ;;  %v599_v16 = vsel %vm596_vm8, %v598_v1, %v594_v4 }
 0x105   : > { %952 = vrsqrt.f32 %v1205_v14  ;;  %vm425_vm10 = vweird.f32 %v1205_v14  ;;  %v663_v26 = vsub.f32 1.0, %v662_v10  ;;  %v1307_v7 = vmul.f32 %v599_v16, %v1138_v8 }
 0x107   : > { %v396_v31 = vpop.xlane.xlu1 %395 }
 0x108   : > { %v408_v40 = vmul.f32 %v396_v31, %v1067_v23  ;;  %v390_v45 = vpop.xlane.xlu2 %389  ;;  %v384_v46 = vpop.xlane.xlu0 %383 }
 0x109   : > { %v406_v47 = vmul.f32 %v390_v45, %v1067_v23  ;;  %v404_v51 = vmul.f32 %v384_v46, %v1067_v23 }
 0x10a   : > { %v1249_v32 = vpop.eup %950  ;;  %v1251_v52 = vadd.f32 1e-05, %v408_v40 }
 0x10b   : > { %v953_v59 = vpop.eup %952  ;;  %v440_v60 = vmul.f32 %v1249_v32, %v1200_v12  ;;  %v1268_v61 = vadd.f32 1e-05, %v406_v47  ;;  %v1270_v63 = vadd.f32 1e-05, %v404_v51  ;;  %vm446_vm11 = vweird.f32 %v1249_v32 }
 0x10c   : > { %v420_v39 = vmul.f32 %v953_v59, %v1205_v14  ;;  %954 = vrsqrt.f32 %v1251_v52  ;;  %vm426_vm12 = vweird.f32 %v953_v59  ;;  %vm447_vm13 = vmor %vm445_vm9, %vm446_vm11  ;;  %vm475_vm14 = vweird.f32 %v1251_v52 }
 0x10d   : > { %v441_v2 = vmul.f32 %v1249_v32, %v440_v60  ;;  %956 = vrsqrt.f32 %v1268_v61  ;;  %vm455_vm15 = vweird.f32 %v1268_v61  ;;  %vm427_vm2 = vmor %vm425_vm10, %vm426_vm12  ;;  %v664_v60 = vmul.f32 %v1243_v25, %v663_v26  ;;  %v1388_v26 = vld [vmem:[%s1121_s6 + $0x38] sm:$0xff] }
 0x10e   : > { %v421_v5 = vmul.f32 %v953_v59, %v420_v39  ;;  %958 = vrsqrt.f32 %v1270_v63  ;;  %vm435_vm9 = vweird.f32 %v1270_v63  ;;  %vm1383_vm11 = vcmp.eq.f32.partialorder %v670_v0, 8.507059e+37 }
 0x10f   : > { %v442_v11 = vmul.f32 0.5, %v441_v2  ;;  %960 = vrcp.f32 %v1264_v57 }
 0x110   : > { %v422_v43 = vmul.f32 0.5, %v421_v5  ;;  %v399_v18 = vpop.xlane.xlu2 %398  ;;  %v393_v28 = vpop.xlane.xlu0 %392 }
 0x111   : > { %v443_v20 = vsub.f32 1.5, %v442_v11  ;;  %v409_v19 = vmul.f32 %v399_v18, %v1067_v23  ;;  %v407_v47 = vmul.f32 %v393_v28, %v1067_v23 }
 0x112   : > { %v1298_v22 = vpop.eup %954  ;;  %v423_v6 = vsub.f32 1.5, %v422_v43 }
 0x113   : > { %v1301_v31 = vpop.eup %956  ;;  %v444_v33 = vmul.f32 %v1249_v32, %v443_v20  ;;  %v470_v34 = vmul.f32 %v1298_v22, %v1251_v52  ;;  %vm476_vm5 = vweird.f32 %v1298_v22  ;;  %v1357_v5 = vadd.f32 1e-05, %v407_v47 }
 0x114   : > { %v1310_v35 = vpop.eup %958  ;;  %v424_v37 = vmul.f32 %v953_v59, %v423_v6  ;;  %v450_v8 = vmul.f32 %v1301_v31, %v1268_v61  ;;  %vm456_vm6 = vweird.f32 %v1301_v31  ;;  %vm477_vm8 = vmor %vm475_vm14, %vm476_vm5  ;;  %v673_v6 = vor.u32 1.1754944e-38, %v672_v3 }
 0x115   : > { %v1325_v40 = vpop.eup %960  ;;  %v448_v45 = vsel %vm447_vm13, %v1249_v32, %v444_v33  ;;  %v471_v46 = vmul.f32 %v1298_v22, %v470_v34  ;;  %v430_v12 = vmul.f32 %v1310_v35, %v1270_v63  ;;  %v1344_v32 = vadd.f32 1e-05, %v409_v19  ;;  %vm457_vm10 = vmor %vm455_vm15, %vm456_vm6 }
 0x116   : > { %v501_v49 = vmul.f32 %v448_v45, %v1071_v29  ;;  %v428_v14 = vsel %vm427_vm2, %v953_v59, %v424_v37  ;;  %v451_v51 = vmul.f32 %v1301_v31, %v450_v8  ;;  %v632_v29 = vmul.f32 %v1325_v40, %v1264_v57  ;;  %vm1411_vm14 = vmor %vm666_vm3, %vm667_vm4 }
 0x117   : > { %v499_v53 = vmul.f32 %v428_v14, %v1073_v30  ;;  %v472_v54 = vmul.f32 0.5, %v471_v46  ;;  %v431_v55 = vmul.f32 %v1310_v35, %v430_v12  ;;  %962 = vrsqrt.f32 %v1344_v32 }
 0x118   : > { %v513_v39 = vmul.f32 %v1315_v36, %v501_v49  ;;  %v452_v27 = vmul.f32 0.5, %v451_v51  ;;  %vm436_vm7 = vweird.f32 %v1310_v35  ;;  %964 = vrsqrt.f32 %v1357_v5  ;;  %v402_v19 = vpop.xlane.xlu0 %401 }
 0x119   : > { %v511_v59 = vmul.f32 %v1315_v36, %v499_v53  ;;  %v473_v1 = vsub.f32 1.5, %v472_v54  ;;  %v432_v30 = vmul.f32 0.5, %v431_v55  ;;  %vm437_vm12 = vmor %vm435_vm9, %vm436_vm7  ;;  %v633_v61 = vsub.f32 1.0, %v632_v29 }
 0x11a   : > { %v525_v2 = vadd.f32 %v1340_v48, %v513_v39  ;;  %v453_v4 = vsub.f32 1.5, %v452_v27  ;;  %vm636_vm13 = vweird.f32 %v1264_v57  ;;  %v665_v33 = vadd.f32 %v1243_v25, %v664_v60 }
 0x11b   : > { %v523_v9 = vadd.f32 %v1340_v48, %v511_v59  ;;  %v474_v10 = vmul.f32 %v1298_v22, %v473_v1  ;;  %v433_v11 = vsub.f32 1.5, %v432_v30  ;;  %vm637_vm15 = vweird.f32 %v1325_v40 }
 0x11c   : > { %v1369_v43 = vmul.f32 %v1221_v24, %v525_v2  ;;  %v454_v16 = vmul.f32 %v1301_v31, %v453_v4  ;;  %v642_v8 = vand.u32 2147483648, %v1264_v57  ;;  %v410_v45 = vmul.f32 %v402_v19, %v1067_v23  ;;  %vm1449_vm4 = vmor %vm636_vm13, %vm637_vm15 }
 0x11d   : > { %v1377_v18 = vmul.f32 %v1285_v13, %v523_v9  ;;  %v478_v20 = vsel %vm477_vm8, %v1298_v22, %v474_v10  ;;  %v434_v24 = vmul.f32 %v1310_v35, %v433_v11  ;;  %v963_v63 = vpop.eup %962  ;;  %v634_v12 = vmul.f32 %v1325_v40, %v633_v61 }
 0x11e   : > { %709 = vst.msk [vmem:[%s1363_s13 + $0x10] sm:$0xff] %vm323_vm1, %v1369_v43  ;;  %v504_v13 = vmul.f32 %v478_v20, %v1084_v41  ;;  %v458_v22 = vsel %vm457_vm10, %v1301_v31, %v454_v16  ;;  %v480_v41 = vmul.f32 %v963_v63, %v1344_v32  ;;  %v669_v49 = vsel %vm1411_vm14, %v1243_v25, %v665_v33 }
 0x11f   : > { %707 = vst.msk [vmem:[%s1363_s13] sm:$0xff] %vm323_vm1, %v1377_v18  ;;  %v502_v3 = vmul.f32 %v458_v22, %v1086_v42  ;;  %v438_v28 = vsel %vm437_vm12, %v1310_v35, %v434_v24  ;;  %v888_v42 = vmul.f32 -1.442695, %v1388_v26  ;;  %vm485_vm2 = vweird.f32 %v1344_v32 }
 0x120   : > { %v516_v31 = vmul.f32 %v1315_v36, %v504_v13  ;;  %v500_v34 = vmul.f32 %v438_v28, %v1089_v44  ;;  %v481_v37 = vmul.f32 %v963_v63, %v480_v41  ;;  %v965_v44 = vpop.eup %964  ;;  %v1433_v54 = vadd.f32 1e-05, %v410_v45 }
 0x121   : > { %v514_v35 = vmul.f32 %v1315_v36, %v502_v3  ;;  %966 = vpow2.f32 %v888_v42  ;;  %v460_v51 = vmul.f32 %v965_v44, %v1357_v5  ;;  %vm486_vm3 = vweird.f32 %v963_v63 }
 0x122   : > { %v528_v46 = vadd.f32 %v1340_v48, %v516_v31  ;;  %v512_v62 = vmul.f32 %v1315_v36, %v500_v34  ;;  %v482_v14 = vmul.f32 0.5, %v481_v37  ;;  %v640_v27 = vand.u32 2147483647, %v1264_v57  ;;  %vm487_vm5 = vmor %vm485_vm2, %vm486_vm3 }
 0x123   : > { %v526_v47 = vadd.f32 %v1340_v48, %v514_v35  ;;  %v461_v39 = vmul.f32 %v965_v44, %v460_v51  ;;  %968 = vrsqrt.f32 %v1433_v54  ;;  %v643_v30 = vor.u32 1.1754944e-38, %v642_v8 }
 0x124   : > { %v1429_v23 = vmul.f32 %v1288_v15, %v528_v46  ;;  %v524_v53 = vadd.f32 %v1340_v48, %v512_v62  ;;  %v483_v60 = vsub.f32 1.5, %v482_v14  ;;  %v635_v15 = vadd.f32 %v1325_v40, %v634_v12 }
 0x125   : > { %v702_v55 = vmul.f32 %v1295_v21, %v526_v47  ;;  %v462_v59 = vmul.f32 0.5, %v461_v39  ;;  %vm466_vm6 = vweird.f32 %v965_v44  ;;  %vm641_vm7 = vcmp.eq.f32.partialorder %v640_v27, 8.507059e+37 }
 0x126   : > { %712 = vst.msk [vmem:[%s1363_s13 + $0x28] sm:$0xff] %vm323_vm1, %v1429_v23  ;;  %v700_v25 = vmul.f32 %v1307_v7, %v524_v53  ;;  %v484_v29 = vmul.f32 %v963_v63, %v483_v60  ;;  %v674_v7 = vsel %vm1383_vm11, %v673_v6, %v669_v49  ;;  %v639_v11 = vsel %vm1449_vm4, %v1325_v40, %v635_v15 }
 0x127   : > { %710 = vst.msk [vmem:[%s1363_s13 + $0x18] sm:$0xff] %vm323_vm1, %v702_v55  ;;  %v967_v1 = vpop.eup %966  ;;  %v463_v4 = vsub.f32 1.5, %v462_v59  ;;  %vm465_vm8 = vweird.f32 %v1357_v5  ;;  %v716_v20 = vsel %vm323_vm1, %v1377_v18, 0.0  ;;  %v697_v24 = vmul.f32 %v674_v7, %v1144_v17 }
 0x128   : > { %708 = vst.msk [vmem:[%s1363_s13 + $0x8] sm:$0xff] %vm323_vm1, %v700_v25  ;;  %v488_v2 = vsel %vm487_vm5, %v963_v63, %v484_v29  ;;  %v570_v9 = vadd.f32 1.0, %v967_v1  ;;  %v717_v57 = vsel %vm323_vm1, %v700_v25, 0.0  ;;  %vm467_vm9 = vmor %vm465_vm8, %vm466_vm6  ;;  %v644_v6 = vsel %vm641_vm7, %v643_v30, %v639_v11  ;;  %v715_v1 = vld [vmem:[%s1051_s25] sm:$0x1] }
 0x129   : > { %v505_v10 = vmul.f32 %v488_v2, %v1104_v56  ;;  %v464_v16 = vmul.f32 %v965_v44, %v463_v4  ;;  %v969_v32 = vpop.eup %968  ;;  %v718_v56 = vadd.f32 %v717_v57, %v716_v20  ;;  %v719_v61 = vsel %vm323_vm1, %v1369_v43, 0.0 }
 0x12a   : > { %970 = vrcp.f32 %v570_v9  ;;  %v490_v40 = vmul.f32 %v969_v32, %v1433_v54  ;;  %v695_v17 = vmul.f32 %v644_v6, %v1165_v38  ;;  %v721_v41 = vsel %vm323_vm1, %v702_v55, 0.0 }
 0x12b   : > { %v517_v52 = vmul.f32 %v1315_v36, %v505_v10  ;;  %v468_v63 = vsel %vm467_vm9, %v965_v44, %v464_v16  ;;  %v720_v28 = vadd.f32 %v719_v61, %v718_v56  ;;  %vm681_vm10 = vweird.f32 %v570_v9 }
 0x12c   : > { %v503_v5 = vmul.f32 %v468_v63, %v1099_v50  ;;  %v491_v22 = vmul.f32 %v969_v32, %v490_v40  ;;  %v687_v34 = vand.u32 2147483648, %v570_v9  ;;  %vm496_vm11 = vweird.f32 %v969_v32 }
 0x12d   : > { %v529_v13 = vadd.f32 %v1340_v48, %v517_v52  ;;  %v685_v38 = vand.u32 2147483647, %v570_v9  ;;  %v722_v35 = vadd.f32 %v721_v41, %v720_v28  ;;  %vm495_vm13 = vweird.f32 %v1433_v54 }
 0x12e   : > { %v515_v19 = vmul.f32 %v1315_v36, %v503_v5  ;;  %v492_v33 = vmul.f32 0.5, %v491_v22  ;;  %vm497_vm14 = vmor %vm495_vm13, %vm496_vm11  ;;  %v688_v46 = vor.u32 1.1754944e-38, %v687_v34  ;;  %v725_v49 = vsel %vm323_vm1, %v1429_v23, 0.0 }
 0x12f   : > { %v705_v18 = vmul.f32 %v697_v24, %v529_v13  ;;  %vm686_vm2 = vcmp.eq.f32.partialorder %v685_v38, 8.507059e+37 }
 0x130   : > { %v971_v3 = vpop.eup %970  ;;  %v527_v31 = vadd.f32 %v1340_v48, %v515_v19  ;;  %v493_v0 = vsub.f32 1.5, %v492_v33 }
 0x131   : > { %713 = vst.msk [vmem:[%s1363_s13 + $0x30] sm:$0xff] %vm323_vm1, %v705_v18  ;;  %v677_v50 = vmul.f32 %v971_v3, %v570_v9  ;;  %vm682_vm12 = vweird.f32 %v971_v3  ;;  %v727_v39 = vsel %vm323_vm1, %v705_v18, 0.0 }
 0x132   : > { %v703_v43 = vmul.f32 %v695_v17, %v527_v31  ;;  %v494_v37 = vmul.f32 %v969_v32, %v493_v0  ;;  %vm683_vm15 = vmor %vm681_vm10, %vm682_vm12 }
 0x133   : > { %v678_v42 = vsub.f32 1.0, %v677_v50 }
 0x134   : > { %711 = vst.msk [vmem:[%s1363_s13 + $0x20] sm:$0xff] %vm323_vm1, %v703_v43  ;;  %v723_v8 = vsel %vm323_vm1, %v703_v43, 0.0  ;;  %v498_v62 = vsel %vm497_vm14, %v969_v32, %v494_v37 }
 0x135   : > { %v679_v45 = vmul.f32 %v971_v3, %v678_v42  ;;  %v724_v44 = vadd.f32 %v723_v8, %v722_v35  ;;  %v506_v47 = vmul.f32 %v498_v62, %v1108_v58 }
 0x137   : > { %v680_v12 = vadd.f32 %v971_v3, %v679_v45  ;;  %v518_v51 = vmul.f32 %v1315_v36, %v506_v47  ;;  %v726_v53 = vadd.f32 %v725_v49, %v724_v44 }
 0x139   : > { %v684_v14 = vsel %vm683_vm15, %v971_v3, %v680_v12  ;;  %v530_v60 = vadd.f32 %v1340_v48, %v518_v51  ;;  %v728_v15 = vadd.f32 %v727_v39, %v726_v53 }
 0x13a   : > { %v689_v54 = vsel %vm686_vm2, %v688_v46, %v684_v14 }
 0x13b   : > { %v698_v55 = vmul.f32 %v689_v54, %v1388_v26 }
 0x13d   : > { %v706_v25 = vmul.f32 %v698_v55, %v530_v60 }
 0x13f   : > { %714 = vst.msk [vmem:[%s1363_s13 + $0x38] sm:$0xff] %vm323_vm1, %v706_v25  ;;  %v729_v58 = vsel %vm323_vm1, %v706_v25, 0.0 }
 0x140   : > { %v730_v23 = vadd.f32 %v729_v58, %v728_v15 }
 0x142   : > { %v731_v27 = vrot.slane %v730_v23, 4 }
 0x144   : > { %v732_v29 = vadd.f32 %v731_v27, %v730_v23 }
 0x146   : > { %v733_v36 = vrot.slane %v732_v29, 2 }
 0x148   : > { %v734_v21 = vadd.f32 %v733_v36, %v732_v29 }
 0x14a   : > { %v735_v59 = vrot.slane %v734_v21, 1 }
 0x14c   : > { %v736_v7 = vadd.f32 %v735_v59, %v734_v21 }
 0x14e   : > { %v737_v26 = vadd.f32 %v736_v7, %v715_v1 }
 0x150   : > { %739 = vst.msk [vmem:[%s1051_s25] sm:$0x1] %vm313_vm0, %v737_v26 }
 0x151 PF: > { %s16_s20 = sadd.s32 1, %s994_s20   ;;  %s1533_s18 = smov %s990_s19 }
 0x152   : > { %p13_p5 = scmp.ge.s32.totalorder %s16_s20, 4   ;;  %s1534_s19 = smov %s1536_s21 }
 0x154   :  { %15 = sbr.rel (!%p13_p5) target bundleno = 2 (0x2), region = 85 }

// kernel: vss_block_forward.11
= control target key start
LH: loop header
LB: loop body
LE: loop exit
PB: predicated region body
PF: predicated region fallthrough
CT: control target
= control target key end

     0   :  { %s1731_s24 = smov 0   ;;  %s1733_s25 = smov 0   ;;  %s2064_s0 = inlined_call_operand.vmem [shape: f32[8,64,64], index: 0, kind: input, shape index: {}]   ;;  %s2065_s1 = inlined_call_operand.vmem [shape: f32[8,64,64], index: 1, kind: input, shape index: {}]   ;;  %s2066_s2 = inlined_call_operand.vmem [shape: f32[8,16,64], index: 2, kind: input, shape index: {}]   ;;  %s2067_s3 = inlined_call_operand.vmem [shape: f32[8,64,16,1], index: 3, kind: input, shape index: {}]   ;;  %s2068_s4 = inlined_call_operand.vmem [shape: f32[8,64,16,1], index: 4, kind: input, shape index: {}]   ;;  %s2069_s5 = inlined_call_operand.vmem [shape: f32[8,1,64], index: 5, kind: input, shape index: {}]   ;;  %s2070_s6 = inlined_call_operand.vmem [shape: f32[8,1,64], index: 6, kind: input, shape index: {}]   ;;  %s2071_s7 = inlined_call_operand.vmem [shape: f32[8,64,64], index: 7, kind: output, shape index: {}]  }
   0x1   :  { %s1735_s26 = smov 0  }
   0x2 LB: > { %s29_s27 = sadd.s32 1, %s1671_s25  ;;  %p1402_p0 = scmp.ge.s32.totalorder %s1675_s26, 1  ;;  %s1675_s26 = sphi %s1735_s26, %s17_s26   ;;  %s1671_s25 = sphi %s1733_s25, %s2077_s25   ;;  %s1667_s24 = sphi %s1731_s24, %s2076_s24  }
   0x3   : > { %p31_p1 = scmp.ge.s32.totalorder %s29_s27, 8  ;;  %p337_p2 = scmp.lt.s32.totalorder %s1675_s26, 9 }
   0x5   : > { %s2079_s27 = smov (%p31_p1, %s29_s27), 0  ;;  %p338_p3 = pnand %p1402_p0, %p337_p2 }
   0x6   : > { %p418_p4 = scmp.lt.s32.totalorder (!%p338_p3), %s1667_s24, 7 }
   0x7   : > { %341 = sbr.rel (%p338_p3) target bundleno = 244 (0xf4), region = 48 }
   0xc   : > { %vm484_vm0 = vcmask 523264   ;;  %v1689_v0 = vmov 0.0   ;;  %s2081_s24 = smov (!%p418_p4, %s1667_s24), 7 }
   0xd   : > { %485 = vst.msk [vmem:[#allocation2] sm:$0xff] %vm484_vm0, %v1689_v0  ;;  %s1751_s28 = sshll.u32 %s2081_s24, 6  ;;  %s1505_s29 = sshll.u32 %s2081_s24, 4 }
   0xe   : > { %486 = vst.msk [vmem:[#allocation2 + $0x8] sm:$0xff] %vm484_vm0, %v1689_v0  ;;  %s425_s9 = scalar_lea.vmem %s2064_s0, %s1751_s28  ;;  %s435_s12 = scalar_lea.vmem %s2065_s1, %s1751_s28 }
   0xf   : > { %s441_s15 = scalar_lea.vmem %s2066_s2, %s1505_s29  ;;  %s1506_s16 = sshll.u32 %s2081_s24, 10 }
  0x10   : > { %s1767_s19 = scalar_lea.vmem %s2067_s3, %s1506_s16  ;;  %s1772_s22 = scalar_lea.vmem %s2068_s4, %s1506_s16  ;;  %v1774_v1 = vld [vmem:[%s441_s15] sm:$0xff]  ;;  %v1776_v2 = vld [vmem:[%s441_s15 + $0x8] sm:$0xff] }
  0x11   : > { %s466_s8 = scalar_lea.vmem %s2069_s5, %s2081_s24  ;;  %s469_s11 = scalar_lea.vmem %s2070_s6, %s2081_s24 }
  0x12   : > { %s478_s17 = scalar_lea.vmem %s2071_s7, %s1751_s28  ;;  %v1788_v4 = vld [vmem:[%s466_s8] sm:$0x1]  ;;  %s1796_s15 = smov 0  }
  0x13   : > { %v1790_v5 = vld [vmem:[%s469_s11] sm:$0x1] }
  0x14   : > { %v491_v3 = vld [vmem:[#allocation2] sm:$0xff]  }
  0x15   : > { %v492_v6 = vld [vmem:[#allocation2 + $0x8] sm:$0xff]  }
  0x16 LB: >> { %v1690_v7 = vmov 0   ;;  %s1509_s24 = sshll.u32 %s1687_s15, 7  ;;  %s1833_s20 = sshll.u32 %s1687_s15, 3  ;;  %vm1083_vm1 = vcmask 1040384   ;;  %vm1085_vm2 = vcmask 1041408   ;;  %vm1087_vm3 = vcmask 1042432   ;;  %s1687_s15 = sphi %s1796_s15, %s498_s15   ;;  %v1683_v3 = vphi %v491_v3, %v2075_v3   ;;  %v1679_v6 = vphi %v492_v6, %v2074_v6  }
  0x17   : >> { %1576 = vset.pattern.permute.xlu2 %v1690_v7  ;;  %1575 = vset.pattern.permute.xlu1 %v1690_v7  ;;  %s1809_s16 = scalar_lea.vmem %s1772_s22, %s1509_s24  ;;  %s1812_s18 = scalar_lea.vmem %s1767_s19, %s1509_s24  ;;  %vm1089_vm4 = vcmask 1043456   ;;  %vm1091_vm5 = vcmask 1044480   ;;  %vm1093_vm6 = vcmask 1045504   ;;  %vm1095_vm7 = vcmask 1046528  }
  0x18   : >> { %1574 = vset.pattern.permute.xlu0 %v1690_v7  ;;  %v521_v8 = vld [vmem:[%s1809_s16] sm:$0xff]  ;;  %v1423_v9 = vld [vmem:[%s1812_s18 + $0x10] sm:$0xff]  ;;  %v522_v11 = vld [vmem:[%s1809_s16 + $0x8] sm:$0xff]  ;;  %s1843_s30 = scalar_lea.vmem %s435_s12, %s1833_s20  ;;  %s1888_s10 = scalar_lea.vmem %s425_s9, %s1833_s20 }
  0x19   : >> { %v518_v10 = vld [vmem:[%s1812_s18] sm:$0xff]  ;;  %550 = vperm.xlu1 %1575, %v521_v8   ;;  %606 = vperm.xlu2 %1576, %v1423_v9   ;;  %v1424_v12 = vld [vmem:[%s1812_s18 + $0x18] sm:$0xff]  ;;  %v519_v13 = vld [vmem:[%s1812_s18 + $0x8] sm:$0xff]  ;;  %s1097_s14 = scalar_lea.vmem %s478_s17, %s1833_s20  ;;  %s498_s15 = sadd.s32 1, %s1687_s15  }
  0x1a   : >> { %535 = vperm.xlu0 %1574, %v518_v10   ;;  %v1428_v14 = vld [vmem:[%s1809_s16 + $0x18] sm:$0xff]  ;;  %v1435_v15 = vld [vmem:[%s1812_s18 + $0x20] sm:$0xff]  ;;  %v1427_v16 = vld [vmem:[%s1809_s16 + $0x10] sm:$0xff]  ;;  %p495_p5 = scmp.ge.s32.totalorder %s498_s15, 8  }
  0x1b   : >> { %v1439_v17 = vld [vmem:[%s1809_s16 + $0x20] sm:$0xff]  ;;  %v1440_v18 = vld [vmem:[%s1809_s16 + $0x28] sm:$0xff]  ;;  %v1448_v20 = vld [vmem:[%s1812_s18 + $0x38] sm:$0xff] }
  0x1c   : >> { %v1436_v19 = vld [vmem:[%s1812_s18 + $0x28] sm:$0xff]  ;;  %v1451_v21 = vld [vmem:[%s1809_s16 + $0x30] sm:$0xff]  ;;  %v1459_v23 = vld [vmem:[%s1812_s18 + $0x40] sm:$0xff] }
  0x1d   : >> { %v1447_v22 = vld [vmem:[%s1812_s18 + $0x30] sm:$0xff]  ;;  %v1460_v24 = vld [vmem:[%s1812_s18 + $0x48] sm:$0xff]  ;;  %v1452_v25 = vld [vmem:[%s1809_s16 + $0x38] sm:$0xff] }
  0x1e   : >> { %v1464_v26 = vld [vmem:[%s1809_s16 + $0x48] sm:$0xff]  ;;  %v1471_v27 = vld [vmem:[%s1812_s18 + $0x50] sm:$0xff]  ;;  %v1463_v28 = vld [vmem:[%s1809_s16 + $0x40] sm:$0xff] }
  0x1f   : >> { %v505_v29 = vld [vmem:[%s1843_s30] sm:$0x1]  ;;  %v1484_v32 = vld [vmem:[%s1812_s18 + $0x68] sm:$0xff]  ;;  %v1472_v33 = vld [vmem:[%s1812_s18 + $0x58] sm:$0xff] }
  0x20   : >> { %v506_v30 = vadd.f32 %v505_v29, %v1790_v5  ;;  %v1483_v31 = vld [vmem:[%s1812_s18 + $0x60] sm:$0xff]  ;;  %v1496_v36 = vld [vmem:[%s1812_s18 + $0x78] sm:$0xff]  ;;  %v1475_v37 = vld [vmem:[%s1809_s16 + $0x50] sm:$0xff] }
  0x21   : >> { %555 = vperm.xlu1 %1575, %v522_v11   ;;  %611 = vperm.xlu2 %1576, %v1424_v12   ;;  %v1495_v38 = vld [vmem:[%s1812_s18 + $0x70] sm:$0xff]  ;;  %v1487_v40 = vld [vmem:[%s1809_s16 + $0x60] sm:$0xff]  ;;  %v1488_v41 = vld [vmem:[%s1809_s16 + $0x68] sm:$0xff] }
  0x22   : >> { %540 = vperm.xlu0 %1574, %v519_v13   ;;  %v508_v34 = vand.u32 2147483647, %v506_v30  ;;  %v1476_v42 = vld [vmem:[%s1809_s16 + $0x58] sm:$0xff]  ;;  %v1420_v43 = vld [vmem:[%s1843_s30 + $0x1] sm:$0x1]  ;;  %v1499_v48 = vld [vmem:[%s1809_s16 + $0x70] sm:$0xff] }
  0x23   : >> { %v1859_v45 = vadd.f32 %v1420_v43, %v1790_v5  ;;  %v1500_v47 = vld [vmem:[%s1809_s16 + $0x78] sm:$0xff]  ;;  %v1432_v50 = vld [vmem:[%s1843_s30 + $0x2] sm:$0x1]  ;;  %v507_v56 = vmax.f32 %v506_v30, 0.0  ;;  %v1444_v58 = vld [vmem:[%s1843_s30 + $0x3] sm:$0x1] }
  0x24   : >> { %v509_v35 = vsub.f32 0.0, %v508_v34  ;;  %v1866_v52 = vadd.f32 %v1432_v50, %v1790_v5  ;;  %v1871_v60 = vadd.f32 %v1444_v58, %v1790_v5  ;;  %v1456_v0 = vld [vmem:[%s1843_s30 + $0x4] sm:$0x1]  ;;  %v1480_v30 = vld [vmem:[%s1843_s30 + $0x6] sm:$0x1] }
  0x25   : >> { %v579_v49 = vand.u32 2147483647, %v1859_v45  ;;  %v1878_v10 = vadd.f32 %v1456_v0, %v1790_v5  ;;  %v1492_v50 = vld [vmem:[%s1843_s30 + $0x7] sm:$0x1] }
  0x26   : >> { %v510_v39 = vmul.f32 1.442695, %v509_v35  ;;  %v649_v55 = vand.u32 2147483647, %v1866_v52  ;;  %v719_v7 = vand.u32 2147483647, %v1871_v60 }
  0x27   : >> { %v580_v51 = vsub.f32 0.0, %v579_v49 }
  0x28   : >> { %1577 = vpow2.f32 %v510_v39  ;;  %v650_v59 = vsub.f32 0.0, %v649_v55  ;;  %v720_v12 = vsub.f32 0.0, %v719_v7 }
  0x29   : >> { %626 = vperm.xlu1 %1575, %v1428_v14   ;;  %676 = vperm.xlu2 %1576, %v1435_v15   ;;  %v581_v54 = vmul.f32 1.442695, %v580_v51  ;;  %v789_v14 = vand.u32 2147483647, %v1878_v10 }
  0x2a   : >> { %621 = vperm.xlu0 %1574, %v1427_v16   ;;  %v651_v63 = vmul.f32 1.442695, %v650_v59  ;;  %v1468_v16 = vld [vmem:[%s1843_s30 + $0x5] sm:$0x1] }
  0x2e   : >> { %v1578_v44 = vpop.eup %1577 }
  0x2f   : >> { %v512_v46 = vadd.f32 1.0, %v1578_v44 }
  0x31   : >> { %691 = vperm.xlu1 %1575, %v1439_v17   ;;  %696 = vperm.xlu2 %1576, %v1440_v18   ;;  %1579 = vlog2.f32 %v512_v46  ;;  %v721_v17 = vmul.f32 1.442695, %v720_v12 }
  0x32   : >> { %681 = vperm.xlu0 %1574, %v1436_v19   ;;  %1581 = vpow2.f32 %v581_v54 }
  0x33   : >> { %1583 = vpow2.f32 %v651_v63 }
  0x37   : >> { %v1580_v53 = vpop.eup %1579 }
  0x38   : >> { %v514_v57 = vmul.f32 0.6931472, %v1580_v53  ;;  %v1582_v8 = vpop.eup %1581  ;;  %v648_v53 = vmax.f32 %v1866_v52, 0.0 }
  0x39   : >> { %751 = vperm.xlu1 %1575, %v1448_v20   ;;  %761 = vperm.xlu2 %1576, %v1451_v21   ;;  %v583_v11 = vadd.f32 1.0, %v1582_v8  ;;  %v1584_v18 = vpop.eup %1583  ;;  %v790_v21 = vsub.f32 0.0, %v789_v14 }
  0x3a   : >> { %746 = vperm.xlu0 %1574, %v1447_v22   ;;  %v515_v61 = vadd.f32 %v514_v57, %v507_v56  ;;  %v1895_v22 = vld [vmem:[%s1888_s10] sm:$0x1] }
  0x3b   : >> { %1585 = vlog2.f32 %v583_v11 }
  0x3c   : >> { %v523_v9 = vperm.slane %v515_v61, 0  ;;  %1587 = vpow2.f32 %v721_v17 }
  0x3e   : >> { %v524_v13 = vmul.f32 %v523_v9, %v1774_v1  ;;  %v525_v19 = vmul.f32 %v523_v9, %v1776_v2 }
  0x40   : >> { %v526_v20 = vmul.f32 1.442695, %v524_v13 }
  0x41   : >> { %816 = vperm.xlu1 %1575, %v1459_v23   ;;  %821 = vperm.xlu2 %1576, %v1460_v24   ;;  %v1898_v23 = vadd.f32 %v1468_v16, %v1790_v5  ;;  %v653_v24 = vadd.f32 1.0, %v1584_v18 }
  0x42   : >> { %766 = vperm.xlu0 %1574, %v1452_v25   ;;  %1589 = vpow2.f32 %v526_v20  ;;  %v528_v25 = vmul.f32 1.442695, %v525_v19  ;;  %v718_v20 = vmax.f32 %v1871_v60, 0.0 }
  0x43   : >> { %v859_v29 = vand.u32 2147483647, %v1898_v23  ;;  %1591 = vlog2.f32 %v653_v24 }
  0x44   : >> { %1593 = vpow2.f32 %v528_v25 }
  0x49   : >> { %836 = vperm.xlu1 %1575, %v1464_v26   ;;  %886 = vperm.xlu2 %1576, %v1471_v27   ;;  %v1586_v26 = vpop.eup %1585  ;;  %v532_v27 = vmul.f32 %v515_v61, %v1895_v22  ;;  %v1917_v61 = vadd.f32 %v1492_v50, %v1790_v5  ;;  %v1946_v50 = vld [vmem:[%s1888_s10 + $0x2] sm:$0x1] }
  0x4a   : >> { %831 = vperm.xlu0 %1574, %v1463_v28   ;;  %v791_v28 = vmul.f32 1.442695, %v790_v21 }
  0x4b   : >> { %v999_v13 = vand.u32 2147483647, %v1917_v61 }
  0x4c   : >> { %1595 = vpow2.f32 %v791_v28 }
  0x51   : >> { %956 = vperm.xlu1 %1575, %v1483_v31   ;;  %961 = vperm.xlu2 %1576, %v1484_v32   ;;  %v578_v31 = vmax.f32 %v1859_v45, 0.0  ;;  %v585_v32 = vmul.f32 0.6931472, %v1586_v26 }
  0x52   : >> { %891 = vperm.xlu0 %1574, %v1472_v33   ;;  %v1588_v33 = vpop.eup %1587 }
  0x59   : >> { %1031 = vperm.xlu1 %1575, %v1496_v36   ;;  %901 = vperm.xlu2 %1576, %v1475_v37   ;;  %v543_v36 = vperm.slane %v532_v27, 0  ;;  %v1907_v37 = vadd.f32 %v1480_v30, %v1790_v5  ;;  %v1935_v30 = vld [vmem:[%s1888_s10 + $0x1] sm:$0x1] }
  0x5a   : >> { %1026 = vperm.xlu0 %1574, %v1495_v38   ;;  %v1590_v38 = vpop.eup %1589 }
  0x5b   : >> { %v1592_v43 = vpop.eup %1591  ;;  %v530_v44 = vmul.f32 %v1683_v3, %v1590_v38  ;;  %v929_v46 = vand.u32 2147483647, %v1907_v37 }
  0x5c   : >> { %v655_v54 = vmul.f32 0.6931472, %v1592_v43 }
  0x5d   : >> { %v930_v58 = vsub.f32 0.0, %v929_v46 }
  0x5e   : >> { %v656_v8 = vadd.f32 %v655_v54, %v648_v53 }
  0x5f   : >> { %v931_v12 = vmul.f32 1.442695, %v930_v58 }
  0x60   : >> { %v664_v19 = vperm.slane %v656_v8, 0 }
  0x61   : >> { %971 = vperm.xlu1 %1575, %v1487_v40   ;;  %976 = vperm.xlu2 %1576, %v1488_v41   ;;  %v860_v40 = vsub.f32 0.0, %v859_v29  ;;  %v586_v41 = vadd.f32 %v585_v32, %v578_v31  ;;  %v1000_v29 = vsub.f32 0.0, %v999_v13 }
  0x62   : >> { %906 = vperm.xlu0 %1574, %v1476_v42   ;;  %v723_v42 = vadd.f32 1.0, %v1588_v33  ;;  %v665_v60 = vmul.f32 %v664_v19, %v1774_v1  ;;  %v666_v33 = vmul.f32 %v664_v19, %v1776_v2 }
  0x63   : >> { %v594_v51 = vperm.slane %v586_v41, 0  ;;  %v603_v38 = vmul.f32 %v1935_v30, %v586_v41 }
  0x64   : >> { %1597 = vlog2.f32 %v723_v42  ;;  %v788_v42 = vmax.f32 %v1878_v10, 0.0 }
  0x65   : >> { %v595_v7 = vmul.f32 %v594_v51, %v1774_v1  ;;  %v596_v52 = vmul.f32 %v594_v51, %v1776_v2 }
  0x67   : >> { %v597_v17 = vmul.f32 1.442695, %v595_v7  ;;  %v599_v18 = vmul.f32 1.442695, %v596_v52 }
  0x69   : >> { %1046 = vperm.xlu1 %1575, %v1500_v47   ;;  %v1594_v47 = vpop.eup %1593 }
  0x6a   : >> { %1041 = vperm.xlu0 %1574, %v1499_v48   ;;  %v861_v48 = vmul.f32 1.442695, %v860_v40  ;;  %v1596_v49 = vpop.eup %1595  ;;  %v531_v57 = vmul.f32 %v1679_v6, %v1594_v47 }
  0x6b   : >> { %v793_v3 = vadd.f32 1.0, %v1596_v49  ;;  %v1598_v6 = vpop.eup %1597  ;;  %v614_v49 = vperm.slane %v603_v38, 0 }
  0x6c   : >> { %1599 = vpow2.f32 %v861_v48  ;;  %v725_v26 = vmul.f32 0.6931472, %v1598_v6 }
  0x6d   : >> { %1601 = vlog2.f32 %v793_v3 }
  0x6e   : >> { %1603 = vpow2.f32 %v931_v12 }
  0x6f   : >> { %1605 = vpow2.f32 %v597_v17 }
  0x70   : >> { %1607 = vpow2.f32 %v599_v18 }
  0x72   : >> { %v1600_v16 = vpop.eup %1599 }
  0x73   : >> { %v1873_v62 = vpop.permute.xlu2 %606  ;;  %v863_v31 = vadd.f32 1.0, %v1600_v16  ;;  %v1602_v32 = vpop.eup %1601 }
  0x74   : >> { %v1604_v40 = vpop.eup %1603  ;;  %v795_v43 = vmul.f32 0.6931472, %v1602_v32  ;;  %v615_v3 = vmul.f32 %v614_v49, %v1873_v62 }
  0x75   : >> { %1609 = vlog2.f32 %v863_v31  ;;  %v1606_v48 = vpop.eup %1605  ;;  %v933_v53 = vadd.f32 1.0, %v1604_v40 }
  0x76   : >> { %v1608_v41 = vpop.eup %1607  ;;  %v796_v54 = vadd.f32 %v795_v43, %v788_v42 }
  0x78   : >> { %v804_v58 = vperm.slane %v796_v54, 0 }
  0x7a   : >> { %v806_v17 = vmul.f32 %v804_v58, %v1776_v2 }
  0x7b   : >> { %v1890_v15 = vpop.permute.xlu2 %611  ;;  %v1610_v10 = vpop.eup %1609 }
  0x7c   : >> { %v616_v13 = vmul.f32 %v614_v49, %v1890_v15 }
  0x83   : >> { %v1904_v34 = vpop.permute.xlu2 %676 }
  0x8b   : >> { %v551_v35 = vpop.permute.xlu1 %550  ;;  %v1919_v63 = vpop.permute.xlu2 %696 }
  0x8c   : >> { %v536_v39 = vpop.permute.xlu0 %535 }
  0x8d   : >> { %v544_v45 = vmul.f32 %v543_v36, %v536_v39  ;;  %v1001_v39 = vmul.f32 1.442695, %v1000_v29 }
  0x8f   : >> { %v1913_v55 = vadd.f32 %v544_v45, %v530_v44  ;;  %v667_v44 = vmul.f32 1.442695, %v665_v60  ;;  %v669_v45 = vmul.f32 1.442695, %v666_v33  ;;  %1611 = vpow2.f32 %v1001_v39 }
  0x90   : >> { %v809_v60 = vmul.f32 1.442695, %v806_v17  ;;  %v998_v17 = vmax.f32 %v1917_v61, 0.0 }
  0x91   : >> { %v558_v9 = vmul.f32 %v551_v35, %v1913_v55  ;;  %1613 = vpow2.f32 %v667_v44  ;;  %v601_v7 = vmul.f32 %v1606_v48, %v1913_v55 }
  0x92   : >> { %1615 = vpow2.f32 %v669_v45 }
  0x93   : >> { %v556_v56 = vpop.permute.xlu1 %555  ;;  %v561_v21 = vsel %vm484_vm0, %v558_v9, 0.0  ;;  %v1939_v35 = vpop.permute.xlu2 %761  ;;  %1617 = vlog2.f32 %v933_v53  ;;  %v1956_v9 = vld [vmem:[%s1888_s10 + $0x3] sm:$0x1]  ;;  %v617_v55 = vadd.f32 %v615_v3, %v601_v7 }
  0x94   : >> { %v541_v59 = vpop.permute.xlu0 %540 }
  0x95   : >> { %v545_v0 = vmul.f32 %v543_v36, %v541_v59  ;;  %v726_v36 = vadd.f32 %v725_v26, %v718_v20  ;;  %v1612_v6 = vpop.eup %1611  ;;  %v805_v26 = vmul.f32 %v804_v58, %v1774_v1 }
  0x96   : >> { %v1003_v29 = vadd.f32 1.0, %v1612_v6 }
  0x97   : >> { %v547_v11 = vadd.f32 %v545_v0, %v531_v57  ;;  %v734_v47 = vperm.slane %v726_v36, 0  ;;  %v673_v57 = vmul.f32 %v1946_v50, %v656_v8  ;;  %v865_v8 = vmul.f32 0.6931472, %v1610_v10 }
  0x98   : >> { %v743_v20 = vmul.f32 %v1956_v9, %v726_v36  ;;  %v807_v42 = vmul.f32 1.442695, %v805_v26  ;;  %v928_v36 = vmax.f32 %v1907_v37, 0.0 }
  0x99   : >> { %v559_v14 = vmul.f32 %v556_v56, %v547_v11  ;;  %v736_v56 = vmul.f32 %v734_v47, %v1776_v2  ;;  %v735_v59 = vmul.f32 %v734_v47, %v1774_v1  ;;  %v602_v0 = vmul.f32 %v1608_v41, %v547_v11  ;;  %v1614_v11 = vpop.eup %1613  ;;  %v1966_v47 = vld [vmem:[%s1888_s10 + $0x4] sm:$0x1] }
  0x9a   : >> { %v684_v16 = vperm.slane %v673_v57, 0  ;;  %v671_v33 = vmul.f32 %v1614_v11, %v617_v55  ;;  %v754_v40 = vperm.slane %v743_v20, 0  ;;  %v813_v37 = vmul.f32 %v1966_v47, %v796_v54  ;;  %v1976_v20 = vld [vmem:[%s1888_s10 + $0x5] sm:$0x1] }
  0x9b   : >> { %v562_v24 = vsel %vm484_vm0, %v559_v14, 0.0  ;;  %v1928_v25 = vpop.permute.xlu1 %626  ;;  %v1953_v52 = vpop.permute.xlu2 %821  ;;  %v739_v12 = vmul.f32 1.442695, %v736_v56  ;;  %v858_v14 = vmax.f32 %v1898_v23, 0.0  ;;  %v737_v62 = vmul.f32 1.442695, %v735_v59 }
  0x9c   : >> { %v1930_v27 = vadd.f32 %v562_v24, %v561_v21  ;;  %v1932_v28 = vpop.permute.xlu0 %621  ;;  %v618_v19 = vadd.f32 %v616_v13, %v602_v0  ;;  %v1616_v24 = vpop.eup %1615  ;;  %v685_v32 = vmul.f32 %v684_v16, %v1904_v34 }
  0x9d   : >> { %1619 = vpow2.f32 %v739_v12  ;;  %v1618_v15 = vpop.eup %1617  ;;  %v866_v23 = vadd.f32 %v865_v8, %v858_v14  ;;  %v824_v8 = vperm.slane %v813_v37, 0 }
  0x9e   : >> { %1621 = vpow2.f32 %v737_v62  ;;  %v672_v39 = vmul.f32 %v1616_v24, %v618_v19  ;;  %v935_v43 = vmul.f32 0.6931472, %v1618_v15  ;;  %v687_v34 = vadd.f32 %v685_v32, %v671_v33 }
  0x9f   : >> { %v874_v38 = vperm.slane %v866_v23, 0  ;;  %1623 = vlog2.f32 %v1003_v29  ;;  %v630_v29 = vmul.f32 %v1928_v25, %v618_v19  ;;  %v629_v15 = vmul.f32 %v1932_v28, %v617_v55  ;;  %v1988_v55 = vld [vmem:[%s1888_s10 + $0x6] sm:$0x1] }
  0xa0   : >> { %1625 = vpow2.f32 %v809_v60  ;;  %v936_v10 = vadd.f32 %v935_v43, %v928_v36  ;;  %v826_v60 = vmul.f32 %v824_v8, %v1953_v52 }
  0xa1   : >> { %1627 = vpow2.f32 %v807_v42  ;;  %v875_v3 = vmul.f32 %v874_v38, %v1774_v1  ;;  %v632_v19 = vsel %vm484_vm0, %v630_v29, 0.0  ;;  %v631_v28 = vsel %vm484_vm0, %v629_v15, 0.0  ;;  %v2002_v15 = vld [vmem:[%s1888_s10 + $0x7] sm:$0x1] }
  0xa2   : >> { %v944_v0 = vperm.slane %v936_v10, 0  ;;  %v953_v37 = vmul.f32 %v1988_v55, %v936_v10 }
  0xa3   : >> { %v1943_v46 = vpop.permute.xlu1 %691  ;;  %v1620_v45 = vpop.eup %1619  ;;  %v877_v54 = vmul.f32 1.442695, %v875_v3 }
  0xa4   : >> { %v682_v51 = vpop.permute.xlu0 %681  ;;  %v1968_v48 = vpop.permute.xlu2 %886  ;;  %v946_v14 = vmul.f32 %v944_v0, %v1776_v2  ;;  %v699_v42 = vmul.f32 %v1943_v46, %v687_v34 }
  0xa5   : >> { %v686_v31 = vmul.f32 %v684_v16, %v682_v51  ;;  %v876_v51 = vmul.f32 %v874_v38, %v1776_v2  ;;  %v1622_v56 = vpop.eup %1621 }
  0xa6   : >> { %v1624_v59 = vpop.eup %1623  ;;  %v741_v12 = vmul.f32 %v1622_v56, %v687_v34  ;;  %v949_v32 = vmul.f32 1.442695, %v946_v14  ;;  %v701_v56 = vsel %vm484_vm0, %v699_v42, 0.0 }
  0xa7   : >> { %v688_v44 = vadd.f32 %v686_v31, %v672_v39  ;;  %v879_v7 = vmul.f32 1.442695, %v876_v51  ;;  %v1626_v13 = vpop.eup %1625  ;;  %v883_v39 = vmul.f32 %v1976_v20, %v866_v23 }
  0xa8   : >> { %v1628_v62 = vpop.eup %1627 }
  0xa9   : >> { %v742_v58 = vmul.f32 %v1620_v45, %v688_v44  ;;  %1629 = vpow2.f32 %v879_v7  ;;  %v700_v61 = vmul.f32 %v1919_v63, %v688_v44 }
  0xaa   : >> { %1631 = vpow2.f32 %v877_v54 }
  0xab   : >> { %v752_v18 = vpop.permute.xlu1 %751  ;;  %1633 = vpow2.f32 %v949_v32  ;;  %v702_v43 = vsel %vm484_vm0, %v700_v61, 0.0 }
  0xac   : >> { %v747_v21 = vpop.permute.xlu0 %746  ;;  %v756_v53 = vmul.f32 %v754_v40, %v752_v18  ;;  %v1005_v18 = vmul.f32 0.6931472, %v1624_v59  ;;  %v962_v31 = vpop.permute.xlu2 %961  ;;  %v703_v59 = vadd.f32 %v702_v43, %v701_v56 }
  0xad   : >> { %v755_v57 = vmul.f32 %v754_v40, %v747_v21  ;;  %v945_v40 = vmul.f32 %v944_v0, %v1774_v1 }
  0xae   : >> { %v758_v6 = vadd.f32 %v756_v53, %v742_v58  ;;  %v1006_v38 = vadd.f32 %v1005_v18, %v998_v17  ;;  %v633_v53 = vadd.f32 %v632_v19, %v631_v28  ;;  %v704_v54 = vrot.slane %v703_v59, 4 }
  0xaf   : >> { %v757_v16 = vadd.f32 %v755_v57, %v741_v12  ;;  %v1630_v63 = vpop.eup %1629  ;;  %v947_v51 = vmul.f32 1.442695, %v945_v40 }
  0xb0   : >> { %v812_v24 = vmul.f32 %v1626_v13, %v758_v6  ;;  %v1014_v23 = vperm.slane %v1006_v38, 0  ;;  %v1023_v28 = vmul.f32 %v2002_v15, %v1006_v38 }
  0xb1   : >> { %v811_v33 = vmul.f32 %v1628_v62, %v757_v16  ;;  %v769_v46 = vmul.f32 %v1939_v35, %v757_v16  ;;  %1635 = vpow2.f32 %v947_v51  ;;  %v634_v62 = vrot.slane %v633_v53, 4 }
  0xb2   : >> { %v828_v25 = vadd.f32 %v826_v60, %v812_v24  ;;  %v1016_v58 = vmul.f32 %v1014_v23, %v1776_v2  ;;  %v1015_v18 = vmul.f32 %v1014_v23, %v1774_v1 }
  0xb3   : >> { %v817_v49 = vpop.permute.xlu1 %816  ;;  %v771_v14 = vsel %vm484_vm0, %v769_v46, 0.0  ;;  %v635_v42 = vadd.f32 %v634_v62, %v633_v53 }
  0xb4   : >> { %v767_v41 = vpop.permute.xlu0 %766  ;;  %v825_v21 = vmul.f32 %v824_v8, %v817_v49  ;;  %v894_v49 = vperm.slane %v883_v39, 0  ;;  %v882_v0 = vmul.f32 %v1630_v63, %v828_v25  ;;  %v902_v13 = vpop.permute.xlu2 %901  ;;  %v964_v8 = vperm.slane %v953_v37, 0 }
  0xb5   : >> { %v770_v52 = vmul.f32 %v767_v41, %v758_v6  ;;  %v1632_v41 = vpop.eup %1631 }
  0xb6   : >> { %v827_v36 = vadd.f32 %v825_v21, %v811_v33  ;;  %v1634_v35 = vpop.eup %1633  ;;  %v1019_v21 = vmul.f32 1.442695, %v1016_v58  ;;  %v895_v24 = vmul.f32 %v894_v49, %v1968_v48  ;;  %v966_v32 = vmul.f32 %v964_v8, %v962_v31 }
  0xb7   : >> { %v772_v3 = vsel %vm484_vm0, %v770_v52, 0.0  ;;  %v1017_v33 = vmul.f32 1.442695, %v1015_v18  ;;  %v1636_v40 = vpop.eup %1635  ;;  %v564_v48 = vrot.slane %v1930_v27, 4 }
  0xb8   : >> { %v881_v16 = vmul.f32 %v1632_v41, %v827_v36  ;;  %v773_v17 = vadd.f32 %v772_v3, %v771_v14  ;;  %1637 = vpow2.f32 %v1019_v21 }
  0xb9   : >> { %1639 = vpow2.f32 %v1017_v33 }
  0xba   : >> { %v897_v60 = vadd.f32 %v895_v24, %v881_v16  ;;  %v774_v61 = vrot.slane %v773_v17, 4 }
  0xbb   : >> { %v837_v11 = vpop.permute.xlu1 %836 }
  0xbc   : >> { %v832_v26 = vpop.permute.xlu0 %831  ;;  %v840_v44 = vmul.f32 %v837_v11, %v828_v25  ;;  %v775_v63 = vadd.f32 %v774_v61, %v773_v17  ;;  %v951_v43 = vmul.f32 %v1636_v40, %v897_v60  ;;  %v909_v56 = vmul.f32 %v902_v13, %v897_v60 }
  0xbd   : >> { %v839_v45 = vmul.f32 %v832_v26, %v827_v36  ;;  %v705_v36 = vadd.f32 %v704_v54, %v703_v59 }
  0xbe   : >> { %v842_v12 = vsel %vm484_vm0, %v840_v44, 0.0  ;;  %v636_v44 = vrot.slane %v635_v42, 2  ;;  %v1638_v53 = vpop.eup %1637 }
  0xbf   : >> { %v841_v6 = vsel %vm484_vm0, %v839_v45, 0.0  ;;  %v706_v31 = vrot.slane %v705_v36, 2  ;;  %v977_v45 = vpop.permute.xlu2 %976 }
  0xc0   : >> { %v843_v11 = vadd.f32 %v842_v12, %v841_v6  ;;  %v637_v41 = vadd.f32 %v636_v44, %v635_v42 }
  0xc1   : >> { %v707_v59 = vadd.f32 %v706_v31, %v705_v36 }
  0xc2   : >> { %v844_v25 = vrot.slane %v843_v11, 4 }
  0xc3   : >> { %v957_v34 = vpop.permute.xlu1 %956 }
  0xc4   : >> { %v892_v57 = vpop.permute.xlu0 %891  ;;  %v965_v19 = vmul.f32 %v964_v8, %v957_v34  ;;  %v845_v23 = vadd.f32 %v844_v25, %v843_v11  ;;  %v565_v34 = vadd.f32 %v564_v48, %v1930_v27  ;;  %v911_v8 = vsel %vm484_vm0, %v909_v56, 0.0 }
  0xc5   : >> { %v896_v7 = vmul.f32 %v894_v49, %v892_v57  ;;  %v1034_v49 = vperm.slane %v1023_v28, 0  ;;  %v776_v57 = vrot.slane %v775_v63, 2  ;;  %v640_v25 = vmul.f32 %v1935_v30, %v1788_v4 }
  0xc6   : >> { %v967_v51 = vadd.f32 %v965_v19, %v951_v43  ;;  %v846_v3 = vrot.slane %v845_v23, 2  ;;  %v566_v17 = vrot.slane %v565_v34, 2  ;;  %v710_v48 = vmul.f32 %v1946_v50, %v1788_v4 }
  0xc7   : >> { %v898_v10 = vadd.f32 %v896_v7, %v882_v0  ;;  %v1640_v7 = vpop.eup %1639  ;;  %v777_v18 = vadd.f32 %v776_v57, %v775_v63  ;;  %v850_v56 = vmul.f32 %v1966_v47, %v1788_v4  ;;  %v920_v57 = vmul.f32 %v1976_v20, %v1788_v4 }
  0xc8   : >> { %v847_v54 = vadd.f32 %v846_v3, %v845_v23  ;;  %v1021_v21 = vmul.f32 %v1640_v7, %v967_v51  ;;  %v567_v33 = vadd.f32 %v566_v17, %v565_v34 }
  0xc9   : >> { %v952_v26 = vmul.f32 %v1634_v35, %v898_v10 }
  0xca   : >> { %v848_v19 = vrot.slane %v847_v54, 1 }
  0xcb   : >> { %v1032_v29 = vpop.permute.xlu1 %1031  ;;  %v968_v52 = vadd.f32 %v966_v32, %v952_v26 }
  0xcc   : >> { %v1027_v39 = vpop.permute.xlu0 %1026  ;;  %v1036_v12 = vmul.f32 %v1034_v49, %v1032_v29  ;;  %v708_v29 = vrot.slane %v707_v59, 1 }
  0xcd   : >> { %v980_v46 = vmul.f32 %v977_v45, %v968_v52  ;;  %v1022_v14 = vmul.f32 %v1638_v53, %v968_v52  ;;  %v1035_v13 = vmul.f32 %v1034_v49, %v1027_v39  ;;  %v778_v39 = vrot.slane %v777_v18, 1 }
  0xce   : >> { %v709_v31 = vadd.f32 %v708_v29, %v707_v59  ;;  %v780_v45 = vmul.f32 %v1956_v9, %v1788_v4  ;;  %v570_v9 = vmul.f32 %v1895_v22, %v1788_v4 }
  0xcf   : >> { %v982_v35 = vsel %vm484_vm0, %v980_v46, 0.0  ;;  %v2013_v3 = vadd.f32 %v1035_v13, %v1021_v21   ;;  %v779_v30 = vadd.f32 %v778_v39, %v777_v18 }
  0xd1   : >> { %v2073_v61 = vmov %v2013_v3  ;;  %v781_v3 = vadd.f32 %v780_v45, %v779_v30 }
  0xd2   : > { %1100 = vst.msk [vmem:[#allocation2] sm:$0xff] (%p495_p5), %vm484_vm0, %v2073_v61 }
  0xd3   : >> { %v972_v37 = vpop.permute.xlu1 %971 }
  0xd4   : >> { %v979_v38 = vmul.f32 %v972_v37, %v967_v51  ;;  %v907_v58 = vpop.permute.xlu0 %906  ;;  %v568_v51 = vrot.slane %v567_v33, 1  ;;  %v849_v37 = vadd.f32 %v848_v19, %v847_v54 }
  0xd5   : >> { %v910_v0 = vmul.f32 %v907_v58, %v898_v10  ;;  %v638_v10 = vrot.slane %v637_v41, 1 }
  0xd6   : >> { %v981_v6 = vsel %vm484_vm0, %v979_v38, 0.0  ;;  %v569_v59 = vadd.f32 %v568_v51, %v567_v33  ;;  %v851_v47 = vadd.f32 %v850_v56, %v849_v37 }
  0xd7   : >> { %v983_v16 = vadd.f32 %v982_v35, %v981_v6  ;;  %v912_v27 = vsel %vm484_vm0, %v910_v0, 0.0  ;;  %v2011_v6 = vadd.f32 %v1036_v12, %v1022_v14   ;;  %v639_v63 = vadd.f32 %v638_v10, %v637_v41 }
  0xd8   : >> { %v913_v62 = vadd.f32 %v912_v27, %v911_v8  ;;  %v711_v41 = vadd.f32 %v710_v48, %v709_v31  ;;  %v990_v12 = vmul.f32 %v1988_v55, %v1788_v4  ;;  %v571_v13 = vadd.f32 %v570_v9, %v569_v59 }
  0xd9   : >> { %v984_v11 = vrot.slane %v983_v16, 4  ;;  %v2072_v26 = vmov %v2011_v6  ;;  %v641_v34 = vadd.f32 %v640_v25, %v639_v63  ;;  %v1072_v22 = vrot.slane %v851_v47, 4 }
  0xda   : >> { %v914_v24 = vrot.slane %v913_v62, 4  ;;  %v1066_v20 = vrot.slane %v711_v41, 6  ;;  %v1060_v55 = vmul.f32 %v2002_v15, %v1788_v4  ;;  %1101 = vst.msk [vmem:[#allocation2 + $0x8] sm:$0xff] (%p495_p5), %vm484_vm0, %v2072_v26 }
  0xdb   : >> { %v985_v32 = vadd.f32 %v984_v11, %v983_v16  ;;  %v1047_v60 = vpop.permute.xlu1 %1046  ;;  %v1063_v35 = vrot.slane %v641_v34, 7  ;;  %v1069_v16 = vrot.slane %v781_v3, 5  ;;  %v2075_v3 = vmov %v2073_v61 }
  0xdc   : >> { %v915_v40 = vadd.f32 %v914_v24, %v913_v62  ;;  %v1050_v42 = vmul.f32 %v1047_v60, %v2072_v26  ;;  %v1042_v36 = vpop.permute.xlu0 %1041 }
  0xdd   : >> { %v986_v28 = vrot.slane %v985_v32, 2  ;;  %v1049_v52 = vmul.f32 %v1042_v36, %v2073_v61  ;;  %v1084_v18 = vsel %vm1083_vm1, %v571_v13, %v1063_v35 }
  0xde   : >> { %v916_v43 = vrot.slane %v915_v40, 2  ;;  %v1052_v44 = vsel %vm484_vm0, %v1050_v42, 0.0  ;;  %v1086_v11 = vsel %vm1085_vm2, %v1084_v18, %v1066_v20 }
  0xdf   : >> { %v987_v23 = vadd.f32 %v986_v28, %v985_v32  ;;  %v1051_v49 = vsel %vm484_vm0, %v1049_v52, 0.0  ;;  %v1088_v21 = vsel %vm1087_vm3, %v1086_v11, %v1069_v16 }
  0xe0   : >> { %v917_v46 = vadd.f32 %v916_v43, %v915_v40  ;;  %v1053_v53 = vadd.f32 %v1052_v44, %v1051_v49  ;;  %v1090_v24 = vsel %vm1089_vm4, %v1088_v21, %v1072_v22 }
  0xe1   : >> { %v988_v50 = vrot.slane %v987_v23, 1 }
  0xe2   : >> { %v918_v38 = vrot.slane %v917_v46, 1  ;;  %v1054_v58 = vrot.slane %v1053_v53, 4 }
  0xe3   : >> { %v989_v6 = vadd.f32 %v988_v50, %v987_v23 }
  0xe4   : >> { %v919_v0 = vadd.f32 %v918_v38, %v917_v46  ;;  %v1055_v7 = vadd.f32 %v1054_v58, %v1053_v53 }
  0xe5   : >> { %v991_v17 = vadd.f32 %v990_v12, %v989_v6  ;;  %v2074_v6 = vmov %v2072_v26 }
  0xe6   : >> { %v921_v14 = vadd.f32 %v920_v57, %v919_v0  ;;  %v1056_v8 = vrot.slane %v1055_v7, 2 }
  0xe7   : >> { %v1078_v29 = vrot.slane %v991_v17, 2 }
  0xe8   : >> { %v1057_v27 = vadd.f32 %v1056_v8, %v1055_v7  ;;  %v1075_v62 = vrot.slane %v921_v14, 3 }
  0xea   : >> { %v1058_v54 = vrot.slane %v1057_v27, 1  ;;  %v1092_v32 = vsel %vm1091_vm5, %v1090_v24, %v1075_v62 }
  0xeb   : >> { %v1094_v39 = vsel %vm1093_vm6, %v1092_v32, %v1078_v29 }
  0xec   : >> { %v1059_v10 = vadd.f32 %v1058_v54, %v1057_v27 }
  0xee   : >> { %v1061_v60 = vadd.f32 %v1060_v55, %v1059_v10 }
  0xef   : > { %497 = sbr.rel (!%p495_p5) target bundleno = 22 (0x16), region = 140 }
  0xf0   : >> { %v1081_v33 = vrot.slane %v1061_v60, 1 }
  0xf2   : >> { %v1096_v15 = vsel %vm1095_vm7, %v1094_v39, %v1081_v33 }
  0xf3   : >> { %1098 = vst.msk [vmem:[%s1097_s14] sm:$0xff] %vm484_vm0, %v1096_v15 }
  0xf4 PF: > { %s17_s26 = sadd.s32 1, %s1675_s26   ;;  %s2076_s24 = smov %s1671_s25 }
  0xf5   : > { %p14_p6 = scmp.ge.s32.totalorder %s17_s26, 10   ;;  %s2077_s25 = smov %s2079_s27 }
  0xf7   :  { %16 = sbr.rel (!%p14_p6) target bundleno = 2 (0x2), region = 151 }

// kernel: custom-call.1
= control target key start
LH: loop header
LB: loop body
LE: loop exit
PB: predicated region body
PF: predicated region fallthrough
CT: control target
= control target key end

     0   :  { %s6_s0 = inlined_call_operand.vmem [shape: f32[64,2,8], index: 0, kind: output, shape index: {}]  }

// kernel: custom-call
= control target key start
LH: loop header
LB: loop body
LE: loop exit
PB: predicated region body
PF: predicated region fallthrough
CT: control target
= control target key end

     0   :  { %s6_s0 = inlined_call_operand.vmem [shape: f32[2,8,16], index: 0, kind: output, shape index: {}]  }

// kernel: vss_block_forward.13
= control target key start
LH: loop header
LB: loop body
LE: loop exit
PB: predicated region body
PF: predicated region fallthrough
CT: control target
= control target key end

     0   :  { %9 = vsyncpa [#allocation3], 0  ;;  %s892_s0 = inlined_call_operand.vmem [shape: f32[2,64,64], index: 0, kind: input, shape index: {}]   ;;  %s893_s1 = inlined_call_operand.vmem [shape: f32[2,1,64], index: 1, kind: input, shape index: {}]   ;;  %s894_s2 = inlined_call_operand.vmem [shape: bf16[64,32], index: 2, kind: input, shape index: {}]   ;;  %s895_s3 = inlined_call_operand.vmem [shape: f32[2,64,32], index: 3, kind: input, shape index: {}]   ;;  %s896_s4 = inlined_call_operand.hbm [shape: f32[2,64,32], index: 4, kind: output, shape index: {}]  }
   0x1   :  { %11 = vsyncpa [#allocation3 + $0x1], 0  ;;  %s736_s15 = smov 0   ;;  %s738_s16 = smov 0  }
   0x2   :  { %s740_s17 = smov 0   ;;  %s742_s18 = smov 0  }
   0x3   :  { %s744_s19 = smov 0   ;;  %s746_s20 = smov 0  }
   0x4 LB: > { %s518_s21 = sadd.s32 4294967295, %s707_s20   ;;  %s519_s22 = sadd.s32 4294967294, %s707_s20   ;;  %s707_s20 = sphi %s746_s20, %s17_s20   ;;  %s703_s19 = sphi %s744_s19, %s903_s19   ;;  %s699_s18 = sphi %s742_s18, %s902_s18   ;;  %s695_s17 = sphi %s740_s17, %s901_s17   ;;  %s691_s16 = sphi %s738_s16, %s900_s16   ;;  %s687_s15 = sphi %s736_s15, %s899_s15  }
   0x5   : > { %s29_s23 = sadd.s32 1, %s703_s19  ;;  %s141_s24 = sadd.s32 1, %s695_s17 }
   0x6   : > { %p31_p0 = scmp.ge.s32.totalorder %s29_s23, 2  ;;  %p151_p1 = scmp.ne.s32.totalorder %s695_s17, %s691_s16 }
   0x7   : > { %p152_p2 = scmp.eq.s32.totalorder %s518_s21, 1  ;;  %p157_p3 = scmp.ne.s32.totalorder %s691_s16, %s687_s15 }
   0x8   : > { %s905_s23 = smov (%p31_p0, %s29_s23), 0  ;;  %p158_p5 = scmp.eq.s32.totalorder %s519_s22, 1 }
   0x9   : > { %p776_p4 = por %p152_p2, %p151_p1  ;;  %s136_s26 = ssub.s32 %s703_s19, %s905_s23 }
   0xa   : > { %p522_p6 = scmp.ge.s32.totalorder %s707_s20, 1  ;;  %p139_p7 = scmp.eq.s32.totalorder %s136_s26, 0 }
   0xb   : > { %p783_p8 = por %p158_p5, %p157_p3  ;;  %p211_p9 = scmp.lt.s32.totalorder %s707_s20, 3 }
   0xc   : > { %s789_s28 = scalar_select %p139_p7, %s695_s17, %s141_s24  }
   0xd   : > { %p212_p10 = pnand %p522_p6, %p211_p9 }
   0xe   : > { %p254_p11 = scmp.lt.s32.totalorder (!%p212_p10), %s699_s18, 1  ;;  %s250_s29 = sand.u32 (!%p212_p10), 1, %s691_s16  }
   0xf   : > { %215 = sbr.rel (%p212_p10) target bundleno = 184 (0xb8), region = 36  ;;  %s523_s9 = sshll.u32 (!%p212_p10), %s250_s29, 6 }
  0x10   : > { %s649_s30 = scalar_lea.hbm (!%p212_p10), %s896_s4, 128 }
  0x14   : > { %v558_v0 = vld [vmem:[%s894_s2 + $0x18] sm:$0xff]  ;;  %v557_v1 = vld [vmem:[%s894_s2 + $0x10] sm:$0xff]  ;;  %s799_s7 = scalar_select %p254_p11, %s699_s18, 1  ;;  %v556_v3 = vld [vmem:[%s894_s2 + $0x8] sm:$0xff]  ;;  %vm343_vm0 = vcmask 523264   ;;  %vm385_vm1 = vcmask 261120  }
  0x15   : > { %360 = vmatpush.bf16.msra.mxu0 %v558_v0  ;;  %560 = vmatpush.bf16.msra.mxu1 %v558_v0  ;;  %v555_v14 = vld [vmem:[%s894_s2] sm:$0xff] }
  0x16   : > { %561 = vmatpush.bf16.msra.mxu2 %v558_v0  ;;  %562 = vmatpush.bf16.msra.mxu3 %v558_v0  ;;  %s553_s8 = sshll.u32 %s799_s7, 6  ;;  %s265_s11 = scalar_lea.vmem %s893_s1, %s799_s7 }
  0x17   : > { %s261_s14 = scalar_lea.vmem %s892_s0, %s553_s8  ;;  %v286_v2 = vld [vmem:[%s265_s11] sm:$0x1]  ;;  %s823_s6 = scalar_lea.vmem %s895_s3, %s553_s8 }
  0x18   : > { %v287_v4 = vadd.f32 1.0, %v286_v2  ;;  %v278_v5 = vld [vmem:[%s261_s14] sm:$0xff]  ;;  %v279_v6 = vld [vmem:[%s261_s14 + $0x8] sm:$0xff]  ;;  %v280_v7 = vld [vmem:[%s261_s14 + $0x10] sm:$0xff]  ;;  %s829_s7 = scalar_lea.vmem [#allocation2], %s523_s9  ;;  %s559_s8 = sshll.u32 %s699_s18, 6 }
  0x19   : > { %361 = vmatpush.bf16.msra.mxu0 %v557_v1  ;;  %563 = vmatpush.bf16.msra.mxu1 %v557_v1  ;;  %v281_v9 = vld [vmem:[%s261_s14 + $0x18] sm:$0xff]  ;;  %v282_v10 = vld [vmem:[%s261_s14 + $0x20] sm:$0xff]  ;;  %v283_v11 = vld [vmem:[%s261_s14 + $0x28] sm:$0xff]  ;;  %s408_s12 = scalar_lea.hbm %s896_s4, %s559_s8  ;;  %s409_s18 = sshll.u32 %s829_s7, 4  ;;  %s410_s18 = int_to_ptr.vmem [resolvable:$true] %s409_s18 }
  0x1a   : > { %564 = vmatpush.bf16.msra.mxu2 %v557_v1  ;;  %565 = vmatpush.bf16.msra.mxu3 %v557_v1  ;;  %v289_v8 = vperm.slane %v287_v4, 0  ;;  %v284_v12 = vld [vmem:[%s261_s14 + $0x30] sm:$0xff]  ;;  %v285_v13 = vld [vmem:[%s261_s14 + $0x38] sm:$0xff]  ;;  %v311_v27 = vld [vmem:[%s823_s6] sm:$0xff]  ;;  %s411_s13 = sshll.u32 %s408_s12, 4  ;;  %s395_s14 = scalar_lea.sflag [#allocation3], %s250_s29  ;;  %s412_s13 = int_to_ptr.hbm [resolvable:$true] %s411_s13 }
  0x1b   : > { %v313_v28 = vld [vmem:[%s823_s6 + $0x10] sm:$0xff]  ;;  %v315_v33 = vld [vmem:[%s823_s6 + $0x20] sm:$0xff]  ;;  %v312_v35 = vld [vmem:[%s823_s6 + $0x8] sm:$0xff]  ;;  %s643_s21 = sshra.s32 %s412_s13, 4  ;;  %s644_s21 = int_to_ptr.hbm [resolvable:$true] %s643_s21 }
  0x1c   : > { %v291_v15 = vmul.f32 %v289_v8, %v278_v5  ;;  %v292_v16 = vmul.f32 %v289_v8, %v279_v6  ;;  %v293_v17 = vmul.f32 %v289_v8, %v280_v7  ;;  %v294_v18 = vmul.f32 %v289_v8, %v281_v9  ;;  %v317_v34 = vld [vmem:[%s823_s6 + $0x30] sm:$0xff]  ;;  %v314_v36 = vld [vmem:[%s823_s6 + $0x18] sm:$0xff]  ;;  %v316_v45 = vld [vmem:[%s823_s6 + $0x28] sm:$0xff]  ;;  %s645_s22 = scalar_lea.hbm %s644_s21, 64  ;;  %p650_p1 = scmp.lt.s32.totalorder %s644_s21, %s896_s4 }
  0x1d   : > { %362 = vmatpush.bf16.msra.mxu0 %v556_v3  ;;  %566 = vmatpush.bf16.msra.mxu1 %v556_v3  ;;  %v295_v19 = vmul.f32 %v289_v8, %v282_v10  ;;  %v296_v20 = vmul.f32 %v289_v8, %v283_v11  ;;  %v297_v21 = vmul.f32 %v289_v8, %v284_v12  ;;  %v318_v46 = vld [vmem:[%s823_s6 + $0x38] sm:$0xff]  ;;  %p646_p12 = scmp.ne.s32.totalorder %s644_s21, %s645_s22  ;;  %p651_p2 = scmp.lt.s32.totalorder %s649_s30, %s645_s22 }
  0x1e   : > { %567 = vmatpush.bf16.msra.mxu2 %v556_v3  ;;  %568 = vmatpush.bf16.msra.mxu3 %v556_v3  ;;  %v298_v22 = vmul.f32 %v289_v8, %v285_v13  ;;  %v299_v23 = vpack.c.bf16 %v292_v16, %v291_v15  ;;  %v300_v24 = vpack.c.bf16 %v294_v18, %v293_v17 }
  0x1f   : > { %v301_v25 = vpack.c.bf16 %v296_v20, %v295_v19  ;;  %p647_p13 = pnand %p646_p12, %p776_p4  ;;  %p652_p3 = por %p651_p2, %p650_p1 }
  0x20   : > { %v302_v26 = vpack.c.bf16 %v298_v22, %v297_v21 }
  0x21   : > { %363 = vmatpush.bf16.msra.mxu0 %v555_v14  ;;  %569 = vmatpush.bf16.msra.mxu1 %v555_v14  ;;  %p648_p0 = pneg %p647_p13 }
  0x22   : > { %570 = vmatpush.bf16.msra.mxu2 %v555_v14  ;;  %571 = vmatpush.bf16.msra.mxu3 %v555_v14 }
  0x23   : > { %p653_p5 = pnand %p652_p3, %p648_p0 }
  0x24   : > { %544 = vmatmul.msk.bf16.vlgmr.msra.gmra.mxu0 %vm343_vm0, %v299_v23  ;;  %545 = vmatmul.msk.bf16.vlgmr.msra.gmra.mxu1 %vm343_vm0, %v300_v24 }
  0x25   : > { %546 = vmatmul.msk.bf16.vlgmr.msra.gmra.mxu2 %vm343_vm0, %v301_v25  ;;  %547 = vmatmul.msk.bf16.vlgmr.msra.gmra.mxu3 %vm343_vm0, %v302_v26 }
  0xa1   : > { %v365_v29 = vpop.f32.mrf.mxu0  ;;  %v370_v30 = vpop.f32.mrf.mxu1 }
  0xa2   : > { %v366_v31 = vadd.f32 %v365_v29, %v311_v27  ;;  %v371_v32 = vadd.f32 %v370_v30, %v313_v28 }
  0xa4   : > { %386 = vst.msk [vmem:[%s829_s7] sm:$0xff] %vm385_vm1, %v366_v31 }
  0xa5   : > { %388 = vst.msk [vmem:[%s829_s7 + $0x10] sm:$0xff] %vm385_vm1, %v371_v32 }
  0xa8   : > { %v375_v37 = vpop.f32.mrf.mxu2  ;;  %v380_v38 = vpop.f32.mrf.mxu3 }
  0xa9   : > { %v376_v39 = vadd.f32 %v375_v37, %v315_v33  ;;  %v381_v40 = vadd.f32 %v380_v38, %v317_v34  ;;  %v367_v41 = vpop.f32.mrf.mxu0  ;;  %v372_v42 = vpop.f32.mrf.mxu1 }
  0xaa   : > { %v368_v43 = vadd.f32 %v367_v41, %v312_v35  ;;  %v373_v44 = vadd.f32 %v372_v42, %v314_v36 }
  0xab   : > { %390 = vst.msk [vmem:[%s829_s7 + $0x20] sm:$0xff] %vm385_vm1, %v376_v39 }
  0xac   : > { %392 = vst.msk [vmem:[%s829_s7 + $0x30] sm:$0xff] %vm385_vm1, %v381_v40 }
  0xad   : > { %387 = vst.msk [vmem:[%s829_s7 + $0x8] sm:$0xff] %vm385_vm1, %v368_v43 }
  0xae   : > { %389 = vst.msk [vmem:[%s829_s7 + $0x18] sm:$0xff] %vm385_vm1, %v373_v44 }
  0xb0   : > { %v377_v47 = vpop.f32.mrf.mxu2  ;;  %v382_v48 = vpop.f32.mrf.mxu3 }
  0xb1   : > { %v378_v49 = vadd.f32 %v377_v47, %v316_v45  ;;  %v383_v50 = vadd.f32 %v382_v48, %v318_v46 }
  0xb3   : > { %391 = vst.msk [vmem:[%s829_s7 + $0x28] sm:$0xff] %vm385_vm1, %v378_v49 }
  0xb4   : > { %393 = vst.msk [vmem:[%s829_s7 + $0x38] sm:$0xff] %vm385_vm1, %v383_v50 }
  0xb5   : > { %656 = shalt.err (!%p653_p5)
}
  0xb6   : > { %s709_s29 = smov 128   ;;  %s710_s9 = smov 8  }
  0xb7   : > { %572 = dma.vmem_to_hbm [thread:$0]  (%p776_p4), %s410_s18, 1024, %s412_s13, %s395_s14, %s709_s29, %s709_s29, %s710_s9  }
  0xb8 PF: > { %p578_p6 = scmp.ge.s32.totalorder %s707_s20, 2  ;;  %s426_s7 = sand.u32 1, %s687_s15  }
  0xb9   : > { %s427_s8 = scalar_lea.sflag [#allocation3], %s426_s7 }
  0xba   : > { %p575_p7 = pnand %p578_p6, %p783_p8 }
  0xbc   : > { %p576_p9 = pneg %p575_p7 }
  0xbe   : > { %682 = dma.done.wait (%p576_p9), %s427_s8, 1024  }
  0xbf   : > { %684 = vsyncadd (%p576_p9), %s427_s8, 4294966272  ;;  %s17_s20 = sadd.s32 1, %s707_s20   ;;  %s899_s15 = smov %s691_s16 }
  0xc0   : > { %p14_p10 = scmp.ge.s32.totalorder %s17_s20, 4   ;;  %s900_s16 = smov %s695_s17 }
  0xc1   : > { %s901_s17 = smov %s789_s28  ;;  %s902_s18 = smov %s703_s19 }
  0xc2   : > { %s903_s19 = smov %s905_s23  ;;  %16 = sbr.rel (!%p14_p10) target bundleno = 4 (0x4), region = 77 }
  0xc7   :  { %433 = vsyncpa [#allocation3], 1 }
  0xc8   :  { %435 = vsyncpa [#allocation3 + $0x1], 1 }

</bundles_post_ra>
